<compile_context>
chip_gen: v6e
topology: v6e:2x2x1
jax: 0.10.0
libtpu: 0.0.40
codegen_flags: <defaults>
</compile_context>

<pallas_src>
import functools

import jax
import jax.numpy as jnp
from jax import lax
from jax.experimental import pallas as pl
from jax.experimental.pallas import tpu as pltpu

K_TOP = 10
LANE = 128


def _adj_rows_kernel(w_row_ref, w_col_ref, out_ref, *, k):
    """One row block of the normalized adjacency.

    w_row_ref : W[rows, :]   (row_tile, npad)  -- contiguous row block
    w_col_ref : W[:, rows]   (npad, row_tile)  -- column block of the SAME
                 array; transposed in-kernel (XLU) to obtain W.T[rows, :]
                 without an HBM-materialized transpose.
    """
    tm, npad = out_ref.shape
    r0 = pl.program_id(0) * tm

    # W.T[rows, :] from the column block (XLU transpose; XLU has slack here).
    wt = jnp.transpose(w_col_ref[...])

    # Rows of S = max(A, A.T) with A = relu(W) + I.
    #   max(relu(w), relu(wt)) == relu(max(w, wt)); identity added once.
    row_ids = r0 + lax.broadcasted_iota(jnp.int32, (tm, npad), 0)
    col_ids = lax.broadcasted_iota(jnp.int32, (tm, npad), 1)
    eye = (row_ids == col_ids).astype(jnp.float32)
    m = jnp.maximum(jnp.maximum(w_row_ref[...], wt), 0.0) + eye

    # k-th largest per row with duplicates counted (== torch.topk(...)[:, -1]).
    # Iterative "knock out current max, subtract its multiplicity"; tie counting
    # via f32 equality is exact because values are copied, never recomputed.
    # Sentinel -3.0e38 is safe: every row has >= 128 entries >= 0 > sentinel.
    neg = jnp.float32(-3.0e38)
    work = m
    remaining = jnp.full((tm, 1), jnp.float32(k))
    thresh = jnp.zeros((tm, 1), jnp.float32)
    cur_max = jnp.max(work, axis=1, keepdims=True)
    for it in range(k):
        active = remaining > 0.0
        thresh = jnp.where(active, cur_max, thresh)
        hit = work == cur_max
        cnt = jnp.sum(hit.astype(jnp.float32), axis=1, keepdims=True)
        remaining = jnp.where(active, remaining - cnt, remaining)
        # Unconditional knockout: once remaining <= 0 the threshold is frozen,
        # so extra knockouts cannot change the result (drops a (tm,1)->(tm,npad)
        # broadcast + full-tile AND per iteration).
        work = jnp.where(hit, neg, work)
        if it + 1 < k:  # skip the dead row-max recompute on the last iteration
            cur_max = jnp.max(work, axis=1, keepdims=True)

    # Mask + per-row normalization: one reciprocal per ROW, then a broadcast
    # multiply, instead of a full-tile divide; single where-select for masking.
    wk = jnp.where(m >= thresh, m, 0.0)
    denom = jnp.sum(wk, axis=1, keepdims=True) + jnp.float32(1e-8)
    inv = 1.0 / denom  # (tm, 1) exact f32 reciprocal (precision-sensitive)
    out_ref[...] = (wk * inv).astype(out_ref.dtype)


def _pick_row_tile(npad):
    """Largest lane-aligned row tile whose pipelined VMEM footprint fits.

    Budget ~= (2 inputs + 1 output) x 2 pipeline buffers + ~3 live full-tile
    intermediates ~= 9 tiles of row_tile x npad f32.  Capped at ~26 MiB so the
    kernel is valid on v7x (32 MiB scoped / 64 MiB physical per TC) as well as
    v5e/v6e (128 MiB).
    """
    budget = 26 * 1024 * 1024
    tile = LANE
    for cand in (512, 256, 128):
        if npad % cand == 0 and 9 * cand * npad * 4 <= budget:
            tile = cand
            break
    # v7x shards the "parallel" row axis over 2 TensorCores: keep >= 2 grid
    # steps whenever the matrix allows it so neither TC sits idle.
    while tile > LANE and npad // tile < 2:
        tile //= 2
    return tile


def adj_model_forward(weight, k=K_TOP):
    """Pallas implementation of Adj_model.forward() for an (N, N) weight."""
    n = weight.shape[0]
    # Pad to a lane-dense multiple of 128. Zero padding is exact for this op:
    # padded entries relu to 0, never raise the (nonnegative) per-row top-k
    # threshold, contribute 0 to the masked row sum, and are sliced off below.
    npad = ((n + LANE - 1) // LANE) * LANE
    pad = npad - n
    w_p = weight.astype(jnp.float32)
    if pad:
        w_p = jnp.pad(w_p, ((0, pad), (0, pad)))

    row_tile = _pick_row_tile(npad)
    grid = (npad // row_tile,)

    # Scoped-VMEM request: 32 MiB default, raised only if the minimum tile
    # (128 rows) still needs more (very large N).
    # TODO(synk): for npad large enough that even row_tile=128 exceeds ~26 MiB,
    # a second (column) grid axis with an in-kernel running top-k merge would be
    # needed to stay inside v7x's 64 MiB physical VMEM.
    est_vmem = 9 * row_tile * npad * 4
    vmem_limit = max(32 * 1024 * 1024, min(est_vmem + (8 << 20), 100 * 1024 * 1024))

    kernel = functools.partial(_adj_rows_kernel, k=k)

    out = pl.pallas_call(
        kernel,
        out_shape=jax.ShapeDtypeStruct((npad, npad), jnp.float32),
        grid_spec=pltpu.PrefetchScalarGridSpec(
            num_scalar_prefetch=0,
            grid=grid,
            in_specs=[
                # Row block and column block of the SAME array: no HBM W.T.
                pl.BlockSpec((row_tile, npad), lambda i: (i, 0)),   # W[rows, :]
                pl.BlockSpec((npad, row_tile), lambda i: (0, i)),   # W[:, rows]
            ],
            out_specs=pl.BlockSpec((row_tile, npad), lambda i: (i, 0)),
        ),
        compiler_params=pltpu.CompilerParams(
            dimension_semantics=("parallel",),  # independent row tiles
            vmem_limit_bytes=vmem_limit,
        ),
        cost_estimate=pl.CostEstimate(
            flops=int((8 + 5 * k) * npad * npad),
            transcendentals=0,
            bytes_accessed=int(3 * npad * npad * 4),
        ),
    )(w_p, w_p)

    return out if pad == 0 else out[:n, :n]


def adj_model_ref(weight, k=K_TOP):
    """Literal JAX transcription of the PyTorch forward (reference)."""
    n = weight.shape[0]
    a = jnp.maximum(weight, 0.0) + jnp.eye(n, dtype=weight.dtype)
    upper = jnp.triu(a)
    lower = jnp.tril(a).T
    sym = jnp.maximum(upper, lower)
    sym = sym + sym.T - jnp.diag(jnp.diagonal(sym))
    topk_vals = jax.lax.top_k(sym, k)[0]
    mask = (sym >= topk_vals[:, -1:]).astype(sym.dtype)
    w_topk = sym * mask
    w_sum = jnp.sum(w_topk, axis=1, keepdims=True) + 1e-8
    return w_topk / w_sum


if __name__ == "__main__":
    key0, key1 = jax.random.split(jax.random.PRNGKey(0))

    # Case 1: small module-consistent size (module requires N >= k = 10).
    N = 16
    limit = (6.0 / (N + N)) ** 0.5  # Xavier-uniform-like init for (N, N)
    weight = jax.random.uniform(key0, (N, N), jnp.float32, -limit, limit)

    out = jax.block_until_ready(adj_model_forward(weight))
    ref = adj_model_ref(weight)
    assert out.shape == (N, N)
    assert jnp.allclose(out, ref, atol=1e-5, rtol=1e-5), "mismatch vs reference (N=16)"
    # Rows of the result are normalized weights: each row sums to ~1.
    assert jnp.allclose(jnp.sum(out, axis=1), jnp.ones((N,)), atol=1e-4)

    # Case 2: exercises padding + a 2-step grid (npad=256, row_tile=128) and the
    # column-block DMA at program_id > 0.
    N2 = 130
    limit2 = (6.0 / (N2 + N2)) ** 0.5
    weight2 = jax.random.uniform(key1, (N2, N2), jnp.float32, -limit2, limit2)
    out2 = jax.block_until_ready(adj_model_forward(weight2))
    ref2 = adj_model_ref(weight2)
    assert jnp.allclose(out2, ref2, atol=1e-5, rtol=1e-5), "mismatch vs reference (N=130)"

    print("KERNEL_OK")
</pallas_src>

<mosaic_0001>
module attributes {stable_mosaic.version = 11 : i64} {
  func.func @_adj_rows_kernel(%arg0: i32, %arg1: memref<128x128xf32, #tpu.memory_space<vmem>>, %arg2: memref<128x128xf32, #tpu.memory_space<vmem>>, %arg3: memref<128x128xf32, #tpu.memory_space<vmem>>) attributes {dimension_semantics = [#tpu.dimension_semantics<parallel>], iteration_bounds = array<i64: 1>, scalar_prefetch = 0 : i64, scratch_operands = 0 : i64, tpu.core_type = #tpu.core_type<tc>, window_params = [{transform_indices = @transform_0, window_bounds = array<i64: 128, 128>}, {transform_indices = @transform_1, window_bounds = array<i64: 128, 128>}, {transform_indices = @transform_2, window_bounds = array<i64: 128, 128>}]} {
    %c128_i32 = arith.constant 128 : i32
    %0 = arith.muli %arg0, %c128_i32 : i32
    %c0 = arith.constant 0 : index
    %c0_0 = arith.constant 0 : index
    %1 = vector.load %arg2[%c0, %c0_0] : memref<128x128xf32, #tpu.memory_space<vmem>>, vector<128x128xf32>
    %2 = tpu.transpose %1, [1, 0] : vector<128x128xf32> -> vector<128x128xf32>
    %3 = tpu.iota {dimensions = array<i32: 0>} : vector<128x128xi32>
    %4 = vector.broadcast %0 : i32 to vector<128x128xi32>
    %5 = arith.addi %4, %3 : vector<128x128xi32>
    %6 = tpu.iota {dimensions = array<i32: 1>} : vector<128x128xi32>
    %7 = arith.cmpi eq, %5, %6 : vector<128x128xi32>
    %8 = arith.extui %7 : vector<128x128xi1> to vector<128x128xi32>
    %9 = arith.sitofp %8 : vector<128x128xi32> to vector<128x128xf32>
    %c0_1 = arith.constant 0 : index
    %c0_2 = arith.constant 0 : index
    %10 = vector.load %arg1[%c0_1, %c0_2] : memref<128x128xf32, #tpu.memory_space<vmem>>, vector<128x128xf32>
    %11 = arith.maximumf %10, %2 : vector<128x128xf32>
    %cst = arith.constant 0.000000e+00 : f32
    %12 = vector.broadcast %cst : f32 to vector<128x128xf32>
    %13 = arith.maximumf %11, %12 : vector<128x128xf32>
    %14 = arith.addf %13, %9 : vector<128x128xf32>
    %cst_3 = arith.constant 1.000000e+01 : f32
    %15 = vector.broadcast %cst_3 : f32 to vector<128x1xf32>
    %cst_4 = arith.constant 0.000000e+00 : f32
    %16 = vector.broadcast %cst_4 : f32 to vector<128x1xf32>
    %cst_5 = arith.constant dense<0xFF800000> : vector<128xf32>
    %17 = vector.multi_reduction <maximumf>, %14, %cst_5 [1] : vector<128x128xf32> to vector<128xf32>
    %18 = vector.shape_cast %17 : vector<128xf32> to vector<128x1xf32>
    %cst_6 = arith.constant 0.000000e+00 : f32
    %19 = vector.broadcast %cst_6 : f32 to vector<128x1xf32>
    %20 = arith.cmpf ogt, %15, %19 : vector<128x1xf32>
    %21 = arith.select %20, %18, %16 : vector<128x1xi1>, vector<128x1xf32>
    %22 = vector.broadcast %18 : vector<128x1xf32> to vector<128x128xf32>
    %23 = arith.cmpf oeq, %14, %22 : vector<128x128xf32>
    %24 = arith.extui %23 : vector<128x128xi1> to vector<128x128xi32>
    %25 = arith.sitofp %24 : vector<128x128xi32> to vector<128x128xf32>
    %cst_7 = arith.constant dense<0.000000e+00> : vector<128xf32>
    %26 = vector.multi_reduction <add>, %25, %cst_7 [1] : vector<128x128xf32> to vector<128xf32>
    %27 = vector.shape_cast %26 : vector<128xf32> to vector<128x1xf32>
    %28 = arith.subf %15, %27 : vector<128x1xf32>
    %29 = arith.select %20, %28, %15 : vector<128x1xi1>, vector<128x1xf32>
    %cst_8 = arith.constant -3.000000e+38 : f32
    %30 = vector.broadcast %cst_8 : f32 to vector<128x128xf32>
    %31 = arith.select %23, %30, %14 : vector<128x128xi1>, vector<128x128xf32>
    %cst_9 = arith.constant dense<0xFF800000> : vector<128xf32>
    %32 = vector.multi_reduction <maximumf>, %31, %cst_9 [1] : vector<128x128xf32> to vector<128xf32>
    %33 = vector.shape_cast %32 : vector<128xf32> to vector<128x1xf32>
    %cst_10 = arith.constant 0.000000e+00 : f32
    %34 = vector.broadcast %cst_10 : f32 to vector<128x1xf32>
    %35 = arith.cmpf ogt, %29, %34 : vector<128x1xf32>
    %36 = arith.select %35, %33, %21 : vector<128x1xi1>, vector<128x1xf32>
    %37 = vector.broadcast %33 : vector<128x1xf32> to vector<128x128xf32>
    %38 = arith.cmpf oeq, %31, %37 : vector<128x128xf32>
    %39 = arith.extui %38 : vector<128x128xi1> to vector<128x128xi32>
    %40 = arith.sitofp %39 : vector<128x128xi32> to vector<128x128xf32>
    %cst_11 = arith.constant dense<0.000000e+00> : vector<128xf32>
    %41 = vector.multi_reduction <add>, %40, %cst_11 [1] : vector<128x128xf32> to vector<128xf32>
    %42 = vector.shape_cast %41 : vector<128xf32> to vector<128x1xf32>
    %43 = arith.subf %29, %42 : vector<128x1xf32>
    %44 = arith.select %35, %43, %29 : vector<128x1xi1>, vector<128x1xf32>
    %cst_12 = arith.constant -3.000000e+38 : f32
    %45 = vector.broadcast %cst_12 : f32 to vector<128x128xf32>
    %46 = arith.select %38, %45, %31 : vector<128x128xi1>, vector<128x128xf32>
    %cst_13 = arith.constant dense<0xFF800000> : vector<128xf32>
    %47 = vector.multi_reduction <maximumf>, %46, %cst_13 [1] : vector<128x128xf32> to vector<128xf32>
    %48 = vector.shape_cast %47 : vector<128xf32> to vector<128x1xf32>
    %cst_14 = arith.constant 0.000000e+00 : f32
    %49 = vector.broadcast %cst_14 : f32 to vector<128x1xf32>
    %50 = arith.cmpf ogt, %44, %49 : vector<128x1xf32>
    %51 = arith.select %50, %48, %36 : vector<128x1xi1>, vector<128x1xf32>
    %52 = vector.broadcast %48 : vector<128x1xf32> to vector<128x128xf32>
    %53 = arith.cmpf oeq, %46, %52 : vector<128x128xf32>
    %54 = arith.extui %53 : vector<128x128xi1> to vector<128x128xi32>
    %55 = arith.sitofp %54 : vector<128x128xi32> to vector<128x128xf32>
    %cst_15 = arith.constant dense<0.000000e+00> : vector<128xf32>
    %56 = vector.multi_reduction <add>, %55, %cst_15 [1] : vector<128x128xf32> to vector<128xf32>
    %57 = vector.shape_cast %56 : vector<128xf32> to vector<128x1xf32>
    %58 = arith.subf %44, %57 : vector<128x1xf32>
    %59 = arith.select %50, %58, %44 : vector<128x1xi1>, vector<128x1xf32>
    %cst_16 = arith.constant -3.000000e+38 : f32
    %60 = vector.broadcast %cst_16 : f32 to vector<128x128xf32>
    %61 = arith.select %53, %60, %46 : vector<128x128xi1>, vector<128x128xf32>
    %cst_17 = arith.constant dense<0xFF800000> : vector<128xf32>
    %62 = vector.multi_reduction <maximumf>, %61, %cst_17 [1] : vector<128x128xf32> to vector<128xf32>
    %63 = vector.shape_cast %62 : vector<128xf32> to vector<128x1xf32>
    %cst_18 = arith.constant 0.000000e+00 : f32
    %64 = vector.broadcast %cst_18 : f32 to vector<128x1xf32>
    %65 = arith.cmpf ogt, %59, %64 : vector<128x1xf32>
    %66 = arith.select %65, %63, %51 : vector<128x1xi1>, vector<128x1xf32>
    %67 = vector.broadcast %63 : vector<128x1xf32> to vector<128x128xf32>
    %68 = arith.cmpf oeq, %61, %67 : vector<128x128xf32>
    %69 = arith.extui %68 : vector<128x128xi1> to vector<128x128xi32>
    %70 = arith.sitofp %69 : vector<128x128xi32> to vector<128x128xf32>
    %cst_19 = arith.constant dense<0.000000e+00> : vector<128xf32>
    %71 = vector.multi_reduction <add>, %70, %cst_19 [1] : vector<128x128xf32> to vector<128xf32>
    %72 = vector.shape_cast %71 : vector<128xf32> to vector<128x1xf32>
    %73 = arith.subf %59, %72 : vector<128x1xf32>
    %74 = arith.select %65, %73, %59 : vector<128x1xi1>, vector<128x1xf32>
    %cst_20 = arith.constant -3.000000e+38 : f32
    %75 = vector.broadcast %cst_20 : f32 to vector<128x128xf32>
    %76 = arith.select %68, %75, %61 : vector<128x128xi1>, vector<128x128xf32>
    %cst_21 = arith.constant dense<0xFF800000> : vector<128xf32>
    %77 = vector.multi_reduction <maximumf>, %76, %cst_21 [1] : vector<128x128xf32> to vector<128xf32>
    %78 = vector.shape_cast %77 : vector<128xf32> to vector<128x1xf32>
    %cst_22 = arith.constant 0.000000e+00 : f32
    %79 = vector.broadcast %cst_22 : f32 to vector<128x1xf32>
    %80 = arith.cmpf ogt, %74, %79 : vector<128x1xf32>
    %81 = arith.select %80, %78, %66 : vector<128x1xi1>, vector<128x1xf32>
    %82 = vector.broadcast %78 : vector<128x1xf32> to vector<128x128xf32>
    %83 = arith.cmpf oeq, %76, %82 : vector<128x128xf32>
    %84 = arith.extui %83 : vector<128x128xi1> to vector<128x128xi32>
    %85 = arith.sitofp %84 : vector<128x128xi32> to vector<128x128xf32>
    %cst_23 = arith.constant dense<0.000000e+00> : vector<128xf32>
    %86 = vector.multi_reduction <add>, %85, %cst_23 [1] : vector<128x128xf32> to vector<128xf32>
    %87 = vector.shape_cast %86 : vector<128xf32> to vector<128x1xf32>
    %88 = arith.subf %74, %87 : vector<128x1xf32>
    %89 = arith.select %80, %88, %74 : vector<128x1xi1>, vector<128x1xf32>
    %cst_24 = arith.constant -3.000000e+38 : f32
    %90 = vector.broadcast %cst_24 : f32 to vector<128x128xf32>
    %91 = arith.select %83, %90, %76 : vector<128x128xi1>, vector<128x128xf32>
    %cst_25 = arith.constant dense<0xFF800000> : vector<128xf32>
    %92 = vector.multi_reduction <maximumf>, %91, %cst_25 [1] : vector<128x128xf32> to vector<128xf32>
    %93 = vector.shape_cast %92 : vector<128xf32> to vector<128x1xf32>
    %cst_26 = arith.constant 0.000000e+00 : f32
    %94 = vector.broadcast %cst_26 : f32 to vector<128x1xf32>
    %95 = arith.cmpf ogt, %89, %94 : vector<128x1xf32>
    %96 = arith.select %95, %93, %81 : vector<128x1xi1>, vector<128x1xf32>
    %97 = vector.broadcast %93 : vector<128x1xf32> to vector<128x128xf32>
    %98 = arith.cmpf oeq, %91, %97 : vector<128x128xf32>
    %99 = arith.extui %98 : vector<128x128xi1> to vector<128x128xi32>
    %100 = arith.sitofp %99 : vector<128x128xi32> to vector<128x128xf32>
    %cst_27 = arith.constant dense<0.000000e+00> : vector<128xf32>
    %101 = vector.multi_reduction <add>, %100, %cst_27 [1] : vector<128x128xf32> to vector<128xf32>
    %102 = vector.shape_cast %101 : vector<128xf32> to vector<128x1xf32>
    %103 = arith.subf %89, %102 : vector<128x1xf32>
    %104 = arith.select %95, %103, %89 : vector<128x1xi1>, vector<128x1xf32>
    %cst_28 = arith.constant -3.000000e+38 : f32
    %105 = vector.broadcast %cst_28 : f32 to vector<128x128xf32>
    %106 = arith.select %98, %105, %91 : vector<128x128xi1>, vector<128x128xf32>
    %cst_29 = arith.constant dense<0xFF800000> : vector<128xf32>
    %107 = vector.multi_reduction <maximumf>, %106, %cst_29 [1] : vector<128x128xf32> to vector<128xf32>
    %108 = vector.shape_cast %107 : vector<128xf32> to vector<128x1xf32>
    %cst_30 = arith.constant 0.000000e+00 : f32
    %109 = vector.broadcast %cst_30 : f32 to vector<128x1xf32>
    %110 = arith.cmpf ogt, %104, %109 : vector<128x1xf32>
    %111 = arith.select %110, %108, %96 : vector<128x1xi1>, vector<128x1xf32>
    %112 = vector.broadcast %108 : vector<128x1xf32> to vector<128x128xf32>
    %113 = arith.cmpf oeq, %106, %112 : vector<128x128xf32>
    %114 = arith.extui %113 : vector<128x128xi1> to vector<128x128xi32>
    %115 = arith.sitofp %114 : vector<128x128xi32> to vector<128x128xf32>
    %cst_31 = arith.constant dense<0.000000e+00> : vector<128xf32>
    %116 = vector.multi_reduction <add>, %115, %cst_31 [1] : vector<128x128xf32> to vector<128xf32>
    %117 = vector.shape_cast %116 : vector<128xf32> to vector<128x1xf32>
    %118 = arith.subf %104, %117 : vector<128x1xf32>
    %119 = arith.select %110, %118, %104 : vector<128x1xi1>, vector<128x1xf32>
    %cst_32 = arith.constant -3.000000e+38 : f32
    %120 = vector.broadcast %cst_32 : f32 to vector<128x128xf32>
    %121 = arith.select %113, %120, %106 : vector<128x128xi1>, vector<128x128xf32>
    %cst_33 = arith.constant dense<0xFF800000> : vector<128xf32>
    %122 = vector.multi_reduction <maximumf>, %121, %cst_33 [1] : vector<128x128xf32> to vector<128xf32>
    %123 = vector.shape_cast %122 : vector<128xf32> to vector<128x1xf32>
    %cst_34 = arith.constant 0.000000e+00 : f32
    %124 = vector.broadcast %cst_34 : f32 to vector<128x1xf32>
    %125 = arith.cmpf ogt, %119, %124 : vector<128x1xf32>
    %126 = arith.select %125, %123, %111 : vector<128x1xi1>, vector<128x1xf32>
    %127 = vector.broadcast %123 : vector<128x1xf32> to vector<128x128xf32>
    %128 = arith.cmpf oeq, %121, %127 : vector<128x128xf32>
    %129 = arith.extui %128 : vector<128x128xi1> to vector<128x128xi32>
    %130 = arith.sitofp %129 : vector<128x128xi32> to vector<128x128xf32>
    %cst_35 = arith.constant dense<0.000000e+00> : vector<128xf32>
    %131 = vector.multi_reduction <add>, %130, %cst_35 [1] : vector<128x128xf32> to vector<128xf32>
    %132 = vector.shape_cast %131 : vector<128xf32> to vector<128x1xf32>
    %133 = arith.subf %119, %132 : vector<128x1xf32>
    %134 = arith.select %125, %133, %119 : vector<128x1xi1>, vector<128x1xf32>
    %cst_36 = arith.constant -3.000000e+38 : f32
    %135 = vector.broadcast %cst_36 : f32 to vector<128x128xf32>
    %136 = arith.select %128, %135, %121 : vector<128x128xi1>, vector<128x128xf32>
    %cst_37 = arith.constant dense<0xFF800000> : vector<128xf32>
    %137 = vector.multi_reduction <maximumf>, %136, %cst_37 [1] : vector<128x128xf32> to vector<128xf32>
    %138 = vector.shape_cast %137 : vector<128xf32> to vector<128x1xf32>
    %cst_38 = arith.constant 0.000000e+00 : f32
    %139 = vector.broadcast %cst_38 : f32 to vector<128x1xf32>
    %140 = arith.cmpf ogt, %134, %139 : vector<128x1xf32>
    %141 = arith.select %140, %138, %126 : vector<128x1xi1>, vector<128x1xf32>
    %142 = vector.broadcast %138 : vector<128x1xf32> to vector<128x128xf32>
    %143 = arith.cmpf oeq, %136, %142 : vector<128x128xf32>
    %144 = arith.extui %143 : vector<128x128xi1> to vector<128x128xi32>
    %145 = arith.sitofp %144 : vector<128x128xi32> to vector<128x128xf32>
    %cst_39 = arith.constant dense<0.000000e+00> : vector<128xf32>
    %146 = vector.multi_reduction <add>, %145, %cst_39 [1] : vector<128x128xf32> to vector<128xf32>
    %147 = vector.shape_cast %146 : vector<128xf32> to vector<128x1xf32>
    %148 = arith.subf %134, %147 : vector<128x1xf32>
    %149 = arith.select %140, %148, %134 : vector<128x1xi1>, vector<128x1xf32>
    %cst_40 = arith.constant -3.000000e+38 : f32
    %150 = vector.broadcast %cst_40 : f32 to vector<128x128xf32>
    %151 = arith.select %143, %150, %136 : vector<128x128xi1>, vector<128x128xf32>
    %cst_41 = arith.constant dense<0xFF800000> : vector<128xf32>
    %152 = vector.multi_reduction <maximumf>, %151, %cst_41 [1] : vector<128x128xf32> to vector<128xf32>
    %153 = vector.shape_cast %152 : vector<128xf32> to vector<128x1xf32>
    %cst_42 = arith.constant 0.000000e+00 : f32
    %154 = vector.broadcast %cst_42 : f32 to vector<128x1xf32>
    %155 = arith.cmpf ogt, %149, %154 : vector<128x1xf32>
    %156 = arith.select %155, %153, %141 : vector<128x1xi1>, vector<128x1xf32>
    %157 = vector.broadcast %156 : vector<128x1xf32> to vector<128x128xf32>
    %158 = arith.cmpf oge, %14, %157 : vector<128x128xf32>
    %cst_43 = arith.constant 0.000000e+00 : f32
    %159 = vector.broadcast %cst_43 : f32 to vector<128x128xf32>
    %160 = arith.select %158, %14, %159 : vector<128x128xi1>, vector<128x128xf32>
    %cst_44 = arith.constant dense<0.000000e+00> : vector<128xf32>
    %161 = vector.multi_reduction <add>, %160, %cst_44 [1] : vector<128x128xf32> to vector<128xf32>
    %162 = vector.shape_cast %161 : vector<128xf32> to vector<128x1xf32>
    %cst_45 = arith.constant 9.99999993E-9 : f32
    %163 = vector.broadcast %cst_45 : f32 to vector<128x1xf32>
    %164 = arith.addf %162, %163 : vector<128x1xf32>
    %cst_46 = arith.constant 1.000000e+00 : f32
    %165 = vector.broadcast %cst_46 : f32 to vector<128x1xf32>
    %166 = arith.divf %165, %164 : vector<128x1xf32>
    %167 = vector.broadcast %166 : vector<128x1xf32> to vector<128x128xf32>
    %168 = arith.mulf %160, %167 : vector<128x128xf32>
    %c0_47 = arith.constant 0 : index
    %c0_48 = arith.constant 0 : index
    %169 = vector.load %arg3[%c0_47, %c0_48] : memref<128x128xf32, #tpu.memory_space<vmem>>, vector<128x128xf32>
    tpu.vector_store %arg3[%c0_47, %c0_48], %168 {strides = array<i32>} : memref<128x128xf32, #tpu.memory_space<vmem>>, vector<128x128xf32>,
    return
  }
  func.func @transform_0(%arg0: i32) -> (i32, i32) {
    %c0_i32 = arith.constant 0 : i32
    %c0_i32_0 = arith.constant 0 : i32
    return %arg0, %c0_i32 : i32, i32
  }
  func.func @transform_1(%arg0: i32) -> (i32, i32) {
    %c0_i32 = arith.constant 0 : i32
    %c0_i32_0 = arith.constant 0 : i32
    return %c0_i32, %arg0 : i32, i32
  }
  func.func @transform_2(%arg0: i32) -> (i32, i32) {
    %c0_i32 = arith.constant 0 : i32
    %c0_i32_0 = arith.constant 0 : i32
    return %arg0, %c0_i32 : i32, i32
  }
}

</mosaic_0001>

<bundles_post_ra>
// kernel: tpu_custom_call.1
= control target key start
LH: loop header
LB: loop body
LE: loop exit
PB: predicated region body
PF: predicated region fallthrough
CT: control target
= control target key end

     0   :  { %7 = vsyncpa [#allocation3], 0  ;;  %s5596_s0 = inlined_call_operand.hbm [shape: f32[128,128], index: 0, kind: input, shape index: {}]   ;;  %s5597_s1 = inlined_call_operand.hbm [shape: f32[128,128], index: 1, kind: input, shape index: {}]   ;;  %s5598_s2 = inlined_call_operand.hbm [shape: f32[128,128], index: 2, kind: output, shape index: {}]  }
   0x1   :  { %8 = vsyncpa [#allocation6], 0 }
   0x2   :  { %9 = vsyncpa [#allocation4], 0  ;;  %s2440_s9 = smov [#allocation2]  }
   0x3   :  { %s15_s10 = sshll.u32 %s2440_s9, 4  ;;  %s16_s10 = int_to_ptr.vmem [resolvable:$true] %s15_s10 }
   0x4   :  { %s2382_s11 = scalar_lea.vmem %s16_s10, 2048  ;;  %p2387_p1 = scmp.lt.s32.totalorder %s16_s10, %s16_s10 }
   0x5   :  { %p2383_p0 = scmp.ne.s32.totalorder %s16_s10, %s2382_s11  ;;  %p2388_p2 = scmp.lt.s32.totalorder %s2382_s11, %s2382_s11 }
   0x7   :  { %p2389_p3 = por %p2388_p2, %p2387_p1 }
   0x9   :  { %p2390_p4 = pnand %p2389_p3, %p2383_p0 }
   0xb   :  { %2393 = shalt.err (!%p2390_p4)
}
   0xc   :  { %s2441_s12 = smov 128   ;;  %s2442_s13 = smov 8  }
   0xd   :  { %21 = dma.hbm_to_vmem [thread:$0]  %s5596_s0, 2048, %s16_s10, [#allocation3], %s2441_s12, %s2441_s12, %s2442_s13  }
   0xe   :  { %s2443_s16 = smov [#allocation5]  }
   0xf   :  { %s27_s17 = sshll.u32 %s2443_s16, 4  ;;  %s28_s17 = int_to_ptr.vmem [resolvable:$true] %s27_s17 }
  0x10   :  { %s2402_s18 = scalar_lea.vmem %s28_s17, 2048  ;;  %p2407_p6 = scmp.lt.s32.totalorder %s28_s17, %s28_s17 }
  0x11   :  { %p2403_p5 = scmp.ne.s32.totalorder %s28_s17, %s2402_s18  ;;  %p2408_p7 = scmp.lt.s32.totalorder %s2402_s18, %s2402_s18 }
  0x13   :  { %p2409_p8 = por %p2408_p7, %p2407_p6 }
  0x15   :  { %p2410_p9 = pnand %p2409_p8, %p2403_p5 }
  0x17   :  { %2413 = shalt.err (!%p2410_p9)
}
  0x18   :  { %33 = dma.hbm_to_vmem [thread:$0]  %s5597_s1, 2048, %s28_s17, [#allocation6], %s2441_s12, %s2441_s12, %s2442_s13  }
  0x19   :  { %2434 = dma.done.wait [#allocation3], 2048  }
  0x1a   :  { %2435 = vsyncadd [#allocation3], 4294965248 }
  0x1b   :  { %2436 = dma.done.wait [#allocation6], 2048  }
  0x1c   :  { %2437 = vsyncadd [#allocation6], 4294965248  ;;  %v41_v0 = vld [vmem:[#allocation5] sm:$0xff]  ;;  %v42_v1 = vld [vmem:[#allocation5 + $0x8] sm:$0xff]  ;;  %v89_v16 = vlaneseq  ;;  %v5605_v23 = vmov 0.0   ;;  %s2445_s0 = smov [#allocation7]  }
  0x1d   :  { %57 = vxpose.xlu0.b32.start [1/16] %v41_v0, 128  ;;  %v43_v2 = vld [vmem:[#allocation5 + $0x10] sm:$0xff]  ;;  %v44_v3 = vld [vmem:[#allocation5 + $0x18] sm:$0xff]  ;;  %v45_v4 = vld [vmem:[#allocation5 + $0x20] sm:$0xff]  ;;  %s2163_s1 = sshll.u32 %s2445_s0, 4  ;;  %s2164_s1 = int_to_ptr.vmem [resolvable:$true] %s2163_s1 }
  0x1e   :  { %v46_v5 = vld [vmem:[#allocation5 + $0x28] sm:$0xff]  ;;  %v47_v6 = vld [vmem:[#allocation5 + $0x30] sm:$0xff]  ;;  %v48_v7 = vld [vmem:[#allocation5 + $0x38] sm:$0xff]  ;;  %v2473_v17 = vshrl.u32 %v89_v16, 7  ;;  %v2475_v18 = vand.u32 127, %v89_v16  ;;  %s2414_s21 = scalar_lea.vmem %s2164_s1, 2048  ;;  %p2419_p11 = scmp.lt.s32.totalorder %s2164_s1, %s2164_s1 }
  0x1f   :  { %v49_v8 = vld [vmem:[#allocation5 + $0x40] sm:$0xff]  ;;  %v50_v9 = vld [vmem:[#allocation5 + $0x48] sm:$0xff]  ;;  %v51_v10 = vld [vmem:[#allocation5 + $0x50] sm:$0xff]  ;;  %p2415_p10 = scmp.ne.s32.totalorder %s2164_s1, %s2414_s21  ;;  %p2420_p12 = scmp.lt.s32.totalorder %s2414_s21, %s2414_s21 }
  0x20   :  { %v52_v11 = vld [vmem:[#allocation5 + $0x58] sm:$0xff]  ;;  %v53_v12 = vld [vmem:[#allocation5 + $0x60] sm:$0xff]  ;;  %v54_v13 = vld [vmem:[#allocation5 + $0x68] sm:$0xff]  ;;  %vm125_vm0 = vcmp.eq.s32.totalorder %v2473_v17, %v2475_v18  ;;  %v91_v20 = vadd.s32 8, %v2473_v17  ;;  %v92_v27 = vadd.s32 16, %v2473_v17  ;;  %v93_v34 = vadd.s32 24, %v2473_v17 }
  0x21   :  { %58 = vxpose.xlu0.b32.cont [2/16] %v42_v1, 128  ;;  %v55_v14 = vld [vmem:[#allocation5 + $0x70] sm:$0xff]  ;;  %v56_v15 = vld [vmem:[#allocation5 + $0x78] sm:$0xff]  ;;  %v173_v19 = vld [vmem:[#allocation2] sm:$0xff]  ;;  %v2176_v24 = vsel %vm125_vm0, 1.0, %v5605_v23  ;;  %v94_v41 = vadd.s32 32, %v2473_v17  ;;  %v95_v48 = vadd.s32 40, %v2473_v17  ;;  %p2421_p13 = por %p2420_p12, %p2419_p11 }
  0x22   :  { %v174_v25 = vld [vmem:[#allocation2 + $0x8] sm:$0xff]  ;;  %vm126_vm1 = vcmp.eq.s32.totalorder %v91_v20, %v2475_v18  ;;  %v175_v32 = vld [vmem:[#allocation2 + $0x10] sm:$0xff]  ;;  %vm127_vm2 = vcmp.eq.s32.totalorder %v92_v27, %v2475_v18  ;;  %v176_v39 = vld [vmem:[#allocation2 + $0x18] sm:$0xff]  ;;  %vm128_vm3 = vcmp.eq.s32.totalorder %v93_v34, %v2475_v18  ;;  %v96_v55 = vadd.s32 48, %v2473_v17 }
  0x23   :  { %v2177_v31 = vsel %vm126_vm1, 1.0, %v5605_v23  ;;  %v2178_v38 = vsel %vm127_vm2, 1.0, %v5605_v23  ;;  %v2179_v45 = vsel %vm128_vm3, 1.0, %v5605_v23  ;;  %v177_v46 = vld [vmem:[#allocation2 + $0x20] sm:$0xff]  ;;  %vm129_vm4 = vcmp.eq.s32.totalorder %v94_v41, %v2475_v18  ;;  %v178_v53 = vld [vmem:[#allocation2 + $0x28] sm:$0xff]  ;;  %v179_v60 = vld [vmem:[#allocation2 + $0x30] sm:$0xff]  ;;  %p2422_p0 = pnand %p2421_p13, %p2415_p10 }
  0x24   :  { %v2180_v52 = vsel %vm129_vm4, 1.0, %v5605_v23  ;;  %vm130_vm5 = vcmp.eq.s32.totalorder %v95_v48, %v2475_v18  ;;  %vm131_vm6 = vcmp.eq.s32.totalorder %v96_v55, %v2475_v18  ;;  %v97_v62 = vadd.s32 56, %v2473_v17  ;;  %v183_v27 = vld [vmem:[#allocation2 + $0x50] sm:$0xff] }
  0x25   :  { %59 = vxpose.xlu0.b32.cont [3/16] %v43_v2, 128  ;;  %v2181_v59 = vsel %vm130_vm5, 1.0, %v5605_v23  ;;  %v2182_v2 = vsel %vm131_vm6, 1.0, %v5605_v23 }
  0x26   :  { %vm132_vm7 = vcmp.eq.s32.totalorder %v97_v62, %v2475_v18  ;;  %v105_v62 = vadd.s32 120, %v2473_v17 }
  0x28   :  { %vm140_vm15 = vcmp.eq.s32.totalorder %v105_v62, %v2475_v18 }
  0x29   :  { %60 = vxpose.xlu0.b32.cont [4/16] %v44_v3, 128  ;;  %v180_v3 = vld [vmem:[#allocation2 + $0x38] sm:$0xff] }
  0x2d   :  { %61 = vxpose.xlu0.b32.cont [5/16] %v45_v4, 128 }
  0x31   :  { %62 = vxpose.xlu0.b32.cont [6/16] %v46_v5, 128  ;;  %v98_v5 = vadd.s32 64, %v2473_v17 }
  0x33   :  { %vm133_vm8 = vcmp.eq.s32.totalorder %v98_v5, %v2475_v18 }
  0x34   :  { %v2184_v16 = vsel %vm133_vm8, 1.0, %v5605_v23 }
  0x35   :  { %63 = vxpose.xlu0.b32.cont [7/16] %v47_v6, 128 }
  0x39   :  { %64 = vxpose.xlu0.b32.cont [8/16] %v48_v7, 128 }
  0x3d   :  { %65 = vxpose.xlu0.b32.cont [9/16] %v49_v8, 128 }
  0x41   :  { %66 = vxpose.xlu0.b32.cont [10/16] %v50_v9, 128  ;;  %v2183_v9 = vsel %vm132_vm7, 1.0, %v5605_v23 }
  0x45   :  { %67 = vxpose.xlu0.b32.cont [11/16] %v51_v10, 128  ;;  %v181_v10 = vld [vmem:[#allocation2 + $0x40] sm:$0xff] }
  0x49   :  { %68 = vxpose.xlu0.b32.cont [12/16] %v52_v11, 128 }
  0x4d   :  { %69 = vxpose.xlu0.b32.cont [13/16] %v53_v12, 128  ;;  %v99_v12 = vadd.s32 72, %v2473_v17 }
  0x4f   :  { %vm134_vm9 = vcmp.eq.s32.totalorder %v99_v12, %v2475_v18 }
  0x51   :  { %70 = vxpose.xlu0.b32.cont [14/16] %v54_v13, 128 }
  0x55   :  { %71 = vxpose.xlu0.b32.cont [15/16] %v55_v14, 128 }
  0x59   :  { %72 = vxpose.xlu0.b32.end [16/16] %v56_v15, 128 }
  0x99   :  { %v73_v21 = vpop.trf.xlu0 }
  0x9a   :  { %v189_v22 = vmax.f32 %v173_v19, %v73_v21  ;;  %v182_v19 = vld [vmem:[#allocation2 + $0x48] sm:$0xff]  ;;  %v100_v21 = vadd.s32 80, %v2473_v17 }
  0x9c   :  { %v205_v26 = vmax.f32 %v189_v22, 0.0  ;;  %vm135_vm10 = vcmp.eq.s32.totalorder %v100_v21, %v2475_v18 }
  0x9d   :  { %v74_v28 = vpop.trf.xlu0  ;;  %v2186_v34 = vsel %vm135_vm10, 1.0, %v5605_v23 }
  0x9e   :  { %v2483_v29 = vadd.f32 %v2176_v24, %v205_v26  ;;  %v190_v30 = vmax.f32 %v174_v25, %v74_v28  ;;  %v2185_v26 = vsel %vm134_vm9, 1.0, %v5605_v23 }
  0xa0   :  { %5817 = vst [vmem:[#allocation11_spill] sm:$0xff] %v2483_v29  ;;  %v206_v33 = vmax.f32 %v190_v30, 0.0  ;;  %237 = vmax.xlane.f32.xlu1 %v2483_v29  ;;  %v101_v30 = vadd.s32 88, %v2473_v17 }
  0xa1   :  { %v75_v35 = vpop.trf.xlu0 }
  0xa2   :  { %v2489_v36 = vadd.f32 %v2177_v31, %v206_v33  ;;  %v191_v37 = vmax.f32 %v175_v32, %v75_v35  ;;  %v184_v35 = vld [vmem:[#allocation2 + $0x58] sm:$0xff]  ;;  %vm136_vm11 = vcmp.eq.s32.totalorder %v101_v30, %v2475_v18 }
  0xa4   :  { %5818 = vst [vmem:[#allocation12_spill] sm:$0xff] %v2489_v36  ;;  %v207_v40 = vmax.f32 %v191_v37, 0.0  ;;  %239 = vmax.xlane.f32.xlu1 %v2489_v36 }
  0xa5   :  { %v76_v42 = vpop.trf.xlu0 }
  0xa6   :  { %v2495_v43 = vadd.f32 %v2178_v38, %v207_v40  ;;  %v192_v44 = vmax.f32 %v176_v39, %v76_v42  ;;  %v102_v38 = vadd.s32 96, %v2473_v17  ;;  %v2187_v42 = vsel %vm136_vm11, 1.0, %v5605_v23 }
  0xa8   :  { %5819 = vst [vmem:[#allocation13_spill] sm:$0xff] %v2495_v43  ;;  %v208_v47 = vmax.f32 %v192_v44, 0.0  ;;  %241 = vmax.xlane.f32.xlu1 %v2495_v43  ;;  %v185_v44 = vld [vmem:[#allocation2 + $0x60] sm:$0xff]  ;;  %vm137_vm12 = vcmp.eq.s32.totalorder %v102_v38, %v2475_v18 }
  0xa9   :  { %v77_v49 = vpop.trf.xlu0 }
  0xaa   :  { %v2501_v50 = vadd.f32 %v2179_v45, %v208_v47  ;;  %v193_v51 = vmax.f32 %v177_v46, %v77_v49  ;;  %v103_v46 = vadd.s32 104, %v2473_v17 }
  0xac   :  { %5820 = vst [vmem:[#allocation14_spill] sm:$0xff] %v2501_v50  ;;  %v209_v54 = vmax.f32 %v193_v51, 0.0  ;;  %243 = vmax.xlane.f32.xlu1 %v2501_v50  ;;  %v2188_v51 = vsel %vm137_vm12, 1.0, %v5605_v23  ;;  %vm138_vm13 = vcmp.eq.s32.totalorder %v103_v46, %v2475_v18 }
  0xad   :  { %v78_v56 = vpop.trf.xlu0 }
  0xae   :  { %v2507_v57 = vadd.f32 %v2180_v52, %v209_v54  ;;  %v194_v58 = vmax.f32 %v178_v53, %v78_v56  ;;  %v186_v52 = vld [vmem:[#allocation2 + $0x68] sm:$0xff]  ;;  %v104_v54 = vadd.s32 112, %v2473_v17 }
  0xb0   :  { %5821 = vst [vmem:[#allocation15_spill] sm:$0xff] %v2507_v57  ;;  %v210_v61 = vmax.f32 %v194_v58, 0.0  ;;  %245 = vmax.xlane.f32.xlu1 %v2507_v57  ;;  %vm139_vm14 = vcmp.eq.s32.totalorder %v104_v54, %v2475_v18 }
  0xb1   :  { %v79_v63 = vpop.trf.xlu0 }
  0xb2   :  { %v2513_v0 = vadd.f32 %v2181_v59, %v210_v61  ;;  %v195_v1 = vmax.f32 %v179_v60, %v79_v63  ;;  %v2189_v59 = vsel %vm138_vm13, 1.0, %v5605_v23  ;;  %v187_v60 = vld [vmem:[#allocation2 + $0x70] sm:$0xff] }
  0xb4   :  { %5822 = vst [vmem:[#allocation16_spill] sm:$0xff] %v2513_v0  ;;  %v211_v4 = vmax.f32 %v195_v1, 0.0  ;;  %247 = vmax.xlane.f32.xlu1 %v2513_v0 }
  0xb5   :  { %v80_v6 = vpop.trf.xlu0 }
  0xb6   :  { %v2519_v7 = vadd.f32 %v2182_v2, %v211_v4  ;;  %v196_v8 = vmax.f32 %v180_v3, %v80_v6  ;;  %v2190_v3 = vsel %vm139_vm14, 1.0, %v5605_v23  ;;  %v188_v4 = vld [vmem:[#allocation2 + $0x78] sm:$0xff] }
  0xb8   :  { %5823 = vst [vmem:[#allocation17_spill] sm:$0xff] %v2519_v7  ;;  %v212_v11 = vmax.f32 %v196_v8, 0.0  ;;  %249 = vmax.xlane.f32.xlu1 %v2519_v7 }
  0xb9   :  { %v81_v13 = vpop.trf.xlu0 }
  0xba   :  { %v2525_v14 = vadd.f32 %v2183_v9, %v212_v11  ;;  %v197_v15 = vmax.f32 %v181_v10, %v81_v13  ;;  %v2191_v10 = vsel %vm140_vm15, 1.0, %v5605_v23 }
  0xbc   :  { %5824 = vst [vmem:[#allocation18_spill] sm:$0xff] %v2525_v14  ;;  %v213_v20 = vmax.f32 %v197_v15, 0.0  ;;  %251 = vmax.xlane.f32.xlu1 %v2525_v14 }
  0xbd   :  { %v82_v22 = vpop.trf.xlu0 }
  0xbe   :  { %v2531_v24 = vadd.f32 %v2184_v16, %v213_v20  ;;  %v198_v25 = vmax.f32 %v182_v19, %v82_v22 }
  0xc0   :  { %5825 = vst [vmem:[#allocation19_spill] sm:$0xff] %v2531_v24  ;;  %v214_v28 = vmax.f32 %v198_v25, 0.0  ;;  %253 = vmax.xlane.f32.xlu1 %v2531_v24 }
  0xc1   :  { %v83_v31 = vpop.trf.xlu0 }
  0xc2   :  { %v2537_v32 = vadd.f32 %v2185_v26, %v214_v28  ;;  %v199_v33 = vmax.f32 %v183_v27, %v83_v31 }
  0xc4   :  { %5826 = vst [vmem:[#allocation20_spill] sm:$0xff] %v2537_v32  ;;  %v215_v37 = vmax.f32 %v199_v33, 0.0  ;;  %255 = vmax.xlane.f32.xlu1 %v2537_v32 }
  0xc5   :  { %v84_v39 = vpop.trf.xlu0 }
  0xc6   :  { %v2543_v40 = vadd.f32 %v2186_v34, %v215_v37  ;;  %v200_v41 = vmax.f32 %v184_v35, %v84_v39 }
  0xc8   :  { %5827 = vst [vmem:[#allocation21_spill] sm:$0xff] %v2543_v40  ;;  %v216_v45 = vmax.f32 %v200_v41, 0.0  ;;  %257 = vmax.xlane.f32.xlu1 %v2543_v40 }
  0xc9   :  { %v85_v47 = vpop.trf.xlu0 }
  0xca   :  { %v2549_v48 = vadd.f32 %v2187_v42, %v216_v45  ;;  %v201_v49 = vmax.f32 %v185_v44, %v85_v47 }
  0xcc   :  { %5828 = vst [vmem:[#allocation22_spill] sm:$0xff] %v2549_v48  ;;  %v217_v53 = vmax.f32 %v201_v49, 0.0  ;;  %259 = vmax.xlane.f32.xlu1 %v2549_v48 }
  0xcd   :  { %v86_v55 = vpop.trf.xlu0 }
  0xce   :  { %v2555_v56 = vadd.f32 %v2188_v51, %v217_v53  ;;  %v202_v58 = vmax.f32 %v186_v52, %v86_v55 }
  0xd0   :  { %5829 = vst [vmem:[#allocation23_spill] sm:$0xff] %v2555_v56  ;;  %v218_v61 = vmax.f32 %v202_v58, 0.0  ;;  %261 = vmax.xlane.f32.xlu1 %v2555_v56 }
  0xd1   :  { %v87_v63 = vpop.trf.xlu0 }
  0xd2   :  { %v2561_v1 = vadd.f32 %v2189_v59, %v218_v61  ;;  %v203_v2 = vmax.f32 %v187_v60, %v87_v63 }
  0xd4   :  { %5830 = vst [vmem:[#allocation24_spill] sm:$0xff] %v2561_v1  ;;  %v219_v5 = vmax.f32 %v203_v2, 0.0  ;;  %263 = vmax.xlane.f32.xlu1 %v2561_v1 }
  0xd5   :  { %v88_v6 = vpop.trf.xlu0 }
  0xd6   :  { %v2566_v8 = vadd.f32 %v2190_v3, %v219_v5  ;;  %v204_v9 = vmax.f32 %v188_v4, %v88_v6 }
  0xd8   :  { %5831 = vst [vmem:[#allocation25_spill] sm:$0xff] %v2566_v8  ;;  %v220_v11 = vmax.f32 %v204_v9, 0.0  ;;  %265 = vmax.xlane.f32.xlu1 %v2566_v8 }
  0xda   :  { %v2570_v17 = vadd.f32 %v2191_v10, %v220_v11 }
  0xdc   :  { %5832 = vst [vmem:[#allocation26_spill] sm:$0xff] %v2570_v17  ;;  %267 = vmax.xlane.f32.xlu1 %v2570_v17 }
 0x129   :  { %v2573_v12 = vpop.xlane.xlu1 %237 }
 0x12a   :  { %5833 = vst [vmem:[#allocation27_spill] sm:$0xff] %v2573_v12  ;;  %vm286_vm0 = vcmp.eq.f32.partialorder %v2483_v29, %v2573_v12 }
 0x12b   :  { %v2581_v18 = vsel %vm286_vm0, -3e+38, %v2483_v29  ;;  %v2192_v54 = vsel %vm286_vm0, 1.0, %v5605_v23 }
 0x12c   :  { %414 = vmax.xlane.f32.xlu0 %v2581_v18 }
 0x12d   :  { %v2584_v13 = vpop.xlane.xlu1 %239 }
 0x12e   :  { %5834 = vst [vmem:[#allocation28_spill] sm:$0xff] %v2584_v13  ;;  %vm287_vm1 = vcmp.eq.f32.partialorder %v2489_v36, %v2584_v13 }
 0x12f   :  { %v2592_v15 = vsel %vm287_vm1, -3e+38, %v2489_v36  ;;  %v2193_v58 = vsel %vm287_vm1, 1.0, %v5605_v23 }
 0x130   :  { %416 = vmax.xlane.f32.xlu1 %v2592_v15 }
 0x131   :  { %v2595_v16 = vpop.xlane.xlu1 %241 }
 0x132   :  { %5835 = vst [vmem:[#allocation29_spill] sm:$0xff] %v2595_v16  ;;  %vm288_vm2 = vcmp.eq.f32.partialorder %v2495_v43, %v2595_v16 }
 0x133   :  { %v2603_v19 = vsel %vm288_vm2, -3e+38, %v2495_v43 }
 0x134   :  { %418 = vmax.xlane.f32.xlu1 %v2603_v19 }
 0x135   :  { %v2606_v20 = vpop.xlane.xlu1 %243 }
 0x136   :  { %5836 = vst [vmem:[#allocation30_spill] sm:$0xff] %v2606_v20  ;;  %vm289_vm3 = vcmp.eq.f32.partialorder %v2501_v50, %v2606_v20 }
 0x137   :  { %v2614_v21 = vsel %vm289_vm3, -3e+38, %v2501_v50 }
 0x138   :  { %420 = vmax.xlane.f32.xlu1 %v2614_v21 }
 0x139   :  { %v2617_v22 = vpop.xlane.xlu1 %245 }
 0x13a   :  { %5837 = vst [vmem:[#allocation31_spill] sm:$0xff] %v2617_v22  ;;  %vm290_vm4 = vcmp.eq.f32.partialorder %v2507_v57, %v2617_v22 }
 0x13b   :  { %v2625_v25 = vsel %vm290_vm4, -3e+38, %v2507_v57 }
 0x13c   :  { %422 = vmax.xlane.f32.xlu1 %v2625_v25 }
 0x13d   :  { %v2628_v26 = vpop.xlane.xlu1 %247 }
 0x13e   :  { %5838 = vst [vmem:[#allocation32_spill] sm:$0xff] %v2628_v26  ;;  %vm291_vm5 = vcmp.eq.f32.partialorder %v2513_v0, %v2628_v26 }
 0x13f   :  { %v2636_v27 = vsel %vm291_vm5, -3e+38, %v2513_v0 }
 0x140   :  { %424 = vmax.xlane.f32.xlu1 %v2636_v27 }
 0x141   :  { %v2639_v28 = vpop.xlane.xlu1 %249 }
 0x142   :  { %5839 = vst [vmem:[#allocation33_spill] sm:$0xff] %v2639_v28  ;;  %vm292_vm6 = vcmp.eq.f32.partialorder %v2519_v7, %v2639_v28 }
 0x143   :  { %v2647_v30 = vsel %vm292_vm6, -3e+38, %v2519_v7 }
 0x144   :  { %426 = vmax.xlane.f32.xlu1 %v2647_v30 }
 0x145   :  { %v2650_v31 = vpop.xlane.xlu1 %251 }
 0x146   :  { %5840 = vst [vmem:[#allocation34_spill] sm:$0xff] %v2650_v31  ;;  %vm293_vm7 = vcmp.eq.f32.partialorder %v2525_v14, %v2650_v31 }
 0x147   :  { %v2658_v33 = vsel %vm293_vm7, -3e+38, %v2525_v14 }
 0x148   :  { %5841 = vst [vmem:[#allocation35_spill] sm:$0xff] %v2658_v33  ;;  %428 = vmax.xlane.f32.xlu1 %v2658_v33 }
 0x149   :  { %v2661_v34 = vpop.xlane.xlu1 %253 }
 0x14a   :  { %5842 = vst [vmem:[#allocation36_spill] sm:$0xff] %v2661_v34  ;;  %vm294_vm8 = vcmp.eq.f32.partialorder %v2531_v24, %v2661_v34 }
 0x14b   :  { %v2669_v35 = vsel %vm294_vm8, -3e+38, %v2531_v24 }
 0x14c   :  { %5843 = vst [vmem:[#allocation37_spill] sm:$0xff] %v2669_v35  ;;  %430 = vmax.xlane.f32.xlu1 %v2669_v35 }
 0x14d   :  { %v2672_v37 = vpop.xlane.xlu1 %255 }
 0x14e   :  { %5844 = vst [vmem:[#allocation38_spill] sm:$0xff] %v2672_v37  ;;  %vm295_vm9 = vcmp.eq.f32.partialorder %v2537_v32, %v2672_v37 }
 0x14f   :  { %v2680_v38 = vsel %vm295_vm9, -3e+38, %v2537_v32 }
 0x150   :  { %5845 = vst [vmem:[#allocation39_spill] sm:$0xff] %v2680_v38  ;;  %432 = vmax.xlane.f32.xlu1 %v2680_v38 }
 0x151   :  { %v2683_v39 = vpop.xlane.xlu1 %257 }
 0x152   :  { %5846 = vst [vmem:[#allocation40_spill] sm:$0xff] %v2683_v39  ;;  %vm296_vm10 = vcmp.eq.f32.partialorder %v2543_v40, %v2683_v39 }
 0x153   :  { %v2691_v41 = vsel %vm296_vm10, -3e+38, %v2543_v40 }
 0x154   :  { %5847 = vst [vmem:[#allocation41_spill] sm:$0xff] %v2691_v41  ;;  %434 = vmax.xlane.f32.xlu1 %v2691_v41 }
 0x155   :  { %v2694_v42 = vpop.xlane.xlu1 %259 }
 0x156   :  { %5848 = vst [vmem:[#allocation42_spill] sm:$0xff] %v2694_v42  ;;  %vm297_vm11 = vcmp.eq.f32.partialorder %v2549_v48, %v2694_v42 }
 0x157   :  { %v2702_v44 = vsel %vm297_vm11, -3e+38, %v2549_v48 }
 0x158   :  { %5849 = vst [vmem:[#allocation43_spill] sm:$0xff] %v2702_v44  ;;  %436 = vmax.xlane.f32.xlu1 %v2702_v44 }
 0x159   :  { %v2705_v45 = vpop.xlane.xlu1 %261 }
 0x15a   :  { %5850 = vst [vmem:[#allocation44_spill] sm:$0xff] %v2705_v45  ;;  %vm298_vm12 = vcmp.eq.f32.partialorder %v2555_v56, %v2705_v45 }
 0x15b   :  { %v2713_v46 = vsel %vm298_vm12, -3e+38, %v2555_v56 }
 0x15c   :  { %5851 = vst [vmem:[#allocation45_spill] sm:$0xff] %v2713_v46  ;;  %438 = vmax.xlane.f32.xlu1 %v2713_v46 }
 0x15d   :  { %v2716_v47 = vpop.xlane.xlu1 %263 }
 0x15e   :  { %5852 = vst [vmem:[#allocation46_spill] sm:$0xff] %v2716_v47  ;;  %vm299_vm13 = vcmp.eq.f32.partialorder %v2561_v1, %v2716_v47 }
 0x15f   :  { %v2724_v49 = vsel %vm299_vm13, -3e+38, %v2561_v1 }
 0x160   :  { %5853 = vst [vmem:[#allocation47_spill] sm:$0xff] %v2724_v49  ;;  %440 = vmax.xlane.f32.xlu0 %v2724_v49 }
 0x161   :  { %v2727_v51 = vpop.xlane.xlu1 %265 }
 0x162   :  { %5854 = vst [vmem:[#allocation48_spill] sm:$0xff] %v2727_v51  ;;  %vm300_vm14 = vcmp.eq.f32.partialorder %v2566_v8, %v2727_v51  ;;  %v5901_v51 = vld [vmem:[#allocation35_spill] sm:$0xff] }
 0x163   :  { %v2735_v52 = vsel %vm300_vm14, -3e+38, %v2566_v8 }
 0x164   :  { %442 = vmax.xlane.f32.xlu1 %v2735_v52 }
 0x165   :  { %v2738_v53 = vpop.xlane.xlu1 %267 }
 0x166   :  { %5855 = vst [vmem:[#allocation49_spill] sm:$0xff] %v2738_v53  ;;  %vm5599_vm15 = vcmp.eq.f32.partialorder %v2570_v17, %v2738_v53 }
 0x167   :  { %v2750_v55 = vsel %vm5599_vm15, -3e+38, %v2570_v17 }
 0x168   :  { %334 = vadd.xlane.f32.xlu1 %v2192_v54  ;;  %444 = vmax.xlane.f32.xlu0 %v2750_v55 }
 0x16c   :  { %336 = vadd.xlane.f32.xlu0 %v2193_v58 }
 0x1b5   :  { %v2757_v59 = vpop.xlane.xlu0 %414 }
 0x1b6   :  { %5856 = vst [vmem:[#allocation50_spill] sm:$0xff] %v2757_v59  ;;  %vm478_vm0 = vcmp.eq.f32.partialorder %v2581_v18, %v2757_v59 }
 0x1b7   :  { %v2765_v60 = vsel %vm478_vm0, -3e+38, %v2581_v18 }
 0x1b8   :  { %606 = vmax.xlane.f32.xlu1 %v2765_v60 }
 0x1b9   :  { %v2768_v61 = vpop.xlane.xlu1 %416 }
 0x1ba   :  { %5857 = vst [vmem:[#allocation51_spill] sm:$0xff] %v2768_v61  ;;  %vm5600_vm15 = vcmp.eq.f32.partialorder %v2592_v15, %v2768_v61 }
 0x1bb   :  { %v2776_v62 = vsel %vm5600_vm15, -3e+38, %v2592_v15 }
 0x1bc   :  { %608 = vmax.xlane.f32.xlu0 %v2776_v62 }
 0x1bd   :  { %v2779_v63 = vpop.xlane.xlu1 %418 }
 0x1be   :  { %5858 = vst [vmem:[#allocation52_spill] sm:$0xff] %v2779_v63  ;;  %vm5601_vm1 = vcmp.eq.f32.partialorder %v2603_v19, %v2779_v63 }
 0x1bf   :  { %v2787_v2 = vsel %vm5601_vm1, -3e+38, %v2603_v19 }
 0x1c0   :  { %610 = vmax.xlane.f32.xlu1 %v2787_v2 }
 0x1c1   :  { %v2790_v3 = vpop.xlane.xlu1 %420 }
 0x1c2   :  { %5859 = vst [vmem:[#allocation53_spill] sm:$0xff] %v2790_v3  ;;  %vm5602_vm15 = vcmp.eq.f32.partialorder %v2614_v21, %v2790_v3 }
 0x1c3   :  { %v2798_v4 = vsel %vm5602_vm15, -3e+38, %v2614_v21 }
 0x1c4   :  { %612 = vmax.xlane.f32.xlu0 %v2798_v4 }
 0x1c5   :  { %v2801_v5 = vpop.xlane.xlu1 %422 }
 0x1c6   :  { %5860 = vst [vmem:[#allocation54_spill] sm:$0xff] %v2801_v5  ;;  %vm5603_vm1 = vcmp.eq.f32.partialorder %v2625_v25, %v2801_v5 }
 0x1c7   :  { %v2809_v6 = vsel %vm5603_vm1, -3e+38, %v2625_v25 }
 0x1c8   :  { %614 = vmax.xlane.f32.xlu1 %v2809_v6 }
 0x1c9   :  { %v2812_v9 = vpop.xlane.xlu1 %424 }
 0x1ca   :  { %5861 = vst [vmem:[#allocation55_spill] sm:$0xff] %v2812_v9  ;;  %vm5604_vm15 = vcmp.eq.f32.partialorder %v2636_v27, %v2812_v9 }
 0x1cb   :  { %v2820_v10 = vsel %vm5604_vm15, -3e+38, %v2636_v27 }
 0x1cc   :  { %616 = vmax.xlane.f32.xlu0 %v2820_v10 }
 0x1cd   :  { %v2823_v11 = vpop.xlane.xlu1 %426 }
 0x1ce   :  { %5862 = vst [vmem:[#allocation56_spill] sm:$0xff] %v2823_v11  ;;  %vm5609_vm1 = vcmp.eq.f32.partialorder %v2647_v30, %v2823_v11 }
 0x1cf   :  { %v2831_v54 = vsel %vm5609_vm1, -3e+38, %v2647_v30 }
 0x1d0   :  { %618 = vmax.xlane.f32.xlu1 %v2831_v54 }
 0x1d1   :  { %v2834_v58 = vpop.xlane.xlu1 %428 }
 0x1d2   :  { %5863 = vst [vmem:[#allocation57_spill] sm:$0xff] %v2834_v58  ;;  %vm5613_vm15 = vcmp.eq.f32.partialorder %v2658_v33, %v2834_v58 }
 0x1d3   :  { %v2842_v23 = vsel %vm5613_vm15, -3e+38, %v2658_v33 }
 0x1d4   :  { %620 = vmax.xlane.f32.xlu0 %v2842_v23 }
 0x1d5   :  { %v2845_v36 = vpop.xlane.xlu1 %430 }
 0x1d6   :  { %5864 = vst [vmem:[#allocation58_spill] sm:$0xff] %v2845_v36  ;;  %vm5617_vm1 = vcmp.eq.f32.partialorder %v2669_v35, %v2845_v36 }
 0x1d7   :  { %v2853_v29 = vsel %vm5617_vm1, -3e+38, %v2669_v35 }
 0x1d8   :  { %622 = vmax.xlane.f32.xlu1 %v2853_v29 }
 0x1d9   :  { %v2856_v13 = vpop.xlane.xlu1 %432  ;;  %v5902_v42 = vld [vmem:[#allocation57_spill] sm:$0xff] }
 0x1da   :  { %5865 = vst [vmem:[#allocation59_spill] sm:$0xff] %v2856_v13  ;;  %vm5621_vm15 = vcmp.eq.f32.partialorder %v2680_v38, %v2856_v13 }
 0x1db   :  { %v2864_v12 = vsel %vm5621_vm15, -3e+38, %v2680_v38 }
 0x1dc   :  { %624 = vmax.xlane.f32.xlu0 %v2864_v12 }
 0x1dd   :  { %v2867_v58 = vpop.xlane.xlu1 %434 }
 0x1de   :  { %5866 = vst [vmem:[#allocation60_spill] sm:$0xff] %v2867_v58  ;;  %vm5625_vm1 = vcmp.eq.f32.partialorder %v2691_v41, %v2867_v58 }
 0x1df   :  { %v2875_v33 = vsel %vm5625_vm1, -3e+38, %v2691_v41 }
 0x1e0   :  { %626 = vmax.xlane.f32.xlu1 %v2875_v33 }
 0x1e1   :  { %v2878_v36 = vpop.xlane.xlu1 %436  ;;  %v5908_v37 = vld [vmem:[#allocation59_spill] sm:$0xff] }
 0x1e2   :  { %5867 = vst [vmem:[#allocation61_spill] sm:$0xff] %v2878_v36  ;;  %vm5629_vm15 = vcmp.eq.f32.partialorder %v2702_v44, %v2878_v36 }
 0x1e3   :  { %v2886_v13 = vsel %vm5629_vm15, -3e+38, %v2702_v44 }
 0x1e4   :  { %628 = vmax.xlane.f32.xlu0 %v2886_v13 }
 0x1e5   :  { %v2889_v38 = vpop.xlane.xlu1 %438  ;;  %v5905_v45 = vld [vmem:[#allocation60_spill] sm:$0xff] }
 0x1e6   :  { %5868 = vst [vmem:[#allocation62_spill] sm:$0xff] %v2889_v38  ;;  %vm5633_vm1 = vcmp.eq.f32.partialorder %v2713_v46, %v2889_v38 }
 0x1e7   :  { %v2897_v58 = vsel %vm5633_vm1, -3e+38, %v2713_v46 }
 0x1e8   :  { %630 = vmax.xlane.f32.xlu1 %v2897_v58 }
 0x1e9   :  { %v2900_v41 = vpop.xlane.xlu0 %440 }
 0x1ea   :  { %5869 = vst [vmem:[#allocation63_spill] sm:$0xff] %v2900_v41  ;;  %vm5637_vm15 = vcmp.eq.f32.partialorder %v2724_v49, %v2900_v41  ;;  %v5872_v41 = vmov 0.0  }
 0x1eb   :  { %v2908_v36 = vsel %vm5637_vm15, -3e+38, %v2724_v49  ;;  %v2194_v49 = vsel %vm288_vm2, 1.0, %v5872_v41  ;;  %v2195_v43 = vsel %vm289_vm3, 1.0, %v5872_v41  ;;  %v2198_v16 = vsel %vm292_vm6, 1.0, %v5872_v41 }
 0x1ec   :  { %632 = vmax.xlane.f32.xlu0 %v2908_v36  ;;  %v2200_v57 = vsel %vm294_vm8, 1.0, %v5872_v41  ;;  %vm5873_vm2 = vcmp.eq.f32.partialorder %v2570_v17, %v2738_v53  ;;  %vm5874_vm3 = vcmp.eq.f32.partialorder %v2603_v19, %v2779_v63  ;;  %vm5877_vm6 = vcmp.eq.f32.partialorder %v2614_v21, %v2790_v3  ;;  %v5899_v53 = vld [vmem:[#allocation58_spill] sm:$0xff] }
 0x1ed   :  { %v2911_v44 = vpop.xlane.xlu1 %442 }
 0x1ee   :  { %5870 = vst [vmem:[#allocation64_spill] sm:$0xff] %v2911_v44  ;;  %vm492_vm1 = vcmp.eq.f32.partialorder %v2735_v52, %v2911_v44  ;;  %v2196_v44 = vsel %vm290_vm4, 1.0, %v5872_v41  ;;  %vm5875_vm4 = vcmp.eq.f32.partialorder %v2592_v15, %v2768_v61 }
 0x1ef   :  { %v2919_v38 = vsel %vm492_vm1, -3e+38, %v2735_v52 }
 0x1f0   :  { %634 = vmax.xlane.f32.xlu1 %v2919_v38 }
 0x1f1   :  { %v2922_v46 = vpop.xlane.xlu0 %444  ;;  %v3013_v19 = vpop.xlane.xlu1 %334 }
 0x1f2   :  { %5871 = vst [vmem:[#allocation65_spill] sm:$0xff] %v2922_v46  ;;  %vm493_vm15 = vcmp.eq.f32.partialorder %v2750_v55, %v2922_v46  ;;  %5879 = vst [vmem:[#allocation66_spill] sm:$0xff] %v3013_v19  ;;  %v5898_v19 = vld [vmem:[#allocation37_spill] sm:$0xff] }
 0x1f3   :  { %v2934_v35 = vsel %vm493_vm15, -3e+38, %v2750_v55 }
 0x1f4   :  { %338 = vadd.xlane.f32.xlu1 %v2194_v49  ;;  %636 = vmax.xlane.f32.xlu0 %v2934_v35  ;;  %v2197_v49 = vsel %vm291_vm5, 1.0, %v5872_v41  ;;  %vm5876_vm5 = vcmp.eq.f32.partialorder %v2625_v25, %v2801_v5 }
 0x1f5   :  { %v2212_v18 = vsel %vm5876_vm5, 1.0, %v5872_v41 }
 0x1f8   :  { %342 = vadd.xlane.f32.xlu1 %v2196_v44  ;;  %340 = vadd.xlane.f32.xlu0 %v2195_v43  ;;  %v2199_v43 = vsel %vm293_vm7, 1.0, %v5872_v41  ;;  %v2202_v44 = vsel %vm296_vm10, 1.0, %v5872_v41  ;;  %vm5878_vm7 = vcmp.eq.f32.partialorder %v2636_v27, %v2812_v9 }
 0x1f9   :  { %v2213_v15 = vsel %vm5878_vm7, 1.0, %v5872_v41 }
 0x1fc   :  { %346 = vadd.xlane.f32.xlu1 %v2198_v16  ;;  %344 = vadd.xlane.f32.xlu0 %v2197_v49  ;;  %v2201_v16 = vsel %vm295_vm9, 1.0, %v5872_v41  ;;  %v2204_v49 = vsel %vm298_vm12, 1.0, %v5872_v41 }
 0x200   :  { %350 = vadd.xlane.f32.xlu1 %v2200_v57  ;;  %348 = vadd.xlane.f32.xlu0 %v2199_v43  ;;  %v2203_v57 = vsel %vm297_vm11, 1.0, %v5872_v41  ;;  %v2206_v43 = vsel %vm300_vm14, 1.0, %v5872_v41 }
 0x204   :  { %354 = vadd.xlane.f32.xlu1 %v2202_v44  ;;  %352 = vadd.xlane.f32.xlu0 %v2201_v16  ;;  %v2205_v44 = vsel %vm299_vm13, 1.0, %v5872_v41  ;;  %v2208_v16 = vsel %vm478_vm0, 1.0, %v5872_v41 }
 0x208   :  { %358 = vadd.xlane.f32.xlu1 %v2204_v49  ;;  %356 = vadd.xlane.f32.xlu0 %v2203_v57  ;;  %v2207_v49 = vsel %vm5873_vm2, 1.0, %v5872_v41  ;;  %v2210_v57 = vsel %vm5874_vm3, 1.0, %v5872_v41 }
 0x20c   :  { %362 = vadd.xlane.f32.xlu1 %v2206_v43  ;;  %360 = vadd.xlane.f32.xlu0 %v2205_v44  ;;  %v2209_v43 = vsel %vm5875_vm4, 1.0, %v5872_v41  ;;  %v2211_v44 = vsel %vm5877_vm6, 1.0, %v5872_v41 }
 0x210   :  { %526 = vadd.xlane.f32.xlu1 %v2208_v16  ;;  %364 = vadd.xlane.f32.xlu0 %v2207_v49  ;;  %v3015_v16 = vpop.xlane.xlu0 %336 }
 0x211   :  { %5880 = vst [vmem:[#allocation67_spill] sm:$0xff] %v3015_v16 }
 0x214   :  { %530 = vadd.xlane.f32.xlu1 %v2210_v57  ;;  %528 = vadd.xlane.f32.xlu0 %v2209_v43 }
 0x218   :  { %534 = vadd.xlane.f32.xlu1 %v2212_v18  ;;  %532 = vadd.xlane.f32.xlu0 %v2211_v44 }
 0x21c   :  { %536 = vadd.xlane.f32.xlu0 %v2213_v15 }
 0x241   :  { %v3017_v49 = vpop.xlane.xlu1 %606 }
 0x242   :  { %5881 = vst [vmem:[#allocation68_spill] sm:$0xff] %v3017_v49  ;;  %vm670_vm8 = vcmp.eq.f32.partialorder %v2765_v60, %v3017_v49 }
 0x243   :  { %v3025_v21 = vsel %vm670_vm8, -3e+38, %v2765_v60 }
 0x244   :  { %798 = vmax.xlane.f32.xlu1 %v3025_v21 }
 0x245   :  { %v3028_v25 = vpop.xlane.xlu0 %608 }
 0x246   :  { %5882 = vst [vmem:[#allocation69_spill] sm:$0xff] %v3028_v25  ;;  %vm671_vm9 = vcmp.eq.f32.partialorder %v2776_v62, %v3028_v25 }
 0x247   :  { %v3036_v27 = vsel %vm671_vm9, -3e+38, %v2776_v62  ;;  %v2225_v60 = vsel %vm671_vm9, 1.0, %v5872_v41 }
 0x248   :  { %800 = vmax.xlane.f32.xlu0 %v3036_v27 }
 0x249   :  { %v3039_v57 = vpop.xlane.xlu1 %610 }
 0x24a   :  { %5883 = vst [vmem:[#allocation70_spill] sm:$0xff] %v3039_v57  ;;  %vm672_vm10 = vcmp.eq.f32.partialorder %v2787_v2, %v3039_v57 }
 0x24b   :  { %v3047_v43 = vsel %vm672_vm10, -3e+38, %v2787_v2 }
 0x24c   :  { %802 = vmax.xlane.f32.xlu1 %v3047_v43 }
 0x24d   :  { %v3050_v18 = vpop.xlane.xlu0 %612 }
 0x24e   :  { %5884 = vst [vmem:[#allocation71_spill] sm:$0xff] %v3050_v18  ;;  %vm673_vm11 = vcmp.eq.f32.partialorder %v2798_v4, %v3050_v18 }
 0x24f   :  { %v3058_v44 = vsel %vm673_vm11, -3e+38, %v2798_v4  ;;  %v2227_v2 = vsel %vm673_vm11, 1.0, %v5872_v41 }
 0x250   :  { %804 = vmax.xlane.f32.xlu0 %v3058_v44 }
 0x251   :  { %v3061_v15 = vpop.xlane.xlu1 %614 }
 0x252   :  { %5885 = vst [vmem:[#allocation72_spill] sm:$0xff] %v3061_v15  ;;  %vm674_vm12 = vcmp.eq.f32.partialorder %v2809_v6, %v3061_v15 }
 0x253   :  { %v3069_v17 = vsel %vm674_vm12, -3e+38, %v2809_v6  ;;  %v2228_v55 = vsel %vm674_vm12, 1.0, %v5872_v41 }
 0x254   :  { %806 = vmax.xlane.f32.xlu1 %v3069_v17 }
 0x255   :  { %v3072_v8 = vpop.xlane.xlu0 %616 }
 0x256   :  { %5886 = vst [vmem:[#allocation73_spill] sm:$0xff] %v3072_v8  ;;  %vm675_vm13 = vcmp.eq.f32.partialorder %v2820_v10, %v3072_v8 }
 0x257   :  { %v3080_v1 = vsel %vm675_vm13, -3e+38, %v2820_v10  ;;  %v2229_v6 = vsel %vm675_vm13, 1.0, %v5872_v41 }
 0x258   :  { %808 = vmax.xlane.f32.xlu0 %v3080_v1 }
 0x259   :  { %v3083_v56 = vpop.xlane.xlu1 %618 }
 0x25a   :  { %5887 = vst [vmem:[#allocation74_spill] sm:$0xff] %v3083_v56  ;;  %vm676_vm14 = vcmp.eq.f32.partialorder %v2831_v54, %v3083_v56 }
 0x25b   :  { %v3091_v48 = vsel %vm676_vm14, -3e+38, %v2831_v54 }
 0x25c   :  { %810 = vmax.xlane.f32.xlu1 %v3091_v48 }
 0x25d   :  { %v3094_v40 = vpop.xlane.xlu0 %620 }
 0x25e   :  { %5888 = vst [vmem:[#allocation75_spill] sm:$0xff] %v3094_v40  ;;  %vm677_vm0 = vcmp.eq.f32.partialorder %v2842_v23, %v3094_v40 }
 0x25f   :  { %v3102_v32 = vsel %vm677_vm0, -3e+38, %v2842_v23  ;;  %v2231_v54 = vsel %vm677_vm0, 1.0, %v5872_v41 }
 0x260   :  { %812 = vmax.xlane.f32.xlu0 %v3102_v32 }
 0x261   :  { %v3105_v24 = vpop.xlane.xlu1 %622 }
 0x262   :  { %5889 = vst [vmem:[#allocation76_spill] sm:$0xff] %v3105_v24  ;;  %vm678_vm2 = vcmp.eq.f32.partialorder %v2853_v29, %v3105_v24 }
 0x263   :  { %v3113_v14 = vsel %vm678_vm2, -3e+38, %v2853_v29 }
 0x264   :  { %814 = vmax.xlane.f32.xlu1 %v3113_v14 }
 0x265   :  { %v3116_v7 = vpop.xlane.xlu0 %624 }
 0x266   :  { %5890 = vst [vmem:[#allocation77_spill] sm:$0xff] %v3116_v7  ;;  %vm679_vm3 = vcmp.eq.f32.partialorder %v2864_v12, %v3116_v7 }
 0x267   :  { %v3124_v0 = vsel %vm679_vm3, -3e+38, %v2864_v12  ;;  %v2233_v10 = vsel %vm679_vm3, 1.0, %v5872_v41 }
 0x268   :  { %816 = vmax.xlane.f32.xlu0 %v3124_v0 }
 0x269   :  { %v3127_v50 = vpop.xlane.xlu1 %626 }
 0x26a   :  { %5891 = vst [vmem:[#allocation78_spill] sm:$0xff] %v3127_v50  ;;  %vm5692_vm4 = vcmp.eq.f32.partialorder %v2875_v33, %v3127_v50 }
 0x26b   :  { %v3135_v31 = vsel %vm5692_vm4, -3e+38, %v2875_v33  ;;  %vm5903_vm4 = vcmp.eq.f32.partialorder %v5901_v51, %v5902_v42 }
 0x26c   :  { %818 = vmax.xlane.f32.xlu1 %v3135_v31 }
 0x26d   :  { %v3138_v9 = vpop.xlane.xlu0 %628 }
 0x26e   :  { %5892 = vst [vmem:[#allocation79_spill] sm:$0xff] %v3138_v9  ;;  %vm5681_vm5 = vcmp.eq.f32.partialorder %v2886_v13, %v3138_v9 }
 0x26f   :  { %v3146_v26 = vsel %vm5681_vm5, -3e+38, %v2886_v13 }
 0x270   :  { %820 = vmax.xlane.f32.xlu0 %v3146_v26 }
 0x271   :  { %v3149_v28 = vpop.xlane.xlu1 %630 }
 0x272   :  { %5893 = vst [vmem:[#allocation80_spill] sm:$0xff] %v3149_v28  ;;  %vm5685_vm6 = vcmp.eq.f32.partialorder %v2897_v58, %v3149_v28 }
 0x273   :  { %v3157_v3 = vsel %vm5685_vm6, -3e+38, %v2897_v58  ;;  %vm5897_vm6 = vcmp.eq.f32.partialorder %v2647_v30, %v2823_v11  ;;  %v2215_v30 = vsel %vm5903_vm4, 1.0, %v5872_v41  ;;  %v5904_v11 = vld [vmem:[#allocation41_spill] sm:$0xff] }
 0x274   :  { %822 = vmax.xlane.f32.xlu1 %v3157_v3  ;;  %v2214_v59 = vsel %vm5897_vm6, 1.0, %v5872_v41  ;;  %vm5906_vm6 = vcmp.eq.f32.partialorder %v5904_v11, %v5905_v45 }
 0x275   :  { %v3160_v20 = vpop.xlane.xlu0 %632  ;;  %v2218_v39 = vsel %vm5906_vm6, 1.0, %v5872_v41 }
 0x276   :  { %5894 = vst [vmem:[#allocation81_spill] sm:$0xff] %v3160_v20  ;;  %vm5684_vm7 = vcmp.eq.f32.partialorder %v2908_v36, %v3160_v20 }
 0x277   :  { %v3168_v5 = vsel %vm5684_vm7, -3e+38, %v2908_v36 }
 0x278   :  { %824 = vmax.xlane.f32.xlu0 %v3168_v5 }
 0x279   :  { %v3171_v22 = vpop.xlane.xlu1 %634 }
 0x27a   :  { %5895 = vst [vmem:[#allocation82_spill] sm:$0xff] %v3171_v22  ;;  %vm5688_vm5 = vcmp.eq.f32.partialorder %v2919_v38, %v3171_v22 }
 0x27b   :  { %v3179_v63 = vsel %vm5688_vm5, -3e+38, %v2919_v38  ;;  %vm5900_vm5 = vcmp.eq.f32.partialorder %v5898_v19, %v5899_v53  ;;  %v5910_v19 = vld [vmem:[#allocation45_spill] sm:$0xff]  ;;  %v5911_v53 = vld [vmem:[#allocation62_spill] sm:$0xff] }
 0x27c   :  { %826 = vmax.xlane.f32.xlu1 %v3179_v63  ;;  %v2216_v47 = vsel %vm5900_vm5, 1.0, %v5872_v41  ;;  %vm5912_vm5 = vcmp.eq.f32.partialorder %v5910_v19, %v5911_v53 }
 0x27d   :  { %v3182_v61 = vpop.xlane.xlu0 %636  ;;  %v2220_v51 = vsel %vm5912_vm5, 1.0, %v5872_v41  ;;  %v3229_v19 = vpop.xlane.xlu1 %338 }
 0x27e   :  { %5896 = vst [vmem:[#allocation83_spill] sm:$0xff] %v3182_v61  ;;  %vm5697_vm7 = vcmp.eq.f32.partialorder %v2934_v35, %v3182_v61  ;;  %5920 = vst [vmem:[#allocation37_spill] sm:$0xff] %v3229_v19 }
 0x27f   :  { %v3194_v16 = vsel %vm5697_vm7, -3e+38, %v2934_v35 }
 0x280   :  { %538 = vadd.xlane.f32.xlu1 %v2214_v59  ;;  %828 = vmax.xlane.f32.xlu0 %v3194_v16  ;;  %v5907_v59 = vld [vmem:[#allocation39_spill] sm:$0xff] }
 0x281   :  { %vm5909_vm7 = vcmp.eq.f32.partialorder %v5907_v59, %v5908_v37  ;;  %v2222_v59 = vsel %vm492_vm1, 1.0, %v5872_v41  ;;  %v3239_v52 = vpop.xlane.xlu0 %340 }
 0x282   :  { %v2217_v34 = vsel %vm5909_vm7, 1.0, %v5872_v41  ;;  %5921 = vst [vmem:[#allocation35_spill] sm:$0xff] %v3239_v52 }
 0x284   :  { %542 = vadd.xlane.f32.xlu1 %v2216_v47  ;;  %540 = vadd.xlane.f32.xlu0 %v2215_v30  ;;  %v5913_v47 = vld [vmem:[#allocation43_spill] sm:$0xff]  ;;  %v5914_v30 = vld [vmem:[#allocation61_spill] sm:$0xff] }
 0x285   :  { %vm5915_vm4 = vcmp.eq.f32.partialorder %v5913_v47, %v5914_v30  ;;  %v3249_v47 = vpop.xlane.xlu1 %342 }
 0x286   :  { %v2219_v42 = vsel %vm5915_vm4, 1.0, %v5872_v41  ;;  %5922 = vst [vmem:[#allocation41_spill] sm:$0xff] %v3249_v47 }
 0x288   :  { %546 = vadd.xlane.f32.xlu1 %v2218_v39  ;;  %544 = vadd.xlane.f32.xlu0 %v2217_v34  ;;  %v5917_v39 = vld [vmem:[#allocation47_spill] sm:$0xff] }
 0x289   :  { %v5918_v34 = vld [vmem:[#allocation63_spill] sm:$0xff]  ;;  %v3261_v62 = vpop.xlane.xlu1 %346 }
 0x28a   :  { %vm5919_vm7 = vcmp.eq.f32.partialorder %v5917_v39, %v5918_v34  ;;  %5924 = vst [vmem:[#allocation45_spill] sm:$0xff] %v3261_v62  ;;  %v2230_v39 = vsel %vm676_vm14, 1.0, %v5872_v41 }
 0x28b   :  { %v2221_v45 = vsel %vm5919_vm7, 1.0, %v5872_v41 }
 0x28c   :  { %550 = vadd.xlane.f32.xlu1 %v2220_v51  ;;  %548 = vadd.xlane.f32.xlu0 %v2219_v42  ;;  %v2224_v51 = vsel %vm670_vm8, 1.0, %v5872_v41  ;;  %v2223_v42 = vsel %vm493_vm15, 1.0, %v5872_v41 }
 0x290   :  { %554 = vadd.xlane.f32.xlu1 %v2222_v59  ;;  %552 = vadd.xlane.f32.xlu0 %v2221_v45  ;;  %v2226_v45 = vsel %vm672_vm10, 1.0, %v5872_v41  ;;  %v3259_v59 = vpop.xlane.xlu0 %344 }
 0x291   :  { %5923 = vst [vmem:[#allocation39_spill] sm:$0xff] %v3259_v59 }
 0x294   :  { %718 = vadd.xlane.f32.xlu1 %v2224_v51  ;;  %556 = vadd.xlane.f32.xlu0 %v2223_v42  ;;  %v3271_v4 = vpop.xlane.xlu0 %348  ;;  %v2232_v51 = vsel %vm678_vm2, 1.0, %v5872_v41  ;;  %v3281_v42 = vpop.xlane.xlu1 %350 }
 0x295   :  { %5925 = vst [vmem:[#allocation43_spill] sm:$0xff] %v3271_v4 }
 0x298   :  { %722 = vadd.xlane.f32.xlu1 %v2226_v45  ;;  %720 = vadd.xlane.f32.xlu0 %v2225_v60  ;;  %v3287_v45 = vpop.xlane.xlu0 %352  ;;  %v3289_v60 = vpop.xlane.xlu1 %354 }
 0x299   :  { %5926 = vst [vmem:[#allocation47_spill] sm:$0xff] %v3287_v45  ;;  %5927 = vst [vmem:[#allocation84_spill] sm:$0xff] %v3289_v60 }
 0x29c   :  { %726 = vadd.xlane.f32.xlu1 %v2228_v55  ;;  %724 = vadd.xlane.f32.xlu0 %v2227_v2  ;;  %v3291_v29 = vpop.xlane.xlu0 %356  ;;  %v3293_v55 = vpop.xlane.xlu1 %358 }
 0x29d   :  { %5928 = vst [vmem:[#allocation85_spill] sm:$0xff] %v3291_v29  ;;  %5929 = vst [vmem:[#allocation86_spill] sm:$0xff] %v3293_v55 }
 0x2a0   :  { %730 = vadd.xlane.f32.xlu1 %v2230_v39  ;;  %728 = vadd.xlane.f32.xlu0 %v2229_v6  ;;  %v3295_v23 = vpop.xlane.xlu0 %360  ;;  %v3297_v2 = vpop.xlane.xlu1 %362 }
 0x2a1   :  { %5930 = vst [vmem:[#allocation87_spill] sm:$0xff] %v3295_v23  ;;  %5931 = vst [vmem:[#allocation88_spill] sm:$0xff] %v3297_v2 }
 0x2a4   :  { %734 = vadd.xlane.f32.xlu1 %v2232_v51  ;;  %732 = vadd.xlane.f32.xlu0 %v2231_v54  ;;  %v3299_v39 = vpop.xlane.xlu0 %364  ;;  %v3301_v6 = vpop.xlane.xlu1 %526 }
 0x2a5   :  { %5932 = vst [vmem:[#allocation89_spill] sm:$0xff] %v3299_v39  ;;  %5933 = vst [vmem:[#allocation90_spill] sm:$0xff] %v3301_v6 }
 0x2a8   :  { %736 = vadd.xlane.f32.xlu0 %v2233_v10  ;;  %v3303_v51 = vpop.xlane.xlu0 %528  ;;  %v3305_v12 = vpop.xlane.xlu1 %530 }
 0x2a9   :  { %5934 = vst [vmem:[#allocation91_spill] sm:$0xff] %v3303_v51  ;;  %5935 = vst [vmem:[#allocation92_spill] sm:$0xff] %v3305_v12 }
 0x2ac   :  { %v3307_v54 = vpop.xlane.xlu0 %532  ;;  %v3309_v10 = vpop.xlane.xlu1 %534 }
 0x2ad   :  { %5936 = vst [vmem:[#allocation93_spill] sm:$0xff] %v3307_v54  ;;  %5937 = vst [vmem:[#allocation94_spill] sm:$0xff] %v3309_v10 }
 0x2b0   :  { %v3311_v40 = vpop.xlane.xlu0 %536 }
 0x2b1   :  { %5938 = vst [vmem:[#allocation95_spill] sm:$0xff] %v3311_v40 }
 0x2cd   :  { %v3313_v8 = vpop.xlane.xlu1 %798 }
 0x2ce   :  { %5939 = vst [vmem:[#allocation96_spill] sm:$0xff] %v3313_v8  ;;  %vm862_vm15 = vcmp.eq.f32.partialorder %v3025_v21, %v3313_v8 }
 0x2cf   :  { %v3321_v56 = vsel %vm862_vm15, -3e+38, %v3025_v21 }
 0x2d0   :  { %990 = vmax.xlane.f32.xlu1 %v3321_v56 }
 0x2d1   :  { %v3324_v18 = vpop.xlane.xlu0 %800 }
 0x2d2   :  { %5940 = vst [vmem:[#allocation97_spill] sm:$0xff] %v3324_v18  ;;  %vm863_vm1 = vcmp.eq.f32.partialorder %v3036_v27, %v3324_v18 }
 0x2d3   :  { %v3332_v15 = vsel %vm863_vm1, -3e+38, %v3036_v27 }
 0x2d4   :  { %992 = vmax.xlane.f32.xlu0 %v3332_v15 }
 0x2d5   :  { %v3335_v25 = vpop.xlane.xlu1 %802 }
 0x2d6   :  { %5941 = vst [vmem:[#allocation98_spill] sm:$0xff] %v3335_v25  ;;  %vm864_vm8 = vcmp.eq.f32.partialorder %v3047_v43, %v3335_v25 }
 0x2d7   :  { %v3343_v57 = vsel %vm864_vm8, -3e+38, %v3047_v43 }
 0x2d8   :  { %994 = vmax.xlane.f32.xlu1 %v3343_v57 }
 0x2d9   :  { %v3346_v49 = vpop.xlane.xlu0 %804 }
 0x2da   :  { %5942 = vst [vmem:[#allocation99_spill] sm:$0xff] %v3346_v49  ;;  %vm865_vm9 = vcmp.eq.f32.partialorder %v3058_v44, %v3346_v49 }
 0x2db   :  { %v3354_v40 = vsel %vm865_vm9, -3e+38, %v3058_v44  ;;  %v2243_v21 = vsel %vm865_vm9, 1.0, %v5872_v41 }
 0x2dc   :  { %996 = vmax.xlane.f32.xlu0 %v3354_v40 }
 0x2dd   :  { %v3357_v54 = vpop.xlane.xlu1 %806 }
 0x2de   :  { %5943 = vst [vmem:[#allocation100_spill] sm:$0xff] %v3357_v54  ;;  %vm866_vm10 = vcmp.eq.f32.partialorder %v3069_v17, %v3357_v54 }
 0x2df   :  { %v3365_v4 = vsel %vm866_vm10, -3e+38, %v3069_v17 }
 0x2e0   :  { %998 = vmax.xlane.f32.xlu1 %v3365_v4 }
 0x2e1   :  { %v3368_v59 = vpop.xlane.xlu0 %808 }
 0x2e2   :  { %5944 = vst [vmem:[#allocation101_spill] sm:$0xff] %v3368_v59  ;;  %vm867_vm11 = vcmp.eq.f32.partialorder %v3080_v1, %v3368_v59 }
 0x2e3   :  { %v3376_v10 = vsel %vm867_vm11, -3e+38, %v3080_v1  ;;  %v2245_v17 = vsel %vm867_vm11, 1.0, %v5872_v41 }
 0x2e4   :  { %1000 = vmax.xlane.f32.xlu0 %v3376_v10 }
 0x2e5   :  { %v3379_v51 = vpop.xlane.xlu1 %810 }
 0x2e6   :  { %5945 = vst [vmem:[#allocation102_spill] sm:$0xff] %v3379_v51  ;;  %vm868_vm12 = vcmp.eq.f32.partialorder %v3091_v48, %v3379_v51 }
 0x2e7   :  { %v3387_v12 = vsel %vm868_vm12, -3e+38, %v3091_v48  ;;  %v2246_v27 = vsel %vm868_vm12, 1.0, %v5872_v41 }
 0x2e8   :  { %1002 = vmax.xlane.f32.xlu1 %v3387_v12 }
 0x2e9   :  { %v3390_v6 = vpop.xlane.xlu0 %812 }
 0x2ea   :  { %5946 = vst [vmem:[#allocation103_spill] sm:$0xff] %v3390_v6  ;;  %vm869_vm13 = vcmp.eq.f32.partialorder %v3102_v32, %v3390_v6 }
 0x2eb   :  { %v3398_v62 = vsel %vm869_vm13, -3e+38, %v3102_v32  ;;  %v2247_v48 = vsel %vm869_vm13, 1.0, %v5872_v41 }
 0x2ec   :  { %1004 = vmax.xlane.f32.xlu0 %v3398_v62 }
 0x2ed   :  { %v3401_v52 = vpop.xlane.xlu1 %814 }
 0x2ee   :  { %5947 = vst [vmem:[#allocation104_spill] sm:$0xff] %v3401_v52  ;;  %vm870_vm14 = vcmp.eq.f32.partialorder %v3113_v14, %v3401_v52 }
 0x2ef   :  { %v3409_v47 = vsel %vm870_vm14, -3e+38, %v3113_v14  ;;  %v2248_v44 = vsel %vm870_vm14, 1.0, %v5872_v41 }
 0x2f0   :  { %1006 = vmax.xlane.f32.xlu1 %v3409_v47 }
 0x2f1   :  { %v3412_v19 = vpop.xlane.xlu0 %816 }
 0x2f2   :  { %5948 = vst [vmem:[#allocation105_spill] sm:$0xff] %v3412_v19  ;;  %vm871_vm0 = vcmp.eq.f32.partialorder %v3124_v0, %v3412_v19 }
 0x2f3   :  { %v3420_v7 = vsel %vm871_vm0, -3e+38, %v3124_v0  ;;  %v2249_v14 = vsel %vm871_vm0, 1.0, %v5872_v41 }
 0x2f4   :  { %1008 = vmax.xlane.f32.xlu0 %v3420_v7 }
 0x2f5   :  { %v3423_v24 = vpop.xlane.xlu1 %818 }
 0x2f6   :  { %5949 = vst [vmem:[#allocation106_spill] sm:$0xff] %v3423_v24  ;;  %vm872_vm2 = vcmp.eq.f32.partialorder %v3135_v31, %v3423_v24 }
 0x2f7   :  { %v3431_v46 = vsel %vm872_vm2, -3e+38, %v3135_v31 }
 0x2f8   :  { %1010 = vmax.xlane.f32.xlu1 %v3431_v46 }
 0x2f9   :  { %v3434_v34 = vpop.xlane.xlu0 %820 }
 0x2fa   :  { %5950 = vst [vmem:[#allocation107_spill] sm:$0xff] %v3434_v34  ;;  %vm5712_vm3 = vcmp.eq.f32.partialorder %v3146_v26, %v3434_v34 }
 0x2fb   :  { %v3442_v11 = vsel %vm5712_vm3, -3e+38, %v3146_v26  ;;  %vm5957_vm3 = vcmp.eq.f32.partialorder %v2886_v13, %v3138_v9  ;;  %v2240_v13 = vsel %vm862_vm15, 1.0, %v5872_v41  ;;  %vm5963_vm15 = vcmp.eq.f32.partialorder %v3146_v26, %v3434_v34 }
 0x2fc   :  { %1012 = vmax.xlane.f32.xlu0 %v3442_v11  ;;  %v2251_v31 = vsel %vm5963_vm15, 1.0, %v5872_v41 }
 0x2fd   :  { %v3445_v30 = vpop.xlane.xlu1 %822 }
 0x2fe   :  { %5951 = vst [vmem:[#allocation108_spill] sm:$0xff] %v3445_v30  ;;  %vm874_vm6 = vcmp.eq.f32.partialorder %v3157_v3, %v3445_v30 }
 0x2ff   :  { %v3453_v53 = vsel %vm874_vm6, -3e+38, %v3157_v3 }
 0x300   :  { %1014 = vmax.xlane.f32.xlu1 %v3453_v53 }
 0x301   :  { %v3456_v37 = vpop.xlane.xlu0 %824 }
 0x302   :  { %5952 = vst [vmem:[#allocation109_spill] sm:$0xff] %v3456_v37  ;;  %vm5710_vm5 = vcmp.eq.f32.partialorder %v3168_v5, %v3456_v37 }
 0x303   :  { %v3464_v39 = vsel %vm5710_vm5, -3e+38, %v3168_v5  ;;  %vm5955_vm5 = vcmp.eq.f32.partialorder %v2875_v33, %v3127_v50  ;;  %v2235_v33 = vsel %vm5957_vm3, 1.0, %v5872_v41  ;;  %vm5960_vm3 = vcmp.eq.f32.partialorder %v2934_v35, %v3182_v61 }
 0x304   :  { %1016 = vmax.xlane.f32.xlu0 %v3464_v39  ;;  %v2234_v55 = vsel %vm5955_vm5, 1.0, %v5872_v41  ;;  %vm5958_vm5 = vcmp.eq.f32.partialorder %v2919_v38, %v3171_v22  ;;  %v2244_v35 = vsel %vm866_vm10, 1.0, %v5872_v41 }
 0x305   :  { %v3467_v23 = vpop.xlane.xlu1 %826  ;;  %v2238_v50 = vsel %vm5958_vm5, 1.0, %v5872_v41 }
 0x306   :  { %5953 = vst [vmem:[#allocation110_spill] sm:$0xff] %v3467_v23  ;;  %vm5711_vm4 = vcmp.eq.f32.partialorder %v3179_v63, %v3467_v23 }
 0x307   :  { %v3475_v2 = vsel %vm5711_vm4, -3e+38, %v3179_v63  ;;  %vm5956_vm4 = vcmp.eq.f32.partialorder %v2897_v58, %v3149_v28  ;;  %v2239_v58 = vsel %vm5960_vm3, 1.0, %v5872_v41 }
 0x308   :  { %1018 = vmax.xlane.f32.xlu1 %v3475_v2  ;;  %v2236_v60 = vsel %vm5956_vm4, 1.0, %v5872_v41 }
 0x309   :  { %v3478_v29 = vpop.xlane.xlu0 %828  ;;  %v3525_v38 = vpop.xlane.xlu1 %538 }
 0x30a   :  { %5954 = vst [vmem:[#allocation111_spill] sm:$0xff] %v3478_v29  ;;  %vm5714_vm7 = vcmp.eq.f32.partialorder %v3194_v16, %v3478_v29  ;;  %5961 = vst [vmem:[#allocation112_spill] sm:$0xff] %v3525_v38 }
 0x30b   :  { %v3490_v45 = vsel %vm5714_vm7, -3e+38, %v3194_v16  ;;  %vm5959_vm7 = vcmp.eq.f32.partialorder %v2908_v36, %v3160_v20  ;;  %v2242_v36 = vsel %vm864_vm8, 1.0, %v5872_v41 }
 0x30c   :  { %738 = vadd.xlane.f32.xlu1 %v2234_v55  ;;  %1020 = vmax.xlane.f32.xlu0 %v3490_v45  ;;  %v2237_v55 = vsel %vm5959_vm7, 1.0, %v5872_v41 }
 0x30d   :  { %v3535_v43 = vpop.xlane.xlu0 %540 }
 0x30e   :  { %5962 = vst [vmem:[#allocation113_spill] sm:$0xff] %v3535_v43 }
 0x310   :  { %742 = vadd.xlane.f32.xlu1 %v2236_v60  ;;  %740 = vadd.xlane.f32.xlu0 %v2235_v33  ;;  %v3545_v60 = vpop.xlane.xlu1 %542 }
 0x311   :  { %v3555_v33 = vpop.xlane.xlu0 %544 }
 0x314   :  { %746 = vadd.xlane.f32.xlu1 %v2238_v50  ;;  %744 = vadd.xlane.f32.xlu0 %v2237_v55  ;;  %v2241_v50 = vsel %vm863_vm1, 1.0, %v5872_v41  ;;  %v3557_v1 = vpop.xlane.xlu1 %546  ;;  %v2250_v55 = vsel %vm872_vm2, 1.0, %v5872_v41  ;;  %vm5964_vm1 = vcmp.eq.f32.partialorder %v3168_v5, %v3456_v37 }
 0x315   :  { %v3567_v32 = vpop.xlane.xlu0 %548  ;;  %v2253_v0 = vsel %vm5964_vm1, 1.0, %v5872_v41 }
 0x318   :  { %910 = vadd.xlane.f32.xlu1 %v2240_v13  ;;  %748 = vadd.xlane.f32.xlu0 %v2239_v58  ;;  %v2252_v13 = vsel %vm874_vm6, 1.0, %v5872_v41  ;;  %v3577_v58 = vpop.xlane.xlu1 %550 }
 0x31c   :  { %914 = vadd.xlane.f32.xlu1 %v2242_v36  ;;  %912 = vadd.xlane.f32.xlu0 %v2241_v50  ;;  %v3583_v36 = vpop.xlane.xlu0 %552  ;;  %v3585_v50 = vpop.xlane.xlu1 %554 }
 0x320   :  { %918 = vadd.xlane.f32.xlu1 %v2244_v35  ;;  %916 = vadd.xlane.f32.xlu0 %v2243_v21  ;;  %v3587_v3 = vpop.xlane.xlu0 %556  ;;  %v3589_v35 = vpop.xlane.xlu1 %718 }
 0x321   :  { %5965 = vst [vmem:[#allocation114_spill] sm:$0xff] %v3589_v35 }
 0x324   :  { %922 = vadd.xlane.f32.xlu1 %v2246_v27  ;;  %920 = vadd.xlane.f32.xlu0 %v2245_v17  ;;  %v3591_v26 = vpop.xlane.xlu0 %720  ;;  %v3593_v21 = vpop.xlane.xlu1 %722 }
 0x325   :  { %5966 = vst [vmem:[#allocation115_spill] sm:$0xff] %v3591_v26  ;;  %5967 = vst [vmem:[#allocation116_spill] sm:$0xff] %v3593_v21 }
 0x328   :  { %926 = vadd.xlane.f32.xlu1 %v2248_v44  ;;  %924 = vadd.xlane.f32.xlu0 %v2247_v48  ;;  %v3595_v27 = vpop.xlane.xlu0 %724  ;;  %v3597_v17 = vpop.xlane.xlu1 %726 }
 0x329   :  { %5968 = vst [vmem:[#allocation117_spill] sm:$0xff] %v3595_v27  ;;  %5969 = vst [vmem:[#allocation118_spill] sm:$0xff] %v3597_v17 }
 0x32c   :  { %930 = vadd.xlane.f32.xlu1 %v2250_v55  ;;  %928 = vadd.xlane.f32.xlu0 %v2249_v14  ;;  %v3599_v44 = vpop.xlane.xlu0 %728  ;;  %v3601_v5 = vpop.xlane.xlu1 %730 }
 0x32d   :  { %5970 = vst [vmem:[#allocation119_spill] sm:$0xff] %v3599_v44  ;;  %5971 = vst [vmem:[#allocation120_spill] sm:$0xff] %v3601_v5 }
 0x330   :  { %934 = vadd.xlane.f32.xlu1 %v2252_v13  ;;  %932 = vadd.xlane.f32.xlu0 %v2251_v31  ;;  %v3603_v48 = vpop.xlane.xlu0 %732  ;;  %v3605_v55 = vpop.xlane.xlu1 %734 }
 0x331   :  { %5972 = vst [vmem:[#allocation121_spill] sm:$0xff] %v3603_v48  ;;  %5973 = vst [vmem:[#allocation122_spill] sm:$0xff] %v3605_v55 }
 0x334   :  { %936 = vadd.xlane.f32.xlu0 %v2253_v0  ;;  %v3607_v14 = vpop.xlane.xlu0 %736 }
 0x335   :  { %5974 = vst [vmem:[#allocation123_spill] sm:$0xff] %v3607_v14 }
 0x359   :  { %v3609_v13 = vpop.xlane.xlu1 %990 }
 0x35a   :  { %5975 = vst [vmem:[#allocation124_spill] sm:$0xff] %v3609_v13  ;;  %vm1054_vm8 = vcmp.eq.f32.partialorder %v3321_v56, %v3609_v13 }
 0x35b   :  { %v3617_v31 = vsel %vm1054_vm8, -3e+38, %v3321_v56 }
 0x35c   :  { %1182 = vmax.xlane.f32.xlu0 %v3617_v31 }
 0x35d   :  { %v3620_v0 = vpop.xlane.xlu0 %992 }
 0x35e   :  { %5976 = vst [vmem:[#allocation125_spill] sm:$0xff] %v3620_v0  ;;  %vm1055_vm9 = vcmp.eq.f32.partialorder %v3332_v15, %v3620_v0 }
 0x35f   :  { %v3628_v6 = vsel %vm1055_vm9, -3e+38, %v3332_v15  ;;  %v2257_v55 = vsel %vm1055_vm9, 1.0, %v5872_v41 }
 0x360   :  { %1184 = vmax.xlane.f32.xlu1 %v3628_v6 }
 0x361   :  { %v3631_v51 = vpop.xlane.xlu1 %994 }
 0x362   :  { %5977 = vst [vmem:[#allocation126_spill] sm:$0xff] %v3631_v51  ;;  %vm1056_vm10 = vcmp.eq.f32.partialorder %v3343_v57, %v3631_v51 }
 0x363   :  { %v3639_v59 = vsel %vm1056_vm10, -3e+38, %v3343_v57  ;;  %v2258_v15 = vsel %vm1056_vm10, 1.0, %v5872_v41 }
 0x364   :  { %1186 = vmax.xlane.f32.xlu0 %v3639_v59 }
 0x365   :  { %v3642_v54 = vpop.xlane.xlu0 %996 }
 0x366   :  { %5978 = vst [vmem:[#allocation127_spill] sm:$0xff] %v3642_v54  ;;  %vm1057_vm11 = vcmp.eq.f32.partialorder %v3354_v40, %v3642_v54 }
 0x367   :  { %v3650_v25 = vsel %vm1057_vm11, -3e+38, %v3354_v40 }
 0x368   :  { %1188 = vmax.xlane.f32.xlu1 %v3650_v25 }
 0x369   :  { %v3653_v49 = vpop.xlane.xlu1 %998 }
 0x36a   :  { %5979 = vst [vmem:[#allocation128_spill] sm:$0xff] %v3653_v49  ;;  %vm1058_vm12 = vcmp.eq.f32.partialorder %v3365_v4, %v3653_v49 }
 0x36b   :  { %v3661_v18 = vsel %vm1058_vm12, -3e+38, %v3365_v4  ;;  %v2260_v56 = vsel %vm1058_vm12, 1.0, %v5872_v41 }
 0x36c   :  { %1190 = vmax.xlane.f32.xlu0 %v3661_v18 }
 0x36d   :  { %v3664_v48 = vpop.xlane.xlu0 %1000 }
 0x36e   :  { %5980 = vst [vmem:[#allocation129_spill] sm:$0xff] %v3664_v48  ;;  %vm1059_vm13 = vcmp.eq.f32.partialorder %v3376_v10, %v3664_v48 }
 0x36f   :  { %v3672_v8 = vsel %vm1059_vm13, -3e+38, %v3376_v10 }
 0x370   :  { %1192 = vmax.xlane.f32.xlu1 %v3672_v8 }
 0x371   :  { %v3675_v5 = vpop.xlane.xlu1 %1002 }
 0x372   :  { %5981 = vst [vmem:[#allocation130_spill] sm:$0xff] %v3675_v5  ;;  %vm1060_vm14 = vcmp.eq.f32.partialorder %v3387_v12, %v3675_v5 }
 0x373   :  { %v3683_v44 = vsel %vm1060_vm14, -3e+38, %v3387_v12 }
 0x374   :  { %1194 = vmax.xlane.f32.xlu0 %v3683_v44 }
 0x375   :  { %v3686_v17 = vpop.xlane.xlu0 %1004 }
 0x376   :  { %5982 = vst [vmem:[#allocation131_spill] sm:$0xff] %v3686_v17  ;;  %vm1061_vm0 = vcmp.eq.f32.partialorder %v3398_v62, %v3686_v17 }
 0x377   :  { %v3694_v27 = vsel %vm1061_vm0, -3e+38, %v3398_v62  ;;  %v2263_v40 = vsel %vm1061_vm0, 1.0, %v5872_v41  ;;  %v2262_v62 = vsel %vm1060_vm14, 1.0, %v5872_v41 }
 0x378   :  { %1196 = vmax.xlane.f32.xlu1 %v3694_v27 }
 0x379   :  { %v3697_v26 = vpop.xlane.xlu1 %1006 }
 0x37a   :  { %5983 = vst [vmem:[#allocation132_spill] sm:$0xff] %v3697_v26  ;;  %vm1062_vm2 = vcmp.eq.f32.partialorder %v3409_v47, %v3697_v26 }
 0x37b   :  { %v3705_v21 = vsel %vm1062_vm2, -3e+38, %v3409_v47 }
 0x37c   :  { %1198 = vmax.xlane.f32.xlu0 %v3705_v21 }
 0x37d   :  { %v3708_v35 = vpop.xlane.xlu0 %1008 }
 0x37e   :  { %5984 = vst [vmem:[#allocation133_spill] sm:$0xff] %v3708_v35  ;;  %vm1063_vm6 = vcmp.eq.f32.partialorder %v3420_v7, %v3708_v35 }
 0x37f   :  { %v3716_v43 = vsel %vm1063_vm6, -3e+38, %v3420_v7  ;;  %v2265_v57 = vsel %vm1063_vm6, 1.0, %v5872_v41  ;;  %v2264_v7 = vsel %vm1062_vm2, 1.0, %v5872_v41 }
 0x380   :  { %1200 = vmax.xlane.f32.xlu1 %v3716_v43 }
 0x381   :  { %v3719_v38 = vpop.xlane.xlu1 %1010 }
 0x382   :  { %5985 = vst [vmem:[#allocation134_spill] sm:$0xff] %v3719_v38  ;;  %vm1064_vm4 = vcmp.eq.f32.partialorder %v3431_v46, %v3719_v38 }
 0x383   :  { %v3727_v37 = vsel %vm1064_vm4, -3e+38, %v3431_v46 }
 0x384   :  { %1202 = vmax.xlane.f32.xlu0 %v3727_v37 }
 0x385   :  { %v3730_v30 = vpop.xlane.xlu0 %1012 }
 0x386   :  { %5986 = vst [vmem:[#allocation135_spill] sm:$0xff] %v3730_v30  ;;  %vm1065_vm7 = vcmp.eq.f32.partialorder %v3442_v11, %v3730_v30 }
 0x387   :  { %v3738_v34 = vsel %vm1065_vm7, -3e+38, %v3442_v11  ;;  %v2267_v4 = vsel %vm1065_vm7, 1.0, %v5872_v41  ;;  %v2266_v11 = vsel %vm1064_vm4, 1.0, %v5872_v41 }
 0x388   :  { %1204 = vmax.xlane.f32.xlu1 %v3738_v34 }
 0x389   :  { %v3741_v24 = vpop.xlane.xlu1 %1014 }
 0x38a   :  { %5987 = vst [vmem:[#allocation136_spill] sm:$0xff] %v3741_v24  ;;  %vm5733_vm5 = vcmp.eq.f32.partialorder %v3453_v53, %v3741_v24 }
 0x38b   :  { %v3749_v19 = vsel %vm5733_vm5, -3e+38, %v3453_v53  ;;  %vm5991_vm5 = vcmp.eq.f32.partialorder %v3194_v16, %v3478_v29  ;;  %v2259_v29 = vsel %vm1057_vm11, 1.0, %v5872_v41 }
 0x38c   :  { %1206 = vmax.xlane.f32.xlu0 %v3749_v19  ;;  %v2255_v28 = vsel %vm5991_vm5, 1.0, %v5872_v41 }
 0x38d   :  { %v3752_v52 = vpop.xlane.xlu0 %1016 }
 0x38e   :  { %5988 = vst [vmem:[#allocation137_spill] sm:$0xff] %v3752_v52  ;;  %vm1067_vm3 = vcmp.eq.f32.partialorder %v3464_v39, %v3752_v52 }
 0x38f   :  { %v3760_v22 = vsel %vm1067_vm3, -3e+38, %v3464_v39  ;;  %v2269_v12 = vsel %vm1067_vm3, 1.0, %v5872_v41 }
 0x390   :  { %1208 = vmax.xlane.f32.xlu1 %v3760_v22 }
 0x391   :  { %v3763_v61 = vpop.xlane.xlu1 %1018 }
 0x392   :  { %5989 = vst [vmem:[#allocation138_spill] sm:$0xff] %v3763_v61  ;;  %vm5735_vm15 = vcmp.eq.f32.partialorder %v3475_v2, %v3763_v61  ;;  %vm5994_vm9 = vcmp.eq.f32.partialorder %v3475_v2, %v3763_v61 }
 0x393   :  { %v3771_v20 = vsel %vm5735_vm15, -3e+38, %v3475_v2  ;;  %vm5992_vm15 = vcmp.eq.f32.partialorder %v3179_v63, %v3467_v23  ;;  %v2261_v63 = vsel %vm1059_vm13, 1.0, %v5872_v41 }
 0x394   :  { %1210 = vmax.xlane.f32.xlu0 %v3771_v20  ;;  %v2254_v16 = vsel %vm5992_vm15, 1.0, %v5872_v41 }
 0x395   :  { %v3774_v9 = vpop.xlane.xlu0 %1020  ;;  %v3831_v10 = vpop.xlane.xlu1 %738 }
 0x396   :  { %5990 = vst [vmem:[#allocation139_spill] sm:$0xff] %v3774_v9  ;;  %vm1069_vm1 = vcmp.eq.f32.partialorder %v3490_v45, %v3774_v9 }
 0x397   :  { %v3786_v14 = vsel %vm1069_vm1, -3e+38, %v3490_v45  ;;  %v2271_v39 = vsel %vm1069_vm1, 1.0, %v5872_v41 }
 0x398   :  { %940 = vadd.xlane.f32.xlu0 %v2255_v28  ;;  %1212 = vmax.xlane.f32.xlu1 %v3786_v14  ;;  %v2256_v28 = vsel %vm1054_vm8, 1.0, %v5872_v41  ;;  %vm5993_vm8 = vcmp.eq.f32.partialorder %v3453_v53, %v3741_v24 }
 0x39c   :  { %1104 = vadd.xlane.f32.xlu0 %v2257_v55  ;;  %938 = vadd.xlane.f32.xlu1 %v2254_v16  ;;  %v3851_v16 = vpop.xlane.xlu1 %742 }
 0x3a0   :  { %1108 = vadd.xlane.f32.xlu0 %v2259_v29  ;;  %1102 = vadd.xlane.f32.xlu1 %v2256_v28  ;;  %v3821_v29 = vpop.xlane.xlu0 %740  ;;  %v2268_v28 = vsel %vm5993_vm8, 1.0, %v5872_v41  ;;  %v3863_v46 = vpop.xlane.xlu1 %746 }
 0x3a4   :  { %1112 = vadd.xlane.f32.xlu0 %v2261_v63  ;;  %1106 = vadd.xlane.f32.xlu1 %v2258_v15  ;;  %v3841_v55 = vpop.xlane.xlu0 %744  ;;  %v2270_v63 = vsel %vm5994_vm9, 1.0, %v5872_v41 }
 0x3a8   :  { %1116 = vadd.xlane.f32.xlu0 %v2263_v40  ;;  %1110 = vadd.xlane.f32.xlu1 %v2260_v56  ;;  %v3853_v47 = vpop.xlane.xlu0 %748  ;;  %v3871_v40 = vpop.xlane.xlu1 %910 }
 0x3a9   :  { %5996 = vst [vmem:[#allocation141_spill] sm:$0xff] %v3871_v40 }
 0x3ac   :  { %1120 = vadd.xlane.f32.xlu0 %v2265_v57  ;;  %1114 = vadd.xlane.f32.xlu1 %v2262_v62  ;;  %v3869_v15 = vpop.xlane.xlu0 %912  ;;  %v3875_v56 = vpop.xlane.xlu1 %914 }
 0x3ad   :  { %5995 = vst [vmem:[#allocation140_spill] sm:$0xff] %v3869_v15  ;;  %5998 = vst [vmem:[#allocation143_spill] sm:$0xff] %v3875_v56 }
 0x3b0   :  { %1124 = vadd.xlane.f32.xlu0 %v2267_v4  ;;  %1118 = vadd.xlane.f32.xlu1 %v2264_v7  ;;  %v3873_v53 = vpop.xlane.xlu0 %916  ;;  %v3879_v57 = vpop.xlane.xlu1 %918 }
 0x3b1   :  { %5997 = vst [vmem:[#allocation142_spill] sm:$0xff] %v3873_v53  ;;  %6000 = vst [vmem:[#allocation145_spill] sm:$0xff] %v3879_v57 }
 0x3b4   :  { %1128 = vadd.xlane.f32.xlu0 %v2269_v12  ;;  %1122 = vadd.xlane.f32.xlu1 %v2266_v11  ;;  %v3877_v45 = vpop.xlane.xlu0 %920  ;;  %v3883_v4 = vpop.xlane.xlu1 %922 }
 0x3b5   :  { %5999 = vst [vmem:[#allocation144_spill] sm:$0xff] %v3877_v45  ;;  %6002 = vst [vmem:[#allocation147_spill] sm:$0xff] %v3883_v4 }
 0x3b8   :  { %1126 = vadd.xlane.f32.xlu1 %v2268_v28  ;;  %1132 = vadd.xlane.f32.xlu0 %v2271_v39  ;;  %v3881_v62 = vpop.xlane.xlu0 %924  ;;  %v3887_v2 = vpop.xlane.xlu1 %926 }
 0x3b9   :  { %6001 = vst [vmem:[#allocation146_spill] sm:$0xff] %v3881_v62 }
 0x3bc   :  { %1130 = vadd.xlane.f32.xlu1 %v2270_v63  ;;  %v3885_v7 = vpop.xlane.xlu0 %928  ;;  %v3891_v11 = vpop.xlane.xlu1 %930 }
 0x3bd   :  { %6003 = vst [vmem:[#allocation148_spill] sm:$0xff] %v3885_v7  ;;  %6005 = vst [vmem:[#allocation150_spill] sm:$0xff] %v3891_v11 }
 0x3c0   :  { %v3889_v12 = vpop.xlane.xlu0 %932  ;;  %v3895_v39 = vpop.xlane.xlu1 %934 }
 0x3c1   :  { %6004 = vst [vmem:[#allocation149_spill] sm:$0xff] %v3889_v12  ;;  %6007 = vst [vmem:[#allocation152_spill] sm:$0xff] %v3895_v39 }
 0x3c4   :  { %v3893_v28 = vpop.xlane.xlu0 %936 }
 0x3c5   :  { %6006 = vst [vmem:[#allocation151_spill] sm:$0xff] %v3893_v28 }
 0x3e5   :  { %v3897_v63 = vpop.xlane.xlu0 %1182 }
 0x3e6   :  { %6008 = vst [vmem:[#allocation153_spill] sm:$0xff] %v3897_v63  ;;  %vm1246_vm10 = vcmp.eq.f32.partialorder %v3617_v31, %v3897_v63 }
 0x3e7   :  { %v3902_v17 = vsel %vm1246_vm10, -3e+38, %v3617_v31  ;;  %v2272_v5 = vsel %vm1246_vm10, 1.0, %v5872_v41 }
 0x3e8   :  { %1374 = vmax.xlane.f32.xlu0 %v3902_v17  ;;  %1294 = vadd.xlane.f32.xlu1 %v2272_v5 }
 0x3e9   :  { %v3906_v48 = vpop.xlane.xlu1 %1184 }
 0x3ea   :  { %6009 = vst [vmem:[#allocation154_spill] sm:$0xff] %v3906_v48  ;;  %vm1247_vm11 = vcmp.eq.f32.partialorder %v3628_v6, %v3906_v48 }
 0x3eb   :  { %v2273_v49 = vsel %vm1247_vm11, 1.0, %v5872_v41  ;;  %v3912_v54 = vsel %vm1247_vm11, -3e+38, %v3628_v6 }
 0x3ec   :  { %1296 = vadd.xlane.f32.xlu0 %v2273_v49  ;;  %1376 = vmax.xlane.f32.xlu1 %v3912_v54 }
 0x3ed   :  { %v3915_v31 = vpop.xlane.xlu0 %1186 }
 0x3ee   :  { %6010 = vst [vmem:[#allocation155_spill] sm:$0xff] %v3915_v31  ;;  %vm1248_vm12 = vcmp.eq.f32.partialorder %v3639_v59, %v3915_v31 }
 0x3ef   :  { %v3923_v5 = vsel %vm1248_vm12, -3e+38, %v3639_v59  ;;  %v2274_v7 = vsel %vm1248_vm12, 1.0, %v5872_v41 }
 0x3f0   :  { %1378 = vmax.xlane.f32.xlu0 %v3923_v5 }
 0x3f1   :  { %v3926_v48 = vpop.xlane.xlu1 %1188 }
 0x3f2   :  { %6011 = vst [vmem:[#allocation156_spill] sm:$0xff] %v3926_v48  ;;  %vm1249_vm13 = vcmp.eq.f32.partialorder %v3650_v25, %v3926_v48 }
 0x3f3   :  { %v3934_v49 = vsel %vm1249_vm13, -3e+38, %v3650_v25  ;;  %v2275_v12 = vsel %vm1249_vm13, 1.0, %v5872_v41 }
 0x3f4   :  { %1380 = vmax.xlane.f32.xlu1 %v3934_v49 }
 0x3f5   :  { %v3937_v6 = vpop.xlane.xlu0 %1190 }
 0x3f6   :  { %6012 = vst [vmem:[#allocation157_spill] sm:$0xff] %v3937_v6  ;;  %vm1250_vm14 = vcmp.eq.f32.partialorder %v3661_v18, %v3937_v6 }
 0x3f7   :  { %v3945_v63 = vsel %vm1250_vm14, -3e+38, %v3661_v18  ;;  %v2276_v25 = vsel %vm1250_vm14, 1.0, %v5872_v41 }
 0x3f8   :  { %1382 = vmax.xlane.f32.xlu0 %v3945_v63 }
 0x3f9   :  { %v3948_v51 = vpop.xlane.xlu1 %1192 }
 0x3fa   :  { %6013 = vst [vmem:[#allocation158_spill] sm:$0xff] %v3948_v51  ;;  %vm1251_vm0 = vcmp.eq.f32.partialorder %v3672_v8, %v3948_v51 }
 0x3fb   :  { %v3956_v0 = vsel %vm1251_vm0, -3e+38, %v3672_v8  ;;  %v2277_v11 = vsel %vm1251_vm0, 1.0, %v5872_v41 }
 0x3fc   :  { %1384 = vmax.xlane.f32.xlu1 %v3956_v0 }
 0x3fd   :  { %v3959_v13 = vpop.xlane.xlu0 %1194 }
 0x3fe   :  { %6014 = vst [vmem:[#allocation159_spill] sm:$0xff] %v3959_v13  ;;  %vm1252_vm2 = vcmp.eq.f32.partialorder %v3683_v44, %v3959_v13 }
 0x3ff   :  { %v3967_v62 = vsel %vm1252_vm2, -3e+38, %v3683_v44  ;;  %v2278_v8 = vsel %vm1252_vm2, 1.0, %v5872_v41 }
 0x400   :  { %1386 = vmax.xlane.f32.xlu0 %v3967_v62 }
 0x401   :  { %v3970_v4 = vpop.xlane.xlu1 %1196 }
 0x402   :  { %6015 = vst [vmem:[#allocation160_spill] sm:$0xff] %v3970_v4  ;;  %vm1253_vm6 = vcmp.eq.f32.partialorder %v3694_v27, %v3970_v4 }
 0x403   :  { %v3978_v45 = vsel %vm1253_vm6, -3e+38, %v3694_v27 }
 0x404   :  { %1388 = vmax.xlane.f32.xlu1 %v3978_v45 }
 0x405   :  { %v3981_v53 = vpop.xlane.xlu0 %1198 }
 0x406   :  { %6016 = vst [vmem:[#allocation161_spill] sm:$0xff] %v3981_v53  ;;  %vm1254_vm4 = vcmp.eq.f32.partialorder %v3705_v21, %v3981_v53 }
 0x407   :  { %v3989_v57 = vsel %vm1254_vm4, -3e+38, %v3705_v21  ;;  %v2280_v18 = vsel %vm1254_vm4, 1.0, %v5872_v41 }
 0x408   :  { %1390 = vmax.xlane.f32.xlu0 %v3989_v57 }
 0x409   :  { %v3992_v56 = vpop.xlane.xlu1 %1200 }
 0x40a   :  { %6017 = vst [vmem:[#allocation162_spill] sm:$0xff] %v3992_v56  ;;  %vm1255_vm7 = vcmp.eq.f32.partialorder %v3716_v43, %v3992_v56 }
 0x40b   :  { %v4000_v15 = vsel %vm1255_vm7, -3e+38, %v3716_v43  ;;  %v2281_v59 = vsel %vm1255_vm7, 1.0, %v5872_v41 }
 0x40c   :  { %1392 = vmax.xlane.f32.xlu1 %v4000_v15 }
 0x40d   :  { %v4003_v40 = vpop.xlane.xlu0 %1202 }
 0x40e   :  { %6018 = vst [vmem:[#allocation163_spill] sm:$0xff] %v4003_v40  ;;  %vm1256_vm5 = vcmp.eq.f32.partialorder %v3727_v37, %v4003_v40 }
 0x40f   :  { %v4011_v61 = vsel %vm1256_vm5, -3e+38, %v3727_v37  ;;  %v2282_v43 = vsel %vm1256_vm5, 1.0, %v5872_v41 }
 0x410   :  { %1394 = vmax.xlane.f32.xlu0 %v4011_v61 }
 0x411   :  { %v4014_v9 = vpop.xlane.xlu1 %1204 }
 0x412   :  { %6019 = vst [vmem:[#allocation164_spill] sm:$0xff] %v4014_v9  ;;  %vm1257_vm3 = vcmp.eq.f32.partialorder %v3738_v34, %v4014_v9 }
 0x413   :  { %v4022_v24 = vsel %vm1257_vm3, -3e+38, %v3738_v34  ;;  %v2283_v27 = vsel %vm1257_vm3, 1.0, %v5872_v41 }
 0x414   :  { %1396 = vmax.xlane.f32.xlu1 %v4022_v24 }
 0x415   :  { %v4025_v23 = vpop.xlane.xlu0 %1206 }
 0x416   :  { %6020 = vst [vmem:[#allocation165_spill] sm:$0xff] %v4025_v23  ;;  %vm1258_vm15 = vcmp.eq.f32.partialorder %v3749_v19, %v4025_v23 }
 0x417   :  { %v4033_v52 = vsel %vm1258_vm15, -3e+38, %v3749_v19  ;;  %v2284_v34 = vsel %vm1258_vm15, 1.0, %v5872_v41 }
 0x418   :  { %1398 = vmax.xlane.f32.xlu0 %v4033_v52 }
 0x419   :  { %v4036_v30 = vpop.xlane.xlu1 %1208 }
 0x41a   :  { %6021 = vst [vmem:[#allocation166_spill] sm:$0xff] %v4036_v30  ;;  %vm1259_vm1 = vcmp.eq.f32.partialorder %v3760_v22, %v4036_v30 }
 0x41b   :  { %v4044_v38 = vsel %vm1259_vm1, -3e+38, %v3760_v22  ;;  %v2285_v44 = vsel %vm1259_vm1, 1.0, %v5872_v41 }
 0x41c   :  { %1400 = vmax.xlane.f32.xlu1 %v4044_v38 }
 0x41d   :  { %v4047_v26 = vpop.xlane.xlu0 %1210 }
 0x41e   :  { %6022 = vst [vmem:[#allocation167_spill] sm:$0xff] %v4047_v26  ;;  %vm1260_vm8 = vcmp.eq.f32.partialorder %v3771_v20, %v4047_v26 }
 0x41f   :  { %v4055_v35 = vsel %vm1260_vm8, -3e+38, %v3771_v20  ;;  %v2286_v22 = vsel %vm1260_vm8, 1.0, %v5872_v41 }
 0x420   :  { %1402 = vmax.xlane.f32.xlu0 %v4055_v35 }
 0x421   :  { %v4058_v28 = vpop.xlane.xlu1 %1212  ;;  %v4121_v37 = vpop.xlane.xlu0 %940 }
 0x422   :  { %6023 = vst [vmem:[#allocation168_spill] sm:$0xff] %v4058_v28  ;;  %vm1261_vm9 = vcmp.eq.f32.partialorder %v3786_v14, %v4058_v28 }
 0x423   :  { %v4066_v39 = vsel %vm1261_vm9, -3e+38, %v3786_v14  ;;  %v2287_v21 = vsel %vm1261_vm9, 1.0, %v5872_v41 }
 0x424   :  { %1404 = vmax.xlane.f32.xlu1 %v4066_v39  ;;  %1300 = vadd.xlane.f32.xlu0 %v2275_v12  ;;  %v2279_v12 = vsel %vm1253_vm6, 1.0, %v5872_v41 }
 0x428   :  { %1298 = vadd.xlane.f32.xlu1 %v2274_v7  ;;  %1304 = vadd.xlane.f32.xlu0 %v2277_v11  ;;  %v4123_v7 = vpop.xlane.xlu1 %938  ;;  %v4129_v11 = vpop.xlane.xlu0 %1104 }
 0x429   :  { %6024 = vst [vmem:[#allocation169_spill] sm:$0xff] %v4129_v11 }
 0x42c   :  { %1302 = vadd.xlane.f32.xlu1 %v2276_v25  ;;  %1308 = vadd.xlane.f32.xlu0 %v2279_v12  ;;  %v4131_v19 = vpop.xlane.xlu1 %1102  ;;  %v4133_v25 = vpop.xlane.xlu0 %1108 }
 0x42d   :  { %6025 = vst [vmem:[#allocation170_spill] sm:$0xff] %v4131_v19  ;;  %6026 = vst [vmem:[#allocation171_spill] sm:$0xff] %v4133_v25 }
 0x430   :  { %1306 = vadd.xlane.f32.xlu1 %v2278_v8  ;;  %1312 = vadd.xlane.f32.xlu0 %v2281_v59  ;;  %v4135_v14 = vpop.xlane.xlu1 %1106  ;;  %v4137_v12 = vpop.xlane.xlu0 %1112 }
 0x431   :  { %6027 = vst [vmem:[#allocation172_spill] sm:$0xff] %v4135_v14  ;;  %6028 = vst [vmem:[#allocation173_spill] sm:$0xff] %v4137_v12 }
 0x434   :  { %1310 = vadd.xlane.f32.xlu1 %v2280_v18  ;;  %1316 = vadd.xlane.f32.xlu0 %v2283_v27  ;;  %v4139_v8 = vpop.xlane.xlu1 %1110  ;;  %v4141_v59 = vpop.xlane.xlu0 %1116 }
 0x435   :  { %6029 = vst [vmem:[#allocation174_spill] sm:$0xff] %v4139_v8  ;;  %6030 = vst [vmem:[#allocation175_spill] sm:$0xff] %v4141_v59 }
 0x438   :  { %1314 = vadd.xlane.f32.xlu1 %v2282_v43  ;;  %1320 = vadd.xlane.f32.xlu0 %v2285_v44  ;;  %v4143_v18 = vpop.xlane.xlu1 %1114  ;;  %v4145_v27 = vpop.xlane.xlu0 %1120 }
 0x439   :  { %6031 = vst [vmem:[#allocation176_spill] sm:$0xff] %v4143_v18 }
 0x43c   :  { %1318 = vadd.xlane.f32.xlu1 %v2284_v34  ;;  %1324 = vadd.xlane.f32.xlu0 %v2287_v21  ;;  %v4147_v20 = vpop.xlane.xlu1 %1118  ;;  %v4149_v43 = vpop.xlane.xlu0 %1124 }
 0x440   :  { %1322 = vadd.xlane.f32.xlu1 %v2286_v22  ;;  %v4151_v44 = vpop.xlane.xlu1 %1122  ;;  %v4153_v34 = vpop.xlane.xlu0 %1128 }
 0x444   :  { %v4155_v21 = vpop.xlane.xlu1 %1126  ;;  %v4157_v22 = vpop.xlane.xlu0 %1132 }
 0x445   :  { %6032 = vst [vmem:[#allocation177_spill] sm:$0xff] %v4157_v22 }
 0x448   :  { %v4159_v4 = vpop.xlane.xlu1 %1130 }
 0x449   :  { %6033 = vst [vmem:[#allocation178_spill] sm:$0xff] %v4159_v4 }
 0x471   :  { %v4161_v13 = vpop.xlane.xlu1 %1294  ;;  %v4163_v51 = vpop.xlane.xlu0 %1374 }
 0x472   :  { %6034 = vst [vmem:[#allocation179_spill] sm:$0xff] %v4161_v13  ;;  %6035 = vst [vmem:[#allocation180_spill] sm:$0xff] %v4163_v51  ;;  %vm1438_vm10 = vcmp.eq.f32.partialorder %v3902_v17, %v4163_v51 }
 0x473   :  { %v4168_v6 = vsel %vm1438_vm10, -3e+38, %v3902_v17  ;;  %v2288_v31 = vsel %vm1438_vm10, 1.0, %v5872_v41 }
 0x474   :  { %1566 = vmax.xlane.f32.xlu0 %v4168_v6  ;;  %1486 = vadd.xlane.f32.xlu1 %v2288_v31 }
 0x475   :  { %v4172_v48 = vpop.xlane.xlu1 %1376  ;;  %v4174_v18 = vpop.xlane.xlu0 %1296 }
 0x476   :  { %6036 = vst [vmem:[#allocation181_spill] sm:$0xff] %v4172_v48  ;;  %6037 = vst [vmem:[#allocation182_spill] sm:$0xff] %v4174_v18  ;;  %vm1439_vm11 = vcmp.eq.f32.partialorder %v3912_v54, %v4172_v48 }
 0x477   :  { %v2289_v59 = vsel %vm1439_vm11, 1.0, %v5872_v41  ;;  %v4180_v12 = vsel %vm1439_vm11, -3e+38, %v3912_v54 }
 0x478   :  { %1488 = vadd.xlane.f32.xlu0 %v2289_v59  ;;  %1568 = vmax.xlane.f32.xlu1 %v4180_v12 }
 0x479   :  { %v4183_v17 = vpop.xlane.xlu0 %1378 }
 0x47a   :  { %6038 = vst [vmem:[#allocation183_spill] sm:$0xff] %v4183_v17  ;;  %vm1440_vm12 = vcmp.eq.f32.partialorder %v3923_v5, %v4183_v17 }
 0x47b   :  { %v4188_v31 = vsel %vm1440_vm12, -3e+38, %v3923_v5  ;;  %v2290_v51 = vsel %vm1440_vm12, 1.0, %v5872_v41 }
 0x47c   :  { %1570 = vmax.xlane.f32.xlu0 %v4188_v31  ;;  %1490 = vadd.xlane.f32.xlu1 %v2290_v51 }
 0x47d   :  { %v4192_v48 = vpop.xlane.xlu1 %1380 }
 0x47e   :  { %6039 = vst [vmem:[#allocation184_spill] sm:$0xff] %v4192_v48  ;;  %vm1441_vm13 = vcmp.eq.f32.partialorder %v3934_v49, %v4192_v48 }
 0x47f   :  { %v2291_v54 = vsel %vm1441_vm13, 1.0, %v5872_v41  ;;  %v4198_v59 = vsel %vm1441_vm13, -3e+38, %v3934_v49 }
 0x480   :  { %1492 = vadd.xlane.f32.xlu0 %v2291_v54  ;;  %1572 = vmax.xlane.f32.xlu1 %v4198_v59 }
 0x481   :  { %v4201_v5 = vpop.xlane.xlu0 %1382 }
 0x482   :  { %6040 = vst [vmem:[#allocation185_spill] sm:$0xff] %v4201_v5  ;;  %vm1442_vm14 = vcmp.eq.f32.partialorder %v3945_v63, %v4201_v5 }
 0x483   :  { %v4206_v51 = vsel %vm1442_vm14, -3e+38, %v3945_v63  ;;  %v2292_v17 = vsel %vm1442_vm14, 1.0, %v5872_v41 }
 0x484   :  { %1574 = vmax.xlane.f32.xlu0 %v4206_v51  ;;  %1494 = vadd.xlane.f32.xlu1 %v2292_v17 }
 0x485   :  { %v4210_v48 = vpop.xlane.xlu1 %1384 }
 0x486   :  { %6041 = vst [vmem:[#allocation186_spill] sm:$0xff] %v4210_v48  ;;  %vm1443_vm0 = vcmp.eq.f32.partialorder %v3956_v0, %v4210_v48 }
 0x487   :  { %v2293_v49 = vsel %vm1443_vm0, 1.0, %v5872_v41  ;;  %v4216_v54 = vsel %vm1443_vm0, -3e+38, %v3956_v0 }
 0x488   :  { %1496 = vadd.xlane.f32.xlu0 %v2293_v49  ;;  %1576 = vmax.xlane.f32.xlu1 %v4216_v54 }
 0x489   :  { %v4219_v63 = vpop.xlane.xlu0 %1386 }
 0x48a   :  { %6042 = vst [vmem:[#allocation187_spill] sm:$0xff] %v4219_v63  ;;  %vm1444_vm2 = vcmp.eq.f32.partialorder %v3967_v62, %v4219_v63 }
 0x48b   :  { %v4227_v17 = vsel %vm1444_vm2, -3e+38, %v3967_v62  ;;  %v2294_v56 = vsel %vm1444_vm2, 1.0, %v5872_v41 }
 0x48c   :  { %1578 = vmax.xlane.f32.xlu0 %v4227_v17 }
 0x48d   :  { %v4230_v48 = vpop.xlane.xlu1 %1388 }
 0x48e   :  { %6043 = vst [vmem:[#allocation188_spill] sm:$0xff] %v4230_v48  ;;  %vm1445_vm6 = vcmp.eq.f32.partialorder %v3978_v45, %v4230_v48 }
 0x48f   :  { %v4238_v0 = vsel %vm1445_vm6, -3e+38, %v3978_v45  ;;  %v2295_v53 = vsel %vm1445_vm6, 1.0, %v5872_v41 }
 0x490   :  { %1580 = vmax.xlane.f32.xlu1 %v4238_v0 }
 0x491   :  { %v4241_v49 = vpop.xlane.xlu0 %1390 }
 0x492   :  { %6044 = vst [vmem:[#allocation189_spill] sm:$0xff] %v4241_v49  ;;  %vm1446_vm4 = vcmp.eq.f32.partialorder %v3989_v57, %v4241_v49 }
 0x493   :  { %v4249_v5 = vsel %vm1446_vm4, -3e+38, %v3989_v57  ;;  %v2296_v45 = vsel %vm1446_vm4, 1.0, %v5872_v41 }
 0x494   :  { %1582 = vmax.xlane.f32.xlu0 %v4249_v5 }
 0x495   :  { %v4252_v18 = vpop.xlane.xlu1 %1392 }
 0x496   :  { %vm1447_vm7 = vcmp.eq.f32.partialorder %v4000_v15, %v4252_v18 }
 0x497   :  { %v4260_v8 = vsel %vm1447_vm7, -3e+38, %v4000_v15  ;;  %v2297_v22 = vsel %vm1447_vm7, 1.0, %v5872_v41 }
 0x498   :  { %1584 = vmax.xlane.f32.xlu1 %v4260_v8 }
 0x499   :  { %v4263_v14 = vpop.xlane.xlu0 %1394 }
 0x49a   :  { %6045 = vst [vmem:[#allocation190_spill] sm:$0xff] %v4263_v14  ;;  %vm1448_vm5 = vcmp.eq.f32.partialorder %v4011_v61, %v4263_v14 }
 0x49b   :  { %v4271_v13 = vsel %vm1448_vm5, -3e+38, %v4011_v61  ;;  %v2298_v15 = vsel %vm1448_vm5, 1.0, %v5872_v41 }
 0x49c   :  { %1586 = vmax.xlane.f32.xlu0 %v4271_v13 }
 0x49d   :  { %v4274_v25 = vpop.xlane.xlu1 %1396 }
 0x49e   :  { %6046 = vst [vmem:[#allocation191_spill] sm:$0xff] %v4274_v25  ;;  %vm1449_vm3 = vcmp.eq.f32.partialorder %v4022_v24, %v4274_v25  ;;  %v6091_v25 = vld [vmem:[#allocation60_spill] sm:$0xff] }
 0x49f   :  { %v4282_v11 = vsel %vm1449_vm3, -3e+38, %v4022_v24 }
 0x4a0   :  { %1588 = vmax.xlane.f32.xlu1 %v4282_v11 }
 0x4a1   :  { %v4285_v19 = vpop.xlane.xlu0 %1398 }
 0x4a2   :  { %6047 = vst [vmem:[#allocation192_spill] sm:$0xff] %v4285_v19  ;;  %vm1450_vm15 = vcmp.eq.f32.partialorder %v4033_v52, %v4285_v19 }
 0x4a3   :  { %v4293_v26 = vsel %vm1450_vm15, -3e+38, %v4033_v52  ;;  %v2300_v24 = vsel %vm1450_vm15, 1.0, %v5872_v41 }
 0x4a4   :  { %1590 = vmax.xlane.f32.xlu0 %v4293_v26 }
 0x4a5   :  { %v4296_v28 = vpop.xlane.xlu1 %1400 }
 0x4a6   :  { %6048 = vst [vmem:[#allocation193_spill] sm:$0xff] %v4296_v28  ;;  %vm1451_vm1 = vcmp.eq.f32.partialorder %v4044_v38, %v4296_v28  ;;  %v6086_v28 = vld [vmem:[#allocation58_spill] sm:$0xff] }
 0x4a7   :  { %v4304_v23 = vsel %vm1451_vm1, -3e+38, %v4044_v38 }
 0x4a8   :  { %1592 = vmax.xlane.f32.xlu1 %v4304_v23 }
 0x4a9   :  { %v4307_v30 = vpop.xlane.xlu0 %1402 }
 0x4aa   :  { %6049 = vst [vmem:[#allocation194_spill] sm:$0xff] %v4307_v30  ;;  %vm1452_vm8 = vcmp.eq.f32.partialorder %v4055_v35, %v4307_v30 }
 0x4ab   :  { %v4315_v40 = vsel %vm1452_vm8, -3e+38, %v4055_v35  ;;  %v2302_v61 = vsel %vm1452_vm8, 1.0, %v5872_v41 }
 0x4ac   :  { %1594 = vmax.xlane.f32.xlu0 %v4315_v40 }
 0x4ad   :  { %v4318_v4 = vpop.xlane.xlu1 %1404  ;;  %v4369_v38 = vpop.xlane.xlu0 %1300 }
 0x4ae   :  { %6050 = vst [vmem:[#allocation195_spill] sm:$0xff] %v4318_v4  ;;  %vm1453_vm9 = vcmp.eq.f32.partialorder %v4066_v39, %v4318_v4  ;;  %6051 = vst [vmem:[#allocation196_spill] sm:$0xff] %v4369_v38 }
 0x4af   :  { %v4326_v9 = vsel %vm1453_vm9, -3e+38, %v4066_v39  ;;  %v2303_v57 = vsel %vm1453_vm9, 1.0, %v5872_v41 }
 0x4b0   :  { %1596 = vmax.xlane.f32.xlu1 %v4326_v9  ;;  %1500 = vadd.xlane.f32.xlu0 %v2295_v53  ;;  %v2299_v53 = vsel %vm1449_vm3, 1.0, %v5872_v41 }
 0x4b1   :  { %v4371_v62 = vpop.xlane.xlu1 %1298 }
 0x4b2   :  { %6052 = vst [vmem:[#allocation197_spill] sm:$0xff] %v4371_v62 }
 0x4b4   :  { %1498 = vadd.xlane.f32.xlu1 %v2294_v56  ;;  %1504 = vadd.xlane.f32.xlu0 %v2297_v22  ;;  %v2301_v56 = vsel %vm1451_vm1, 1.0, %v5872_v41  ;;  %v4373_v22 = vpop.xlane.xlu0 %1304 }
 0x4b5   :  { %6053 = vst [vmem:[#allocation198_spill] sm:$0xff] %v4373_v22  ;;  %v4375_v52 = vpop.xlane.xlu1 %1302 }
 0x4b6   :  { %6054 = vst [vmem:[#allocation199_spill] sm:$0xff] %v4375_v52 }
 0x4b8   :  { %1502 = vadd.xlane.f32.xlu1 %v2296_v45  ;;  %1508 = vadd.xlane.f32.xlu0 %v2299_v53  ;;  %v4377_v45 = vpop.xlane.xlu0 %1308 }
 0x4b9   :  { %6055 = vst [vmem:[#allocation200_spill] sm:$0xff] %v4377_v45  ;;  %v4379_v39 = vpop.xlane.xlu1 %1306 }
 0x4ba   :  { %6056 = vst [vmem:[#allocation201_spill] sm:$0xff] %v4379_v39 }
 0x4bc   :  { %1506 = vadd.xlane.f32.xlu1 %v2298_v15  ;;  %1512 = vadd.xlane.f32.xlu0 %v2301_v56  ;;  %v4381_v53 = vpop.xlane.xlu0 %1312 }
 0x4bd   :  { %v4383_v15 = vpop.xlane.xlu1 %1310 }
 0x4c0   :  { %1510 = vadd.xlane.f32.xlu1 %v2300_v24  ;;  %1516 = vadd.xlane.f32.xlu0 %v2303_v57  ;;  %v4385_v56 = vpop.xlane.xlu0 %1316 }
 0x4c1   :  { %v4387_v35 = vpop.xlane.xlu1 %1314 }
 0x4c4   :  { %1514 = vadd.xlane.f32.xlu1 %v2302_v61  ;;  %v4389_v24 = vpop.xlane.xlu0 %1320 }
 0x4c5   :  { %v4391_v57 = vpop.xlane.xlu1 %1318 }
 0x4c8   :  { %v4393_v61 = vpop.xlane.xlu0 %1324 }
 0x4c9   :  { %6057 = vst [vmem:[#allocation202_spill] sm:$0xff] %v4393_v61  ;;  %v4395_v48 = vpop.xlane.xlu1 %1322  ;;  %v6092_v61 = vld [vmem:[#allocation44_spill] sm:$0xff] }
 0x4ca   :  { %6058 = vst [vmem:[#allocation203_spill] sm:$0xff] %v4395_v48 }
 0x4fd   :  { %v4397_v63 = vpop.xlane.xlu1 %1486  ;;  %v4399_v45 = vpop.xlane.xlu0 %1566 }
 0x4fe   :  { %6059 = vst [vmem:[#allocation204_spill] sm:$0xff] %v4397_v63  ;;  %6060 = vst [vmem:[#allocation205_spill] sm:$0xff] %v4399_v45  ;;  %vm1630_vm10 = vcmp.eq.f32.partialorder %v4168_v6, %v4399_v45 }
 0x4ff   :  { %v4404_v39 = vsel %vm1630_vm10, -3e+38, %v4168_v6  ;;  %v2304_v22 = vsel %vm1630_vm10, 1.0, %v5872_v41 }
 0x500   :  { %6061 = vst [vmem:[#allocation206_spill] sm:$0xff] %v4404_v39  ;;  %1758 = vmax.xlane.f32.xlu0 %v4404_v39  ;;  %1678 = vadd.xlane.f32.xlu1 %v2304_v22  ;;  %v6075_v39 = vld [vmem:[#allocation47_spill] sm:$0xff] }
 0x501   :  { %v4408_v52 = vpop.xlane.xlu1 %1568  ;;  %v4410_v38 = vpop.xlane.xlu0 %1488 }
 0x502   :  { %6062 = vst [vmem:[#allocation207_spill] sm:$0xff] %v4408_v52  ;;  %6063 = vst [vmem:[#allocation208_spill] sm:$0xff] %v4410_v38  ;;  %vm1631_vm11 = vcmp.eq.f32.partialorder %v4180_v12, %v4408_v52 }
 0x503   :  { %v2305_v62 = vsel %vm1631_vm11, 1.0, %v5872_v41  ;;  %v4416_v63 = vsel %vm1631_vm11, -3e+38, %v4180_v12 }
 0x504   :  { %6064 = vst [vmem:[#allocation209_spill] sm:$0xff] %v4416_v63  ;;  %1680 = vadd.xlane.f32.xlu0 %v2305_v62  ;;  %1760 = vmax.xlane.f32.xlu1 %v4416_v63 }
 0x505   :  { %v4419_v6 = vpop.xlane.xlu1 %1490  ;;  %v4421_v45 = vpop.xlane.xlu0 %1570 }
 0x506   :  { %6065 = vst [vmem:[#allocation210_spill] sm:$0xff] %v4419_v6  ;;  %6066 = vst [vmem:[#allocation211_spill] sm:$0xff] %v4421_v45  ;;  %vm1632_vm12 = vcmp.eq.f32.partialorder %v4188_v31, %v4421_v45 }
 0x507   :  { %v4426_v22 = vsel %vm1632_vm12, -3e+38, %v4188_v31  ;;  %v2306_v52 = vsel %vm1632_vm12, 1.0, %v5872_v41 }
 0x508   :  { %6067 = vst [vmem:[#allocation212_spill] sm:$0xff] %v4426_v22  ;;  %1762 = vmax.xlane.f32.xlu0 %v4426_v22  ;;  %1682 = vadd.xlane.f32.xlu1 %v2306_v52  ;;  %v374_v52 = vsub.f32 10.0, %v3281_v42 }
 0x509   :  { %v4430_v12 = vpop.xlane.xlu1 %1572  ;;  %v4432_v62 = vpop.xlane.xlu0 %1492 }
 0x50a   :  { %6068 = vst [vmem:[#allocation213_spill] sm:$0xff] %v4430_v12  ;;  %6069 = vst [vmem:[#allocation214_spill] sm:$0xff] %v4432_v62  ;;  %vm1633_vm13 = vcmp.eq.f32.partialorder %v4198_v59, %v4430_v12  ;;  %v6074_v62 = vld [vmem:[#allocation84_spill] sm:$0xff]  ;;  %v566_v42 = vsub.f32 %v374_v52, %v3545_v60  ;;  %vm454_vm2 = vcmp.gt.f32.partialorder %v374_v52, 0.0  ;;  %v6082_v60 = vld [vmem:[#allocation87_spill] sm:$0xff] }
 0x50b   :  { %v2307_v63 = vsel %vm1633_vm13, 1.0, %v5872_v41  ;;  %v4438_v6 = vsel %vm1633_vm13, -3e+38, %v4198_v59  ;;  %v376_v59 = vsub.f32 10.0, %v6074_v62 }
 0x50c   :  { %6070 = vst [vmem:[#allocation215_spill] sm:$0xff] %v4438_v6  ;;  %1684 = vadd.xlane.f32.xlu0 %v2307_v63  ;;  %1764 = vmax.xlane.f32.xlu1 %v4438_v6  ;;  %v375_v63 = vsub.f32 10.0, %v6075_v39  ;;  %v6076_v6 = vld [vmem:[#allocation86_spill] sm:$0xff] }
 0x50d   :  { %v4441_v31 = vpop.xlane.xlu1 %1494  ;;  %v4443_v45 = vpop.xlane.xlu0 %1574  ;;  %vm456_vm4 = vcmp.gt.f32.partialorder %v376_v59, 0.0 }
 0x50e   :  { %6071 = vst [vmem:[#allocation216_spill] sm:$0xff] %v4441_v31  ;;  %6072 = vst [vmem:[#allocation217_spill] sm:$0xff] %v4443_v45  ;;  %vm1634_vm14 = vcmp.eq.f32.partialorder %v4206_v51, %v4443_v45  ;;  %v378_v31 = vsub.f32 10.0, %v6076_v6  ;;  %v6081_v6 = vld [vmem:[#allocation88_spill] sm:$0xff]  ;;  %vm455_vm6 = vcmp.gt.f32.partialorder %v375_v63, 0.0 }
 0x50f   :  { %v4449_v22 = vsel %vm1634_vm14, -3e+38, %v4206_v51  ;;  %v2308_v12 = vsel %vm1634_vm14, 1.0, %v5872_v41  ;;  %v568_v51 = vsub.f32 %v376_v59, %v3557_v1  ;;  %v567_v1 = vsub.f32 %v375_v63, %v3555_v33 }
 0x510   :  { %6073 = vst [vmem:[#allocation218_spill] sm:$0xff] %v4449_v22  ;;  %1766 = vmax.xlane.f32.xlu0 %v4449_v22  ;;  %1686 = vadd.xlane.f32.xlu1 %v2308_v12  ;;  %v6080_v12 = vld [vmem:[#allocation85_spill] sm:$0xff]  ;;  %v380_v22 = vsub.f32 10.0, %v6081_v6  ;;  %vm458_vm7 = vcmp.gt.f32.partialorder %v378_v31, 0.0  ;;  %v6087_v6 = vld [vmem:[#allocation38_spill] sm:$0xff] }
 0x511   :  { %v4456_v38 = vpop.xlane.xlu1 %1576  ;;  %v4458_v30 = vpop.xlane.xlu0 %1496  ;;  %v377_v45 = vsub.f32 10.0, %v6080_v12  ;;  %v582_v12 = vsel %vm454_vm2, %v566_v42, %v374_v52  ;;  %v4483_v48 = vsel %vm456_vm4, %v568_v51, %v376_v59  ;;  %v583_v59 = vsel %vm455_vm6, %v567_v1, %v375_v63 }
 0x512   :  { %6077 = vst [vmem:[#allocation84_spill] sm:$0xff] %v4456_v38  ;;  %6078 = vst [vmem:[#allocation47_spill] sm:$0xff] %v4458_v30  ;;  %vm1635_vm0 = vcmp.eq.f32.partialorder %v4216_v54, %v4456_v38  ;;  %v379_v30 = vsub.f32 10.0, %v6082_v60  ;;  %v6083_v38 = vld [vmem:[#allocation89_spill] sm:$0xff]  ;;  %v6090_v60 = vld [vmem:[#allocation40_spill] sm:$0xff]  ;;  %vm460_vm15 = vcmp.gt.f32.partialorder %v380_v22, 0.0  ;;  %v570_v42 = vsub.f32 %v378_v31, %v3577_v58 }
 0x513   :  { %v2309_v62 = vsel %vm1635_vm0, 1.0, %v5872_v41  ;;  %v4466_v39 = vsel %vm1635_vm0, -3e+38, %v4216_v54  ;;  %v381_v4 = vsub.f32 10.0, %v6083_v38  ;;  %v6085_v54 = vld [vmem:[#allocation36_spill] sm:$0xff]  ;;  %v472_v49 = vsel %vm456_vm4, %v6091_v25, %v6090_v60  ;;  %v6096_v58 = vld [vmem:[#allocation61_spill] sm:$0xff] }
 0x514   :  { %6079 = vst [vmem:[#allocation86_spill] sm:$0xff] %v4466_v39  ;;  %1688 = vadd.xlane.f32.xlu0 %v2309_v62  ;;  %1768 = vmax.xlane.f32.xlu1 %v4466_v39  ;;  %v470_v14 = vsel %vm454_vm2, %v6086_v28, %v6085_v54  ;;  %v6088_v62 = vld [vmem:[#allocation59_spill] sm:$0xff]  ;;  %v6093_v28 = vld [vmem:[#allocation62_spill] sm:$0xff]  ;;  %vm457_vm3 = vcmp.gt.f32.partialorder %v377_v45, 0.0  ;;  %vm459_vm1 = vcmp.gt.f32.partialorder %v379_v30, 0.0  ;;  %vm646_vm9 = vcmp.gt.f32.partialorder %v582_v12, 0.0 }
 0x515   :  { %v4474_v19 = vpop.xlane.xlu0 %1578  ;;  %v471_v39 = vsel %vm455_vm6, %v6088_v62, %v6087_v6  ;;  %v474_v52 = vsel %vm458_vm7, %v6093_v28, %v6092_v61  ;;  %vm461_vm8 = vcmp.gt.f32.partialorder %v381_v4, 0.0  ;;  %v569_v25 = vsub.f32 %v377_v45, %v3567_v32  ;;  %v6095_v6 = vld [vmem:[#allocation42_spill] sm:$0xff]  ;;  %v6097_v62 = vld [vmem:[#allocation48_spill] sm:$0xff] }
 0x516   :  { %6084 = vst [vmem:[#allocation85_spill] sm:$0xff] %v4474_v19  ;;  %vm1636_vm5 = vcmp.eq.f32.partialorder %v4227_v17, %v4474_v19  ;;  %vm648_vm10 = vcmp.gt.f32.partialorder %v4483_v48, 0.0  ;;  %v572_v61 = vsub.f32 %v380_v22, %v3585_v50  ;;  %v571_v51 = vsub.f32 %v379_v30, %v3583_v36  ;;  %v6099_v50 = vld [vmem:[#allocation46_spill] sm:$0xff]  ;;  %v6100_v36 = vld [vmem:[#allocation63_spill] sm:$0xff] }
 0x517   :  { %v4486_v38 = vsel %vm1636_vm5, -3e+38, %v4227_v17  ;;  %v2310_v33 = vsel %vm1636_vm5, 1.0, %v5872_v41  ;;  %v573_v54 = vsub.f32 %v381_v4, %v3587_v3  ;;  %v473_v32 = vsel %vm457_vm3, %v6096_v58, %v6095_v6  ;;  %v6103_v3 = vld [vmem:[#allocation76_spill] sm:$0xff] }
 0x518   :  { %6089 = vst [vmem:[#allocation88_spill] sm:$0xff] %v4486_v38  ;;  %1770 = vmax.xlane.f32.xlu0 %v4486_v38  ;;  %1690 = vadd.xlane.f32.xlu1 %v2310_v33  ;;  %v6098_v33 = vld [vmem:[#allocation64_spill] sm:$0xff]  ;;  %v475_v28 = vsel %vm459_vm1, %v6100_v36, %v6099_v50  ;;  %v662_v38 = vsel %vm646_vm9, %v6103_v3, %v470_v14  ;;  %vm647_vm12 = vcmp.gt.f32.partialorder %v583_v59, 0.0 }
 0x519   :  { %v4496_v17 = vpop.xlane.xlu1 %1580  ;;  %v476_v60 = vsel %vm460_vm15, %v6098_v33, %v6097_v62  ;;  %v586_v58 = vsel %vm458_vm7, %v570_v42, %v378_v31  ;;  %v6104_v62 = vld [vmem:[#allocation78_spill] sm:$0xff]  ;;  %v588_v50 = vsel %vm460_vm15, %v572_v61, %v380_v22  ;;  %v6106_v42 = vld [vmem:[#allocation77_spill] sm:$0xff] }
 0x51a   :  { %6094 = vst [vmem:[#allocation87_spill] sm:$0xff] %v4496_v17  ;;  %vm1637_vm11 = vcmp.eq.f32.partialorder %v4238_v0, %v4496_v17  ;;  %v6101_v17 = vld [vmem:[#allocation49_spill] sm:$0xff]  ;;  %v664_v33 = vsel %vm648_vm10, %v6104_v62, %v472_v49  ;;  %v6107_v49 = vld [vmem:[#allocation123_spill] sm:$0xff]  ;;  %vm650_vm14 = vcmp.gt.f32.partialorder %v586_v58, 0.0  ;;  %vm652_vm6 = vcmp.gt.f32.partialorder %v588_v50, 0.0 }
 0x51b   :  { %v2311_v63 = vsel %vm1637_vm11, 1.0, %v5872_v41  ;;  %v4507_v1 = vsel %vm1637_vm11, -3e+38, %v4238_v0  ;;  %v6102_v0 = vld [vmem:[#allocation65_spill] sm:$0xff]  ;;  %v759_v3 = vsub.f32 %v583_v59, %v6107_v49  ;;  %v6109_v62 = vld [vmem:[#allocation79_spill] sm:$0xff]  ;;  %v6112_v49 = vld [vmem:[#allocation82_spill] sm:$0xff] }
 0x51c   :  { %1692 = vadd.xlane.f32.xlu0 %v2311_v63  ;;  %1772 = vmax.xlane.f32.xlu1 %v4507_v1  ;;  %v477_v19 = vsel %vm461_vm8, %v6102_v0, %v6101_v17  ;;  %v585_v63 = vsel %vm457_vm3, %v569_v25, %v377_v45  ;;  %v587_v17 = vsel %vm459_vm1, %v571_v51, %v379_v30  ;;  %v6105_v0 = vld [vmem:[#allocation122_spill] sm:$0xff]  ;;  %v6108_v51 = vld [vmem:[#allocation80_spill] sm:$0xff] }
 0x51d   :  { %v4525_v6 = vpop.xlane.xlu0 %1582  ;;  %v758_v31 = vsub.f32 %v582_v12, %v6105_v0  ;;  %v589_v45 = vsel %vm461_vm8, %v573_v54, %v381_v4  ;;  %v663_v25 = vsel %vm647_vm12, %v6106_v42, %v471_v39  ;;  %v760_v30 = vsub.f32 %v4483_v48, %v3831_v10  ;;  %v6110_v0 = vld [vmem:[#allocation81_spill] sm:$0xff]  ;;  %v6111_v42 = vld [vmem:[#allocation83_spill] sm:$0xff] }
 0x51e   :  { %vm1638_vm13 = vcmp.eq.f32.partialorder %v4249_v5, %v4525_v6  ;;  %vm649_vm0 = vcmp.gt.f32.partialorder %v585_v63, 0.0  ;;  %v761_v22 = vsub.f32 %v585_v63, %v3821_v29  ;;  %vm651_vm2 = vcmp.gt.f32.partialorder %v587_v17, 0.0 }
 0x51f   :  { %v4537_v14 = vsel %vm1638_vm13, -3e+38, %v4249_v5  ;;  %v2312_v36 = vsel %vm1638_vm13, 1.0, %v5872_v41  ;;  %v762_v4 = vsub.f32 %v586_v58, %v3851_v16  ;;  %vm653_vm7 = vcmp.gt.f32.partialorder %v589_v45, 0.0 }
 0x520   :  { %1774 = vmax.xlane.f32.xlu0 %v4537_v14  ;;  %1694 = vadd.xlane.f32.xlu1 %v2312_v36  ;;  %v774_v10 = vsel %vm646_vm9, %v758_v31, %v582_v12  ;;  %v666_v54 = vsel %vm650_vm14, %v6108_v51, %v474_v52  ;;  %v665_v29 = vsel %vm649_vm0, %v6109_v62, %v473_v32  ;;  %v6116_v51 = vld [vmem:[#allocation104_spill] sm:$0xff]  ;;  %v6117_v62 = vld [vmem:[#allocation105_spill] sm:$0xff] }
 0x521   :  { %v4548_v5 = vpop.xlane.xlu1 %1584  ;;  %v763_v36 = vsub.f32 %v587_v17, %v3841_v55  ;;  %v776_v16 = vsel %vm648_vm10, %v760_v30, %v4483_v48  ;;  %v667_v12 = vsel %vm651_vm2, %v6110_v0, %v475_v28  ;;  %v777_v52 = vsel %vm649_vm0, %v761_v22, %v585_v63  ;;  %v6115_v22 = vld [vmem:[#allocation149_spill] sm:$0xff] }
 0x522   :  { %vm1639_vm4 = vcmp.eq.f32.partialorder %v4260_v8, %v4548_v5  ;;  %v669_v32 = vsel %vm653_vm7, %v6111_v42, %v477_v19  ;;  %v765_v48 = vsub.f32 %v589_v45, %v3853_v47  ;;  %v778_v55 = vsel %vm650_vm14, %v762_v4, %v586_v58  ;;  %v6114_v47 = vld [vmem:[#allocation148_spill] sm:$0xff]  ;;  %v6118_v42 = vld [vmem:[#allocation106_spill] sm:$0xff] }
 0x523   :  { %v2313_v39 = vsel %vm1639_vm4, 1.0, %v5872_v41  ;;  %v4556_v61 = vsel %vm1639_vm4, -3e+38, %v4260_v8  ;;  %v775_v8 = vsel %vm647_vm12, %v759_v3, %v583_v59  ;;  %vm838_vm3 = vcmp.gt.f32.partialorder %v774_v10, 0.0 }
 0x524   :  { %1696 = vadd.xlane.f32.xlu0 %v2313_v39  ;;  %1776 = vmax.xlane.f32.xlu1 %v4556_v61  ;;  %v4578_v39 = vsel %vm652_vm6, %v6112_v49, %v476_v60  ;;  %v764_v19 = vsub.f32 %v588_v50, %v3863_v46  ;;  %v950_v28 = vsub.f32 %v774_v10, %v3887_v2  ;;  %vm839_vm15 = vcmp.gt.f32.partialorder %v775_v8, 0.0  ;;  %v6113_v60 = vld [vmem:[#allocation150_spill] sm:$0xff] }
 0x525   :  { %v4571_v31 = vpop.xlane.xlu0 %1586  ;;  %vm840_vm1 = vcmp.gt.f32.partialorder %v776_v16, 0.0  ;;  %v952_v63 = vsub.f32 %v776_v16, %v6113_v60  ;;  %v951_v3 = vsub.f32 %v775_v8, %v6114_v47  ;;  %v779_v58 = vsel %vm651_vm2, %v763_v36, %v587_v17  ;;  %v6119_v60 = vld [vmem:[#allocation107_spill] sm:$0xff] }
 0x526   :  { %vm1640_vm5 = vcmp.eq.f32.partialorder %v4271_v13, %v4571_v31  ;;  %vm841_vm8 = vcmp.gt.f32.partialorder %v777_v52, 0.0  ;;  %v953_v4 = vsub.f32 %v777_v52, %v6115_v22  ;;  %v854_v46 = vsel %vm838_vm3, %v6116_v51, %v662_v38  ;;  %v6121_v22 = vld [vmem:[#allocation108_spill] sm:$0xff] }
 0x527   :  { %v4588_v59 = vsel %vm1640_vm5, -3e+38, %v4271_v13  ;;  %vm842_vm9 = vcmp.gt.f32.partialorder %v778_v55, 0.0  ;;  %v781_v2 = vsel %vm653_vm7, %v765_v48, %v589_v45  ;;  %v855_v0 = vsel %vm839_vm15, %v6117_v62, %v663_v25  ;;  %v6120_v25 = vld [vmem:[#allocation152_spill] sm:$0xff] }
 0x528   :  { %1778 = vmax.xlane.f32.xlu0 %v4588_v59  ;;  %v856_v17 = vsel %vm840_vm1, %v6118_v42, %v664_v33  ;;  %v4615_v38 = vsel %vm652_vm6, %v764_v19, %v588_v50  ;;  %v966_v49 = vsel %vm838_vm3, %v950_v28, %v774_v10  ;;  %v857_v45 = vsel %vm841_vm8, %v6119_v60, %v665_v29  ;;  %v6122_v19 = vld [vmem:[#allocation151_spill] sm:$0xff]  ;;  %v6123_v29 = vld [vmem:[#allocation109_spill] sm:$0xff]  ;;  %v6126_v60 = vld [vmem:[#allocation132_spill] sm:$0xff] }
 0x529   :  { %v4596_v30 = vpop.xlane.xlu1 %1588  ;;  %vm843_vm11 = vcmp.gt.f32.partialorder %v779_v58, 0.0  ;;  %v954_v48 = vsub.f32 %v778_v55, %v6120_v25  ;;  %v967_v33 = vsel %vm839_vm15, %v951_v3, %v775_v8  ;;  %v968_v47 = vsel %vm840_vm1, %v952_v63, %v776_v16  ;;  %v6124_v63 = vld [vmem:[#allocation111_spill] sm:$0xff]  ;;  %v6127_v25 = vld [vmem:[#allocation134_spill] sm:$0xff] }
 0x52a   :  { %vm1641_vm10 = vcmp.eq.f32.partialorder %v4282_v11, %v4596_v30  ;;  %v4626_v51 = vsel %vm842_vm9, %v6121_v22, %v666_v54  ;;  %v955_v10 = vsub.f32 %v779_v58, %v6122_v19  ;;  %v969_v28 = vsel %vm841_vm8, %v953_v4, %v777_v52 }
 0x52b   :  { %v4612_v36 = vsel %vm1641_vm10, -3e+38, %v4282_v11  ;;  %vm845_vm12 = vcmp.gt.f32.partialorder %v781_v2, 0.0  ;;  %v859_v62 = vsel %vm843_vm11, %v6123_v29, %v667_v12  ;;  %vm844_vm14 = vcmp.gt.f32.partialorder %v4615_v38, 0.0 }
 0x52c   :  { %1780 = vmax.xlane.f32.xlu1 %v4612_v36  ;;  %vm1030_vm0 = vcmp.gt.f32.partialorder %v966_v49, 0.0  ;;  %v1143_v16 = vsub.f32 %v967_v33, %v4145_v27  ;;  %v1142_v8 = vsub.f32 %v966_v49, %v4147_v20  ;;  %vm1031_vm2 = vcmp.gt.f32.partialorder %v967_v33, 0.0 }
 0x52d   :  { %v4628_v50 = vpop.xlane.xlu0 %1590  ;;  %vm1032_vm6 = vcmp.gt.f32.partialorder %v968_v47, 0.0  ;;  %v957_v52 = vsub.f32 %v781_v2, %v4121_v37  ;;  %v4648_v12 = vsel %vm842_vm9, %v954_v48, %v778_v55  ;;  %v4652_v3 = vsel %vm845_vm12, %v6124_v63, %v669_v32  ;;  %v6125_v37 = vld [vmem:[#allocation133_spill] sm:$0xff] }
 0x52e   :  { %vm1642_vm13 = vcmp.eq.f32.partialorder %v4293_v26, %v4628_v50  ;;  %vm1033_vm4 = vcmp.gt.f32.partialorder %v969_v28, 0.0  ;;  %v956_v27 = vsub.f32 %v4615_v38, %v4123_v7  ;;  %v1145_v20 = vsub.f32 %v969_v28, %v4149_v43 }
 0x52f   :  { %v4641_v54 = vsel %vm1642_vm13, -3e+38, %v4293_v26  ;;  %v971_v42 = vsel %vm843_vm11, %v955_v10, %v779_v58  ;;  %v1047_v55 = vsel %vm1031_vm2, %v6125_v37, %v855_v0  ;;  %v1046_v32 = vsel %vm1030_vm0, %v6126_v60, %v854_v46 }
 0x530   :  { %1782 = vmax.xlane.f32.xlu0 %v4641_v54  ;;  %v1048_v48 = vsel %vm1032_vm6, %v6127_v25, %v856_v17  ;;  %v1144_v43 = vsub.f32 %v968_v47, %v4151_v44  ;;  %v1159_v58 = vsel %vm1031_vm2, %v1143_v16, %v967_v33  ;;  %v1158_v22 = vsel %vm1030_vm0, %v1142_v8, %v966_v49  ;;  %v6128_v17 = vld [vmem:[#allocation135_spill] sm:$0xff]  ;;  %v6133_v25 = vld [vmem:[#allocation164_spill] sm:$0xff] }
 0x531   :  { %v4654_v4 = vpop.xlane.xlu1 %1592  ;;  %vm1034_vm3 = vcmp.gt.f32.partialorder %v4648_v12, 0.0  ;;  %v4680_v46 = vsel %vm845_vm12, %v957_v52, %v781_v2  ;;  %v1335_v0 = vsub.f32 %v1159_v58, %v4381_v53  ;;  %v1049_v19 = vsel %vm1033_vm4, %v6128_v17, %v857_v45 }
 0x532   :  { %vm1643_vm7 = vcmp.eq.f32.partialorder %v4304_v23, %v4654_v4  ;;  %vm1035_vm15 = vcmp.gt.f32.partialorder %v971_v42, 0.0  ;;  %v1147_v44 = vsub.f32 %v971_v42, %v4153_v34  ;;  %v4691_v49 = vsel %vm844_vm14, %v956_v27, %v4615_v38  ;;  %v6129_v34 = vld [vmem:[#allocation177_spill] sm:$0xff]  ;;  %v6131_v27 = vld [vmem:[#allocation162_spill] sm:$0xff]  ;;  %v6147_v38 = vld [vmem:[#allocation168_spill] sm:$0xff] }
 0x533   :  { %v4672_v7 = vsel %vm1643_vm7, -3e+38, %v4304_v23  ;;  %v1161_v33 = vsel %vm1033_vm4, %v1145_v20, %v969_v28  ;;  %v1146_v53 = vsub.f32 %v4648_v12, %v4155_v21  ;;  %vm1223_vm8 = vcmp.gt.f32.partialorder %v1159_v58, 0.0  ;;  %v6130_v28 = vld [vmem:[#allocation137_spill] sm:$0xff] }
 0x534   :  { %1784 = vmax.xlane.f32.xlu1 %v4672_v7  ;;  %vm1222_vm9 = vcmp.gt.f32.partialorder %v1158_v22, 0.0  ;;  %v1149_v45 = vsub.f32 %v4680_v46, %v6129_v34  ;;  %v1160_v29 = vsel %vm1032_vm6, %v1144_v43, %v968_v47  ;;  %v4709_v16 = vsel %vm1035_vm15, %v6130_v28, %v859_v62  ;;  %v6132_v20 = vld [vmem:[#allocation161_spill] sm:$0xff] }
 0x535   :  { %v4685_v10 = vpop.xlane.xlu0 %1594  ;;  %vm1037_vm11 = vcmp.gt.f32.partialorder %v4680_v46, 0.0  ;;  %v1334_v21 = vsub.f32 %v1158_v22, %v4383_v15  ;;  %v1337_v8 = vsub.f32 %v1161_v33, %v4385_v56  ;;  %vm1036_vm12 = vcmp.gt.f32.partialorder %v4691_v49, 0.0 }
 0x536   :  { %vm1644_vm1 = vcmp.eq.f32.partialorder %v4315_v40, %v4685_v10  ;;  %v1351_v47 = vsel %vm1223_vm8, %v1335_v0, %v1159_v58  ;;  %vm1225_vm0 = vcmp.gt.f32.partialorder %v1161_v33, 0.0  ;;  %v4722_v62 = vsel %vm1035_vm15, %v1147_v44, %v971_v42  ;;  %v6134_v44 = vld [vmem:[#allocation178_spill] sm:$0xff] }
 0x537   :  { %v4702_v2 = vsel %vm1644_vm1, -3e+38, %v4315_v40  ;;  %v1239_v15 = vsel %vm1223_vm8, %v6131_v27, %v1047_v55  ;;  %v1238_v56 = vsel %vm1222_vm9, %v6132_v20, %v1046_v32  ;;  %v4733_v37 = vsel %vm1034_vm3, %v1146_v53, %v4648_v12 }
 0x538   :  { %1786 = vmax.xlane.f32.xlu0 %v4702_v2  ;;  %v2315_v60 = vsel %vm1641_vm10, 1.0, %v5872_v41  ;;  %vm1224_vm6 = vcmp.gt.f32.partialorder %v1160_v29, 0.0  ;;  %v1336_v55 = vsub.f32 %v1160_v29, %v4387_v35  ;;  %v4749_v32 = vsel %vm1037_vm11, %v1149_v45, %v4680_v46  ;;  %v6135_v45 = vld [vmem:[#allocation163_spill] sm:$0xff] }
 0x539   :  { %v4716_v52 = vpop.xlane.xlu1 %1596  ;;  %v4718_v63 = vpop.xlane.xlu0 %1500  ;;  %v1241_v43 = vsel %vm1225_vm0, %v6133_v25, %v1049_v19  ;;  %vm1415_vm4 = vcmp.gt.f32.partialorder %v1351_v47, 0.0  ;;  %v1339_v58 = vsub.f32 %v4722_v62, %v4389_v24  ;;  %v1350_v35 = vsel %vm1222_vm9, %v1334_v21, %v1158_v22  ;;  %v6136_v21 = vld [vmem:[#allocation202_spill] sm:$0xff] }
 0x53a   :  { %vm1645_vm2 = vcmp.eq.f32.partialorder %v4326_v9, %v4716_v52  ;;  %v1353_v17 = vsel %vm1225_vm0, %v1337_v8, %v1161_v33  ;;  %vm1227_vm10 = vcmp.gt.f32.partialorder %v4722_v62, 0.0  ;;  %v1148_v53 = vsub.f32 %v4691_v49, %v6134_v44 }
 0x53b   :  { %v4739_v42 = vsel %vm1645_vm2, -3e+38, %v4326_v9  ;;  %v1240_v19 = vsel %vm1224_vm6, %v6135_v45, %v1048_v48  ;;  %vm1226_vm15 = vcmp.gt.f32.partialorder %v4733_v37, 0.0  ;;  %v2314_v24 = vsel %vm1640_vm5, 1.0, %v5872_v41  ;;  %v6139_v45 = vld [vmem:[#allocation203_spill] sm:$0xff] }
 0x53c   :  { %1788 = vmax.xlane.f32.xlu1 %v4739_v42  ;;  %1700 = vadd.xlane.f32.xlu0 %v2315_v60  ;;  %v2317_v22 = vsel %vm1643_vm7, 1.0, %v5872_v41  ;;  %vm1229_vm8 = vcmp.gt.f32.partialorder %v4749_v32, 0.0  ;;  %v1431_v33 = vsel %vm1415_vm4, %v4252_v18, %v1239_v15  ;;  %v1352_v48 = vsel %vm1224_vm6, %v1336_v55, %v1160_v29  ;;  %v6137_v55 = vld [vmem:[#allocation189_spill] sm:$0xff] }
 0x53d   :  { %v4756_v11 = vpop.xlane.xlu1 %1498  ;;  %v1505_v0 = vpop.xlane.xlu0 %1504  ;;  %vm1414_vm9 = vcmp.gt.f32.partialorder %v1350_v35, 0.0  ;;  %vm1417_vm0 = vcmp.gt.f32.partialorder %v1353_v17, 0.0  ;;  %v1338_v13 = vsub.f32 %v4733_v37, %v4391_v57  ;;  %v1341_v23 = vsub.f32 %v4749_v32, %v6136_v21 }
 0x53e   :  { %v1527_v34 = vsub.f32 %v1351_v47, %v1505_v0  ;;  %v1355_v18 = vsel %vm1227_vm10, %v1339_v58, %v4722_v62  ;;  %v4792_v29 = vsel %vm1036_vm12, %v1148_v53, %v4691_v49  ;;  %v2316_v20 = vsel %vm1642_vm13, 1.0, %v5872_v41  ;;  %v6138_v58 = vld [vmem:[#allocation191_spill] sm:$0xff] }
 0x53f   :  { %v2319_v60 = vsel %vm1645_vm2, 1.0, %v5872_v41  ;;  %v1430_v25 = vsel %vm1414_vm9, %v6137_v55, %v1238_v56  ;;  %v1433_v0 = vsel %vm1417_vm0, %v6138_v58, %v1241_v43  ;;  %vm1416_vm13 = vcmp.gt.f32.partialorder %v1352_v48, 0.0  ;;  %v6145_v55 = vld [vmem:[#allocation139_spill] sm:$0xff] }
 0x540   :  { %1698 = vadd.xlane.f32.xlu1 %v2314_v24  ;;  %1704 = vadd.xlane.f32.xlu0 %v2317_v22  ;;  %v4779_v28 = vsel %vm1415_vm4, %v1527_v34, %v1351_v47  ;;  %vm1419_vm7 = vcmp.gt.f32.partialorder %v1355_v18, 0.0  ;;  %v1354_v9 = vsel %vm1226_vm15, %v1338_v13, %v4733_v37  ;;  %v1357_v56 = vsel %vm1229_vm8, %v1341_v23, %v4749_v32  ;;  %v6140_v22 = vld [vmem:[#allocation166_spill] sm:$0xff]  ;;  %v6142_v23 = vld [vmem:[#allocation193_spill] sm:$0xff] }
 0x541   :  { %v1503_v8 = vpop.xlane.xlu1 %1502  ;;  %v1509_v27 = vpop.xlane.xlu0 %1508  ;;  %vm1607_vm5 = vcmp.gt.f32.partialorder %v4779_v28, 0.0  ;;  %v1340_v24 = vsub.f32 %v4792_v29, %v6139_v45  ;;  %v2318_v13 = vsel %vm1644_vm1, 1.0, %v5872_v41  ;;  %vm1228_vm4 = vcmp.gt.f32.partialorder %v4792_v29, 0.0 }
 0x542   :  { %v1526_v47 = vsub.f32 %v1350_v35, %v1503_v8  ;;  %v1529_v15 = vsub.f32 %v1353_v17, %v1509_v27  ;;  %v4797_v57 = vsel %vm1607_vm5, %v4548_v5, %v1431_v33  ;;  %v1243_v33 = vsel %vm1227_vm10, %v6140_v22, %v4709_v16  ;;  %v6154_v22 = vld [vmem:[#allocation194_spill] sm:$0xff] }
 0x543   :  { %v1435_v8 = vsel %vm1419_vm7, %v6142_v23, %v1243_v33  ;;  %vm1418_vm10 = vcmp.gt.f32.partialorder %v1354_v9, 0.0 }
 0x544   :  { %1702 = vadd.xlane.f32.xlu1 %v2316_v20  ;;  %1708 = vadd.xlane.f32.xlu0 %v2319_v60  ;;  %v4812_v5 = vsel %vm1414_vm9, %v1526_v47, %v1350_v35  ;;  %v4815_v44 = vsel %vm1417_vm0, %v1529_v15, %v1353_v17  ;;  %vm1421_vm9 = vcmp.gt.f32.partialorder %v1357_v56, 0.0  ;;  %v6144_v20 = vld [vmem:[#allocation136_spill] sm:$0xff] }
 0x545   :  { %v1507_v26 = vpop.xlane.xlu1 %1506  ;;  %v1513_v53 = vpop.xlane.xlu0 %1512  ;;  %vm1606_vm2 = vcmp.gt.f32.partialorder %v4812_v5, 0.0  ;;  %vm5813_vm6 = vcmp.gt.f32.partialorder %v4815_v44, 0.0  ;;  %v1050_v60 = vsel %vm1034_vm3, %v6144_v20, %v4626_v51  ;;  %v6163_v20 = vld [vmem:[#allocation92_spill] sm:$0xff] }
 0x546   :  { %v1528_v43 = vsub.f32 %v1352_v48, %v1507_v26  ;;  %v1531_v35 = vsub.f32 %v1355_v18, %v1513_v53  ;;  %v4828_v17 = vsel %vm1606_vm2, %v4525_v6, %v1430_v25  ;;  %v4833_v34 = vsel %vm5813_vm6, %v4596_v30, %v1433_v0  ;;  %v6141_v6 = vld [vmem:[#allocation190_spill] sm:$0xff]  ;;  %v6146_v25 = vld [vmem:[#allocation165_spill] sm:$0xff]  ;;  %v6149_v26 = vld [vmem:[#allocation195_spill] sm:$0xff] }
 0x547   :  { %v1432_v30 = vsel %vm1416_vm13, %v6141_v6, %v1240_v19  ;;  %v1242_v58 = vsel %vm1226_vm15, %v6146_v25, %v1050_v60  ;;  %v6157_v6 = vld [vmem:[#allocation67_spill] sm:$0xff] }
 0x548   :  { %1706 = vadd.xlane.f32.xlu1 %v2318_v13  ;;  %v4849_v21 = vsel %vm1416_vm13, %v1528_v43, %v1352_v48  ;;  %v4854_v62 = vsel %vm1419_vm7, %v1531_v35, %v1355_v18  ;;  %v6143_v18 = vld [vmem:[#allocation110_spill] sm:$0xff]  ;;  %v6153_v35 = vld [vmem:[#allocation167_spill] sm:$0xff]  ;;  %v367_v49 = vsub.f32 10.0, %v6157_v6 }
 0x549   :  { %v1511_v16 = vpop.xlane.xlu1 %1510  ;;  %v1517_v27 = vpop.xlane.xlu0 %1516  ;;  %vm5812_vm1 = vcmp.gt.f32.partialorder %v4849_v21, 0.0  ;;  %vm5810_vm0 = vcmp.gt.f32.partialorder %v4854_v62, 0.0  ;;  %v860_v15 = vsel %vm844_vm14, %v6143_v18, %v4578_v39  ;;  %v6162_v18 = vld [vmem:[#allocation90_spill] sm:$0xff]  ;;  %v6166_v25 = vld [vmem:[#allocation27_spill] sm:$0xff] }
 0x54a   :  { %v1530_v40 = vsub.f32 %v1354_v9, %v1511_v16  ;;  %v1533_v47 = vsub.f32 %v1357_v56, %v1517_v27  ;;  %v4861_v19 = vsel %vm5812_vm1, %v4571_v31, %v1432_v30  ;;  %v4866_v48 = vsel %vm5810_vm0, %v4654_v4, %v1435_v8  ;;  %v6158_v30 = vld [vmem:[#allocation37_spill] sm:$0xff]  ;;  %v6160_v16 = vld [vmem:[#allocation35_spill] sm:$0xff] }
 0x54b   :  { %v1053_v31 = vsel %vm1037_vm11, %v6145_v55, %v4652_v3  ;;  %v1356_v4 = vsel %vm1228_vm4, %v1340_v24, %v4792_v29  ;;  %v6148_v3 = vld [vmem:[#allocation192_spill] sm:$0xff]  ;;  %v368_v23 = vsub.f32 10.0, %v6158_v30  ;;  %v6159_v8 = vld [vmem:[#allocation41_spill] sm:$0xff]  ;;  %v369_v27 = vsub.f32 10.0, %v6160_v16 }
 0x54c   :  { %v1245_v39 = vsel %vm1229_vm8, %v6147_v38, %v1053_v31  ;;  %v4890_v12 = vsel %vm1418_vm10, %v1530_v40, %v1354_v9  ;;  %v4893_v51 = vsel %vm1421_vm9, %v1533_v47, %v1357_v56  ;;  %v1434_v0 = vsel %vm1418_vm10, %v6148_v3, %v1242_v58  ;;  %v6152_v9 = vld [vmem:[#allocation138_spill] sm:$0xff]  ;;  %v6161_v40 = vld [vmem:[#allocation45_spill] sm:$0xff] }
 0x54d   :  { %v1515_v46 = vpop.xlane.xlu1 %1514  ;;  %v1437_v53 = vsel %vm1421_vm9, %v6149_v26, %v1245_v39  ;;  %vm5809_vm14 = vcmp.gt.f32.partialorder %v4890_v12, 0.0  ;;  %vm5808_vm3 = vcmp.gt.f32.partialorder %v4893_v51, 0.0  ;;  %vm1420_vm11 = vcmp.gt.f32.partialorder %v1356_v4, 0.0  ;;  %v6165_v31 = vld [vmem:[#allocation94_spill] sm:$0xff]  ;;  %v6168_v39 = vld [vmem:[#allocation28_spill] sm:$0xff]  ;;  %v6175_v30 = vld [vmem:[#allocation113_spill] sm:$0xff] }
 0x54e   :  { %v1532_v37 = vsub.f32 %v1356_v4, %v1515_v46  ;;  %v4904_v32 = vsel %vm5809_vm14, %v4628_v50, %v1434_v0  ;;  %v4909_v43 = vsel %vm5808_vm3, %v4716_v52, %v1437_v53  ;;  %v1052_v56 = vsel %vm1036_vm12, %v6152_v9, %v860_v15  ;;  %v6156_v52 = vld [vmem:[#allocation66_spill] sm:$0xff]  ;;  %v6169_v46 = vld [vmem:[#allocation51_spill] sm:$0xff]  ;;  %v6172_v9 = vld [vmem:[#allocation93_spill] sm:$0xff] }
 0x54f   :  { %6150 = vst [vmem:[#allocation89_spill] sm:$0xff] %v4904_v32  ;;  %6151 = vst [vmem:[#allocation36_spill] sm:$0xff] %v4909_v43  ;;  %v1244_v45 = vsel %vm1228_vm4, %v6153_v35, %v1052_v56  ;;  %v366_v13 = vsub.f32 10.0, %v6156_v52  ;;  %v370_v29 = vsub.f32 10.0, %v6159_v8  ;;  %vm447_vm8 = vcmp.gt.f32.partialorder %v367_v49, 0.0  ;;  %v6167_v58 = vld [vmem:[#allocation50_spill] sm:$0xff] }
 0x550   :  { %v4917_v24 = vsel %vm1420_vm11, %v1532_v37, %v1356_v4  ;;  %v1436_v33 = vsel %vm1420_vm11, %v6154_v22, %v1244_v45  ;;  %v372_v47 = vsub.f32 10.0, %v6161_v40  ;;  %v560_v60 = vsub.f32 %v368_v23, %v6163_v20  ;;  %v6170_v0 = vld [vmem:[#allocation39_spill] sm:$0xff]  ;;  %v6174_v52 = vld [vmem:[#allocation112_spill] sm:$0xff]  ;;  %v6176_v40 = vld [vmem:[#allocation114_spill] sm:$0xff] }
 0x551   :  { %vm5807_vm15 = vcmp.gt.f32.partialorder %v4917_v24, 0.0  ;;  %vm446_vm12 = vcmp.gt.f32.partialorder %v366_v13, 0.0  ;;  %v558_v15 = vsub.f32 %v366_v13, %v6162_v18  ;;  %v562_v4 = vsub.f32 %v370_v29, %v6165_v31  ;;  %v6171_v53 = vld [vmem:[#allocation43_spill] sm:$0xff]  ;;  %v6177_v20 = vld [vmem:[#allocation29_spill] sm:$0xff] }
 0x552   :  { %v4924_v50 = vsel %vm5807_vm15, %v4685_v10, %v1436_v33  ;;  %v6164_v10 = vld [vmem:[#allocation91_spill] sm:$0xff]  ;;  %v462_v38 = vsel %vm446_vm12, %v6167_v58, %v6166_v25  ;;  %vm448_vm13 = vcmp.gt.f32.partialorder %v368_v23, 0.0  ;;  %v463_v3 = vsel %vm447_vm8, %v6169_v46, %v6168_v39  ;;  %v6180_v58 = vld [vmem:[#allocation54_spill] sm:$0xff] }
 0x553   :  { %6155 = vst [vmem:[#allocation58_spill] sm:$0xff] %v4924_v50  ;;  %v559_v55 = vsub.f32 %v367_v49, %v6164_v10  ;;  %v371_v26 = vsub.f32 10.0, %v6170_v0  ;;  %v373_v37 = vsub.f32 10.0, %v6171_v53  ;;  %vm450_vm7 = vcmp.gt.f32.partialorder %v370_v29, 0.0  ;;  %v6173_v22 = vld [vmem:[#allocation95_spill] sm:$0xff]  ;;  %v6178_v10 = vld [vmem:[#allocation52_spill] sm:$0xff] }
 0x554   :  { %vm449_vm4 = vcmp.gt.f32.partialorder %v369_v27, 0.0  ;;  %v561_v56 = vsub.f32 %v369_v27, %v6172_v9  ;;  %v574_v35 = vsel %vm446_vm12, %v558_v15, %v366_v13  ;;  %v576_v45 = vsel %vm448_vm13, %v560_v60, %v368_v23  ;;  %v6179_v25 = vld [vmem:[#allocation31_spill] sm:$0xff]  ;;  %v6181_v13 = vld [vmem:[#allocation30_spill] sm:$0xff]  ;;  %v6182_v23 = vld [vmem:[#allocation53_spill] sm:$0xff] }
 0x555   :  { %vm452_vm10 = vcmp.gt.f32.partialorder %v372_v47, 0.0  ;;  %v563_v33 = vsub.f32 %v371_v26, %v6173_v22  ;;  %v564_v6 = vsub.f32 %v372_v47, %v6174_v52  ;;  %v565_v8 = vsub.f32 %v373_v37, %v6175_v30  ;;  %v6183_v60 = vld [vmem:[#allocation33_spill] sm:$0xff]  ;;  %v6184_v0 = vld [vmem:[#allocation56_spill] sm:$0xff]  ;;  %v6186_v52 = vld [vmem:[#allocation115_spill] sm:$0xff] }
 0x556   :  { %v575_v16 = vsel %vm447_vm8, %v559_v55, %v367_v49  ;;  %v750_v18 = vsub.f32 %v574_v35, %v6176_v40  ;;  %v464_v31 = vsel %vm448_vm13, %v6178_v10, %v6177_v20  ;;  %v466_v39 = vsel %vm450_vm7, %v6180_v58, %v6179_v25  ;;  %v6187_v40 = vld [vmem:[#allocation117_spill] sm:$0xff]  ;;  %v6188_v25 = vld [vmem:[#allocation118_spill] sm:$0xff]  ;;  %v6193_v50 = vld [vmem:[#allocation68_spill] sm:$0xff] }
 0x557   :  { %v578_v46 = vsel %vm450_vm7, %v562_v4, %v370_v29  ;;  %v465_v15 = vsel %vm449_vm4, %v6182_v23, %v6181_v13  ;;  %v468_v53 = vsel %vm452_vm10, %v6184_v0, %v6183_v60  ;;  %vm451_vm9 = vcmp.gt.f32.partialorder %v371_v26, 0.0  ;;  %v6185_v29 = vld [vmem:[#allocation116_spill] sm:$0xff]  ;;  %v6190_v23 = vld [vmem:[#allocation55_spill] sm:$0xff]  ;;  %v6192_v60 = vld [vmem:[#allocation57_spill] sm:$0xff] }
 0x558   :  { %vm453_vm11 = vcmp.gt.f32.partialorder %v373_v37, 0.0  ;;  %v577_v49 = vsel %vm449_vm4, %v561_v56, %v369_v27  ;;  %vm638_vm12 = vcmp.gt.f32.partialorder %v574_v35, 0.0  ;;  %vm640_vm8 = vcmp.gt.f32.partialorder %v576_v45, 0.0  ;;  %v6189_v13 = vld [vmem:[#allocation32_spill] sm:$0xff]  ;;  %v6191_v56 = vld [vmem:[#allocation34_spill] sm:$0xff] }
 0x559   :  { %vm639_vm15 = vcmp.gt.f32.partialorder %v575_v16, 0.0  ;;  %v580_v55 = vsel %vm452_vm10, %v564_v6, %v372_v47  ;;  %v579_v9 = vsel %vm451_vm9, %v563_v33, %v371_v26  ;;  %v581_v22 = vsel %vm453_vm11, %v565_v8, %v373_v37  ;;  %v6194_v26 = vld [vmem:[#allocation70_spill] sm:$0xff]  ;;  %v6195_v33 = vld [vmem:[#allocation69_spill] sm:$0xff]  ;;  %v6196_v8 = vld [vmem:[#allocation72_spill] sm:$0xff] }
 0x55a   :  { %vm642_vm13 = vcmp.gt.f32.partialorder %v578_v46, 0.0  ;;  %v752_v4 = vsub.f32 %v576_v45, %v6185_v29  ;;  %v751_v30 = vsub.f32 %v575_v16, %v6186_v52  ;;  %v753_v20 = vsub.f32 %v577_v49, %v6187_v40  ;;  %v6198_v40 = vld [vmem:[#allocation120_spill] sm:$0xff] }
 0x55b   :  { %v766_v10 = vsel %vm638_vm12, %v750_v18, %v574_v35  ;;  %v754_v58 = vsub.f32 %v578_v46, %v6188_v25  ;;  %v467_v27 = vsel %vm451_vm9, %v6190_v23, %v6189_v13  ;;  %v469_v0 = vsel %vm453_vm11, %v6192_v60, %v6191_v56  ;;  %v6197_v35 = vld [vmem:[#allocation119_spill] sm:$0xff]  ;;  %v6199_v25 = vld [vmem:[#allocation141_spill] sm:$0xff]  ;;  %v6201_v56 = vld [vmem:[#allocation140_spill] sm:$0xff] }
 0x55c   :  { %v654_v47 = vsel %vm638_vm12, %v6193_v50, %v462_v38  ;;  %v656_v37 = vsel %vm640_vm8, %v6194_v26, %v464_v31  ;;  %v655_v6 = vsel %vm639_vm15, %v6195_v33, %v463_v3  ;;  %v658_v29 = vsel %vm642_vm13, %v6196_v8, %v466_v39  ;;  %v6200_v23 = vld [vmem:[#allocation71_spill] sm:$0xff]  ;;  %v6202_v26 = vld [vmem:[#allocation74_spill] sm:$0xff]  ;;  %v6203_v8 = vld [vmem:[#allocation73_spill] sm:$0xff] }
 0x55d   :  { %vm641_vm7 = vcmp.gt.f32.partialorder %v577_v49, 0.0  ;;  %vm644_vm4 = vcmp.gt.f32.partialorder %v580_v55, 0.0  ;;  %vm643_vm10 = vcmp.gt.f32.partialorder %v579_v9, 0.0  ;;  %vm645_vm3 = vcmp.gt.f32.partialorder %v581_v22, 0.0 }
 0x55e   :  { %vm830_vm14 = vcmp.gt.f32.partialorder %v766_v10, 0.0  ;;  %v755_v18 = vsub.f32 %v579_v9, %v6197_v35  ;;  %v768_v52 = vsel %vm640_vm8, %v752_v4, %v576_v45  ;;  %v767_v50 = vsel %vm639_vm15, %v751_v30, %v575_v16  ;;  %v6204_v4 = vld [vmem:[#allocation75_spill] sm:$0xff]  ;;  %v6208_v35 = vld [vmem:[#allocation145_spill] sm:$0xff] }
 0x55f   :  { %v769_v38 = vsel %vm641_vm7, %v753_v20, %v577_v49  ;;  %v756_v31 = vsub.f32 %v580_v55, %v6198_v40  ;;  %v942_v13 = vsub.f32 %v766_v10, %v6199_v25  ;;  %v770_v3 = vsel %vm642_vm13, %v754_v58, %v578_v46  ;;  %v6205_v49 = vld [vmem:[#allocation96_spill] sm:$0xff]  ;;  %v6206_v46 = vld [vmem:[#allocation121_spill] sm:$0xff]  ;;  %v6207_v20 = vld [vmem:[#allocation143_spill] sm:$0xff] }
 0x560   :  { %v657_v39 = vsel %vm641_vm7, %v6200_v23, %v465_v15  ;;  %v943_v60 = vsub.f32 %v767_v50, %v6201_v56  ;;  %v4986_v33 = vsel %vm644_vm4, %v6202_v26, %v468_v53  ;;  %v659_v45 = vsel %vm643_vm10, %v6203_v8, %v467_v27  ;;  %v6209_v27 = vld [vmem:[#allocation142_spill] sm:$0xff]  ;;  %v6210_v56 = vld [vmem:[#allocation144_spill] sm:$0xff]  ;;  %v6211_v26 = vld [vmem:[#allocation97_spill] sm:$0xff] }
 0x561   :  { %v4992_v16 = vsel %vm645_vm3, %v6204_v4, %v469_v0  ;;  %vm831_vm15 = vcmp.gt.f32.partialorder %v767_v50, 0.0  ;;  %v846_v30 = vsel %vm830_vm14, %v6205_v49, %v654_v47  ;;  %vm833_vm9 = vcmp.gt.f32.partialorder %v769_v38, 0.0  ;;  %v6212_v49 = vld [vmem:[#allocation170_spill] sm:$0xff] }
 0x562   :  { %vm832_vm11 = vcmp.gt.f32.partialorder %v768_v52, 0.0  ;;  %v757_v15 = vsub.f32 %v581_v22, %v6206_v46  ;;  %v944_v58 = vsub.f32 %v768_v52, %v6207_v20  ;;  %v771_v53 = vsel %vm643_vm10, %v755_v18, %v579_v9  ;;  %v6213_v20 = vld [vmem:[#allocation99_spill] sm:$0xff]  ;;  %v6214_v18 = vld [vmem:[#allocation98_spill] sm:$0xff] }
 0x563   :  { %vm834_vm12 = vcmp.gt.f32.partialorder %v770_v3, 0.0  ;;  %v946_v40 = vsub.f32 %v770_v3, %v6208_v35  ;;  %v945_v25 = vsub.f32 %v769_v38, %v6209_v27  ;;  %v5002_v0 = vsel %vm644_vm4, %v756_v31, %v580_v55  ;;  %v6215_v27 = vld [vmem:[#allocation100_spill] sm:$0xff] }
 0x564   :  { %v958_v23 = vsel %vm830_vm14, %v942_v13, %v766_v10  ;;  %v947_v47 = vsub.f32 %v771_v53, %v6210_v56  ;;  %v847_v8 = vsel %vm831_vm15, %v6211_v26, %v655_v6  ;;  %v959_v4 = vsel %vm831_vm15, %v943_v60, %v767_v50  ;;  %v6216_v6 = vld [vmem:[#allocation147_spill] sm:$0xff] }
 0x565   :  { %v1134_v46 = vsub.f32 %v958_v23, %v6212_v49  ;;  %v849_v9 = vsel %vm833_vm9, %v6213_v20, %v657_v39  ;;  %v848_v35 = vsel %vm832_vm11, %v6214_v18, %v656_v37  ;;  %vm835_vm8 = vcmp.gt.f32.partialorder %v771_v53, 0.0  ;;  %v6217_v37 = vld [vmem:[#allocation146_spill] sm:$0xff]  ;;  %v6219_v26 = vld [vmem:[#allocation171_spill] sm:$0xff] }
 0x566   :  { %v850_v55 = vsel %vm834_vm12, %v6215_v27, %v658_v29  ;;  %v5015_v31 = vsel %vm645_vm3, %v757_v15, %v581_v22  ;;  %v960_v10 = vsel %vm832_vm11, %v944_v58, %v768_v52  ;;  %vm836_vm14 = vcmp.gt.f32.partialorder %v5002_v0, 0.0  ;;  %v6218_v29 = vld [vmem:[#allocation169_spill] sm:$0xff]  ;;  %v6221_v20 = vld [vmem:[#allocation179_spill] sm:$0xff]  ;;  %v6222_v27 = vld [vmem:[#allocation172_spill] sm:$0xff] }
 0x567   :  { %vm1022_vm13 = vcmp.gt.f32.partialorder %v958_v23, 0.0  ;;  %v948_v50 = vsub.f32 %v5002_v0, %v6216_v6  ;;  %v961_v13 = vsel %vm833_vm9, %v945_v25, %v769_v38  ;;  %v962_v39 = vsel %vm834_vm12, %v946_v40, %v770_v3  ;;  %v6220_v58 = vld [vmem:[#allocation101_spill] sm:$0xff]  ;;  %v6223_v25 = vld [vmem:[#allocation124_spill] sm:$0xff] }
 0x568   :  { %vm1023_vm7 = vcmp.gt.f32.partialorder %v959_v4, 0.0  ;;  %v949_v60 = vsub.f32 %v5015_v31, %v6217_v37  ;;  %v1135_v56 = vsub.f32 %v959_v4, %v6218_v29  ;;  %v963_v22 = vsel %vm835_vm8, %v947_v47, %v771_v53  ;;  %v6224_v40 = vld [vmem:[#allocation125_spill] sm:$0xff] }
 0x569   :  { %v1150_v15 = vsel %vm1022_vm13, %v1134_v46, %v958_v23  ;;  %v1137_v52 = vsub.f32 %v961_v13, %v6219_v26  ;;  %v851_v49 = vsel %vm835_vm8, %v6220_v58, %v659_v45  ;;  %vm837_vm3 = vcmp.gt.f32.partialorder %v5015_v31, 0.0  ;;  %v6225_v45 = vld [vmem:[#allocation174_spill] sm:$0xff]  ;;  %v6228_v58 = vld [vmem:[#allocation127_spill] sm:$0xff] }
 0x56a   :  { %v1326_v18 = vsub.f32 %v1150_v15, %v6221_v20  ;;  %v1136_v38 = vsub.f32 %v960_v10, %v6222_v27  ;;  %v1038_v3 = vsel %vm1022_vm13, %v6223_v25, %v846_v30  ;;  %v1039_v6 = vsel %vm1023_vm7, %v6224_v40, %v847_v8  ;;  %v6226_v46 = vld [vmem:[#allocation182_spill] sm:$0xff]  ;;  %v6229_v25 = vld [vmem:[#allocation128_spill] sm:$0xff] }
 0x56b   :  { %vm1024_vm4 = vcmp.gt.f32.partialorder %v960_v10, 0.0  ;;  %v5037_v53 = vsel %vm836_vm14, %v948_v50, %v5002_v0  ;;  %vm1025_vm10 = vcmp.gt.f32.partialorder %v961_v13, 0.0  ;;  %vm1027_vm15 = vcmp.gt.f32.partialorder %v963_v22, 0.0  ;;  %v6227_v50 = vld [vmem:[#allocation126_spill] sm:$0xff]  ;;  %v6273_v0 = vld [vmem:[#allocation88_spill] sm:$0xff] }
 0x56c   :  { %vm1026_vm9 = vcmp.gt.f32.partialorder %v962_v39, 0.0  ;;  %v1138_v23 = vsub.f32 %v962_v39, %v6225_v45  ;;  %v5043_v47 = vsel %vm837_vm3, %v949_v60, %v5015_v31  ;;  %vm1214_vm11 = vcmp.gt.f32.partialorder %v1150_v15, 0.0  ;;  %v6230_v45 = vld [vmem:[#allocation204_spill] sm:$0xff]  ;;  %v6231_v60 = vld [vmem:[#allocation129_spill] sm:$0xff] }
 0x56d   :  { %v1151_v30 = vsel %vm1023_vm7, %v1135_v56, %v959_v4  ;;  %v1342_v8 = vsel %vm1214_vm11, %v1326_v18, %v1150_v15  ;;  %v1153_v29 = vsel %vm1025_vm10, %v1137_v52, %v961_v13  ;;  %v1040_v26 = vsel %vm1024_vm4, %v6227_v50, %v848_v35  ;;  %v6232_v4 = vld [vmem:[#allocation173_spill] sm:$0xff]  ;;  %v6233_v35 = vld [vmem:[#allocation175_spill] sm:$0xff]  ;;  %v6237_v50 = vld [vmem:[#allocation208_spill] sm:$0xff] }
 0x56e   :  { %v1327_v37 = vsub.f32 %v1151_v30, %v6226_v46  ;;  %v1041_v20 = vsel %vm1025_vm10, %v6228_v58, %v849_v9  ;;  %v1152_v27 = vsel %vm1024_vm4, %v1136_v38, %v960_v10  ;;  %v1042_v40 = vsel %vm1026_vm9, %v6229_v25, %v850_v55  ;;  %v6234_v55 = vld [vmem:[#allocation197_spill] sm:$0xff]  ;;  %v6236_v38 = vld [vmem:[#allocation154_spill] sm:$0xff] }
 0x56f   :  { %v1518_v43 = vsub.f32 %v1342_v8, %v6230_v45  ;;  %v5055_v32 = vsel %vm1027_vm15, %v6231_v60, %v851_v49  ;;  %vm1029_vm12 = vcmp.gt.f32.partialorder %v5043_v47, 0.0  ;;  %vm1028_vm8 = vcmp.gt.f32.partialorder %v5037_v53, 0.0  ;;  %v6235_v49 = vld [vmem:[#allocation153_spill] sm:$0xff]  ;;  %v6238_v45 = vld [vmem:[#allocation176_spill] sm:$0xff] }
 0x570   :  { %vm1215_vm13 = vcmp.gt.f32.partialorder %v1151_v30, 0.0  ;;  %v1139_v13 = vsub.f32 %v963_v22, %v6232_v4  ;;  %v1141_v9 = vsub.f32 %v5043_v47, %v6233_v35  ;;  %v1154_v10 = vsel %vm1026_vm9, %v1138_v23, %v962_v39  ;;  %v6239_v4 = vld [vmem:[#allocation196_spill] sm:$0xff] }
 0x571   :  { %vm1217_vm7 = vcmp.gt.f32.partialorder %v1153_v29, 0.0  ;;  %vm1406_vm4 = vcmp.gt.f32.partialorder %v1342_v8, 0.0  ;;  %v1328_v56 = vsub.f32 %v1152_v27, %v6234_v55  ;;  %v1343_v52 = vsel %vm1215_vm13, %v1327_v37, %v1151_v30  ;;  %v6240_v23 = vld [vmem:[#allocation156_spill] sm:$0xff] }
 0x572   :  { %vm1216_vm10 = vcmp.gt.f32.partialorder %v1152_v27, 0.0  ;;  %v1230_v18 = vsel %vm1214_vm11, %v6235_v49, %v1038_v3  ;;  %v1231_v46 = vsel %vm1215_vm13, %v6236_v38, %v1039_v6  ;;  %v1519_v58 = vsub.f32 %v1343_v52, %v6237_v50  ;;  %v6241_v6 = vld [vmem:[#allocation155_spill] sm:$0xff]  ;;  %v6242_v38 = vld [vmem:[#allocation206_spill] sm:$0xff] }
 0x573   :  { %v1534_v25 = vsel %vm1406_vm4, %v1518_v43, %v1342_v8  ;;  %v1140_v60 = vsub.f32 %v5037_v53, %v6238_v45  ;;  %v1329_v39 = vsub.f32 %v1153_v29, %v6239_v4  ;;  %v5074_v35 = vsel %vm1217_vm7, %v6240_v23, %v1041_v20  ;;  %v6243_v20 = vld [vmem:[#allocation210_spill] sm:$0xff]  ;;  %v6245_v4 = vld [vmem:[#allocation180_spill] sm:$0xff] }
 0x574   :  { %vm1218_vm9 = vcmp.gt.f32.partialorder %v1154_v10, 0.0  ;;  %v5077_v30 = vsel %vm1027_vm15, %v1139_v13, %v963_v22  ;;  %v5082_v15 = vsel %vm1029_vm12, %v1141_v9, %v5043_v47  ;;  %vm1407_vm11 = vcmp.gt.f32.partialorder %v1343_v52, 0.0  ;;  %v6244_v9 = vld [vmem:[#allocation157_spill] sm:$0xff] }
 0x575   :  { %v1232_v37 = vsel %vm1216_vm10, %v6241_v6, %v1040_v26  ;;  %v1344_v55 = vsel %vm1216_vm10, %v1328_v56, %v1152_v27  ;;  %vm1598_vm13 = vcmp.gt.f32.partialorder %v1534_v25, 0.0  ;;  %v1535_v13 = vsel %vm1407_vm11, %v1519_v58, %v1343_v52  ;;  %v6247_v58 = vld [vmem:[#allocation205_spill] sm:$0xff] }
 0x576   :  { %v1520_v50 = vsub.f32 %v1344_v55, %v6243_v20  ;;  %v5093_v45 = vsel %vm1218_vm9, %v6244_v9, %v1042_v40  ;;  %v1422_v26 = vsel %vm1406_vm4, %v6245_v4, %v1230_v18  ;;  %v5100_v27 = vsel %vm1028_vm8, %v1140_v60, %v5037_v53  ;;  %v6249_v18 = vld [vmem:[#allocation209_spill] sm:$0xff]  ;;  %v6251_v4 = vld [vmem:[#allocation198_spill] sm:$0xff] }
 0x577   :  { %v1345_v56 = vsel %vm1217_vm7, %v1329_v39, %v1153_v29  ;;  %v1614_v20 = vsel %vm1598_vm13, %v6247_v58, %v1422_v26  ;;  %vm1408_vm10 = vcmp.gt.f32.partialorder %v1344_v55, 0.0  ;;  %vm1599_vm7 = vcmp.gt.f32.partialorder %v1535_v13, 0.0  ;;  %v6250_v29 = vld [vmem:[#allocation214_spill] sm:$0xff] }
 0x578   :  { %v1331_v26 = vsub.f32 %v5077_v30, %v6251_v4 }
 0x589   :  { %v1679_v3 = vpop.xlane.xlu1 %1678  ;;  %v1759_v43 = vpop.xlane.xlu0 %1758 }
 0x58a   :  { %v1710_v49 = vsub.f32 %v1534_v25, %v1679_v3  ;;  %vm1822_vm0 = vcmp.eq.f32.partialorder %v6242_v38, %v1759_v43  ;;  %v6246_v3 = vld [vmem:[#allocation199_spill] sm:$0xff] }
 0x58b   :  { %v2320_v22 = vsel %vm1822_vm0, 1.0, %v5872_v41  ;;  %v1330_v6 = vsub.f32 %v1154_v10, %v6246_v3  ;;  %v6252_v3 = vld [vmem:[#allocation181_spill] sm:$0xff] }
 0x58c   :  { %v5103_v23 = vsel %vm1598_vm13, %v1710_v49, %v1534_v25  ;;  %1870 = vadd.xlane.f32.xlu1 %v2320_v22  ;;  %v1521_v25 = vsub.f32 %v1345_v56, %v6250_v29  ;;  %v1934_v49 = vsel %vm1822_vm0, -3e+38, %v6242_v38  ;;  %v1536_v22 = vsel %vm1408_vm10, %v1520_v50, %v1344_v55  ;;  %v6253_v38 = vld [vmem:[#allocation207_spill] sm:$0xff] }
 0x58d   :  { %vm5811_vm15 = vcmp.gt.f32.partialorder %v5103_v23, 0.0  ;;  %v1761_v40 = vpop.xlane.xlu1 %1760  ;;  %v1681_v9 = vpop.xlane.xlu0 %1680  ;;  %vm1219_vm13 = vcmp.gt.f32.partialorder %v5077_v30, 0.0  ;;  %v1423_v58 = vsel %vm1407_vm11, %v6252_v3, %v1231_v46  ;;  %vm1409_vm0 = vcmp.gt.f32.partialorder %v1345_v56, 0.0  ;;  %v6255_v46 = vld [vmem:[#allocation216_spill] sm:$0xff]  ;;  %v6256_v3 = vld [vmem:[#allocation183_spill] sm:$0xff] }
 0x58e   :  { %v5110_v8 = vsel %vm5811_vm15, %v1759_v43, %v1614_v20  ;;  %vm1823_vm4 = vcmp.eq.f32.partialorder %v6249_v18, %v1761_v40  ;;  %v1711_v60 = vsub.f32 %v1535_v13, %v1681_v9  ;;  %v1346_v9 = vsel %vm1218_vm9, %v1330_v6, %v1154_v10 }
 0x58f   :  { %6248 = vst [vmem:[#allocation38_spill] sm:$0xff] %v5110_v8  ;;  %v2321_v39 = vsel %vm1823_vm4, 1.0, %v5872_v41  ;;  %v1615_v50 = vsel %vm1599_vm7, %v6253_v38, %v1423_v58  ;;  %vm1600_vm1 = vcmp.gt.f32.partialorder %v1536_v22, 0.0  ;;  %v6254_v8 = vld [vmem:[#allocation212_spill] sm:$0xff]  ;;  %v1935_v10 = vsel %vm1823_vm4, -3e+38, %v6249_v18 }
 0x590   :  { %1872 = vadd.xlane.f32.xlu0 %v2321_v39  ;;  %1950 = vmax.xlane.f32.xlu1 %v1934_v49  ;;  %v5127_v20 = vsel %vm1599_vm7, %v1711_v60, %v1535_v13  ;;  %v1522_v60 = vsub.f32 %v1346_v9, %v6255_v46  ;;  %v1537_v13 = vsel %vm1409_vm0, %v1521_v25, %v1345_v56  ;;  %v6258_v18 = vld [vmem:[#allocation211_spill] sm:$0xff]  ;;  %vm1410_vm11 = vcmp.gt.f32.partialorder %v1346_v9, 0.0 }
 0x591   :  { %v1683_v29 = vpop.xlane.xlu1 %1682  ;;  %v1763_v43 = vpop.xlane.xlu0 %1762  ;;  %vm1791_vm15 = vcmp.gt.f32.partialorder %v5127_v20, 0.0  ;;  %v1347_v39 = vsel %vm1219_vm13, %v1331_v26, %v5077_v30  ;;  %v1424_v58 = vsel %vm1408_vm10, %v6256_v3, %v1232_v37  ;;  %vm1601_vm10 = vcmp.gt.f32.partialorder %v1537_v13, 0.0  ;;  %v6260_v37 = vld [vmem:[#allocation47_spill] sm:$0xff]  ;;  %v6261_v3 = vld [vmem:[#allocation184_spill] sm:$0xff] }
 0x592   :  { %v1712_v4 = vsub.f32 %v1536_v22, %v1683_v29  ;;  %vm1824_vm6 = vcmp.eq.f32.partialorder %v6254_v8, %v1763_v43  ;;  %v5136_v52 = vsel %vm1791_vm15, %v1761_v40, %v1615_v50  ;;  %v6257_v29 = vld [vmem:[#allocation201_spill] sm:$0xff]  ;;  %v1616_v38 = vsel %vm1600_vm1, %v6258_v18, %v1424_v58  ;;  %v6262_v18 = vld [vmem:[#allocation200_spill] sm:$0xff] }
 0x593   :  { %v2322_v6 = vsel %vm1824_vm6, 1.0, %v5872_v41  ;;  %v1332_v40 = vsub.f32 %v5100_v27, %v6257_v29  ;;  %v1425_v58 = vsel %vm1409_vm0, %v6261_v3, %v5074_v35  ;;  %vm1411_vm7 = vcmp.gt.f32.partialorder %v1347_v39, 0.0  ;;  %v6265_v3 = vld [vmem:[#allocation158_spill] sm:$0xff] }
 0x594   :  { %v5149_v49 = vsel %vm1600_vm1, %v1712_v4, %v1536_v22  ;;  %1952 = vmax.xlane.f32.xlu0 %v1935_v10  ;;  %1874 = vadd.xlane.f32.xlu1 %v2322_v6  ;;  %v6259_v22 = vld [vmem:[#allocation215_spill] sm:$0xff]  ;;  %v1523_v4 = vsub.f32 %v1347_v39, %v6260_v37  ;;  %v1936_v10 = vsel %vm1824_vm6, -3e+38, %v6254_v8  ;;  %v1538_v6 = vsel %vm1410_vm11, %v1522_v60, %v1346_v9  ;;  %v6264_v37 = vld [vmem:[#allocation218_spill] sm:$0xff] }
 0x595   :  { %vm5814_vm9 = vcmp.gt.f32.partialorder %v5149_v49, 0.0  ;;  %v1765_v50 = vpop.xlane.xlu1 %1764  ;;  %v1685_v25 = vpop.xlane.xlu0 %1684  ;;  %vm1220_vm1 = vcmp.gt.f32.partialorder %v5100_v27, 0.0  ;;  %vm1602_vm0 = vcmp.gt.f32.partialorder %v1538_v6, 0.0 }
 0x596   :  { %v5159_v26 = vsel %vm5814_vm9, %v1763_v43, %v1616_v38  ;;  %vm1825_vm4 = vcmp.eq.f32.partialorder %v6259_v22, %v1765_v50  ;;  %v1713_v55 = vsub.f32 %v1537_v13, %v1685_v25  ;;  %v1333_v38 = vsub.f32 %v5082_v15, %v6262_v18  ;;  %v6263_v25 = vld [vmem:[#allocation213_spill] sm:$0xff] }
 0x597   :  { %v2323_v46 = vsel %vm1825_vm4, 1.0, %v5872_v41  ;;  %v1348_v8 = vsel %vm1220_vm1, %v1332_v40, %v5100_v27  ;;  %v1617_v35 = vsel %vm1601_vm10, %v6263_v25, %v1425_v58  ;;  %v1937_v40 = vsel %vm1825_vm4, -3e+38, %v6259_v22  ;;  %v6268_v25 = vld [vmem:[#allocation86_spill] sm:$0xff] }
 0x598   :  { %1876 = vadd.xlane.f32.xlu0 %v2323_v46  ;;  %1954 = vmax.xlane.f32.xlu1 %v1936_v10  ;;  %v5175_v29 = vsel %vm1601_vm10, %v1713_v55, %v1537_v13  ;;  %v1524_v46 = vsub.f32 %v1348_v8, %v4756_v11  ;;  %v1539_v13 = vsel %vm1411_vm7, %v1523_v4, %v1347_v39  ;;  %vm1221_vm10 = vcmp.gt.f32.partialorder %v5082_v15, 0.0  ;;  %v6266_v11 = vld [vmem:[#allocation185_spill] sm:$0xff] }
 0x599   :  { %v1687_v43 = vpop.xlane.xlu1 %1686  ;;  %v1767_v60 = vpop.xlane.xlu0 %1766  ;;  %vm5815_vm6 = vcmp.gt.f32.partialorder %v5175_v29, 0.0  ;;  %v1235_v58 = vsel %vm1219_vm13, %v6265_v3, %v5055_v32  ;;  %v1349_v22 = vsel %vm1221_vm10, %v1333_v38, %v5082_v15  ;;  %v6267_v4 = vld [vmem:[#allocation217_spill] sm:$0xff]  ;;  %vm1412_vm13 = vcmp.gt.f32.partialorder %v1348_v8, 0.0  ;;  %v6270_v3 = vld [vmem:[#allocation186_spill] sm:$0xff]  ;;  %v6281_v15 = vld [vmem:[#allocation87_spill] sm:$0xff] }
 0x59a   :  { %v1714_v56 = vsub.f32 %v1538_v6, %v1687_v43  ;;  %vm1826_vm9 = vcmp.eq.f32.partialorder %v6264_v37, %v1767_v60  ;;  %v5188_v55 = vsel %vm5815_vm6, %v1765_v50, %v1617_v35  ;;  %v1426_v50 = vsel %vm1410_vm11, %v6266_v11, %v5093_v45 }
 0x59b   :  { %v2324_v10 = vsel %vm1826_vm9, 1.0, %v5872_v41  ;;  %v1618_v43 = vsel %vm1602_vm0, %v6267_v4, %v1426_v50  ;;  %vm1603_vm11 = vcmp.gt.f32.partialorder %v1539_v13, 0.0  ;;  %v1525_v9 = vsub.f32 %v1349_v22, %v4718_v63  ;;  %v6271_v50 = vld [vmem:[#allocation130_spill] sm:$0xff] }
 0x59c   :  { %v5203_v18 = vsel %vm1602_vm0, %v1714_v56, %v1538_v6  ;;  %1956 = vmax.xlane.f32.xlu0 %v1937_v40  ;;  %1878 = vadd.xlane.f32.xlu1 %v2324_v10  ;;  %v1938_v35 = vsel %vm1826_vm9, -3e+38, %v6264_v37  ;;  %v1540_v56 = vsel %vm1412_vm13, %v1524_v46, %v1348_v8  ;;  %v6269_v40 = vld [vmem:[#allocation102_spill] sm:$0xff]  ;;  %v1427_v11 = vsel %vm1411_vm7, %v6270_v3, %v1235_v58  ;;  %v6272_v46 = vld [vmem:[#allocation84_spill] sm:$0xff]  ;;  %v6278_v3 = vld [vmem:[#allocation85_spill] sm:$0xff] }
 0x59d   :  { %vm5816_vm4 = vcmp.gt.f32.partialorder %v5203_v18, 0.0  ;;  %v1769_v30 = vpop.xlane.xlu1 %1768  ;;  %v1689_v32 = vpop.xlane.xlu0 %1688  ;;  %v852_v10 = vsel %vm836_vm14, %v6269_v40, %v4986_v33  ;;  %vm1413_vm9 = vcmp.gt.f32.partialorder %v1349_v22, 0.0  ;;  %v6279_v8 = vld [vmem:[#allocation160_spill] sm:$0xff] }
 0x59e   :  { %v5215_v6 = vsel %vm5816_vm4, %v1767_v60, %v1618_v43  ;;  %vm1827_vm6 = vcmp.eq.f32.partialorder %v6268_v25, %v1769_v30  ;;  %v1715_v45 = vsub.f32 %v1539_v13, %v1689_v32  ;;  %v1044_v4 = vsel %vm1028_vm8, %v6271_v50, %v852_v10  ;;  %v6276_v10 = vld [vmem:[#allocation187_spill] sm:$0xff] }
 0x59f   :  { %v2325_v38 = vsel %vm1827_vm6, 1.0, %v5872_v41  ;;  %v1619_v43 = vsel %vm1603_vm11, %v6272_v46, %v1427_v11  ;;  %vm1604_vm4 = vcmp.gt.f32.partialorder %v1540_v56, 0.0  ;;  %v1939_v58 = vsel %vm1827_vm6, -3e+38, %v6268_v25 }
 0x5a0   :  { %1880 = vadd.xlane.f32.xlu0 %v2325_v38  ;;  %1958 = vmax.xlane.f32.xlu1 %v1938_v35  ;;  %v5232_v63 = vsel %vm1603_vm11, %v1715_v45, %v1539_v13  ;;  %v6274_v13 = vld [vmem:[#allocation159_spill] sm:$0xff]  ;;  %v1541_v45 = vsel %vm1413_vm9, %v1525_v9, %v1349_v22 }
 0x5a1   :  { %v1691_v60 = vpop.xlane.xlu1 %1690  ;;  %v1771_v37 = vpop.xlane.xlu0 %1770  ;;  %vm1795_vm0 = vcmp.gt.f32.partialorder %v5232_v63, 0.0  ;;  %v1236_v53 = vsel %vm1220_vm1, %v6274_v13, %v1044_v4  ;;  %v6275_v38 = vld [vmem:[#allocation103_spill] sm:$0xff]  ;;  %vm1605_vm1 = vcmp.gt.f32.partialorder %v1541_v45, 0.0 }
 0x5a2   :  { %v1716_v33 = vsub.f32 %v1540_v56, %v1691_v60  ;;  %vm1828_vm14 = vcmp.eq.f32.partialorder %v6273_v0, %v1771_v37  ;;  %v5242_v39 = vsel %vm1795_vm0, %v1769_v30, %v1619_v43  ;;  %v853_v35 = vsel %vm837_vm3, %v6275_v38, %v4992_v16  ;;  %v6277_v30 = vld [vmem:[#allocation131_spill] sm:$0xff]  ;;  %v6280_v60 = vld [vmem:[#allocation188_spill] sm:$0xff] }
 0x5a3   :  { %v2326_v32 = vsel %vm1828_vm14, 1.0, %v5872_v41  ;;  %v1428_v27 = vsel %vm1412_vm13, %v6276_v10, %v1236_v53  ;;  %v1045_v25 = vsel %vm1029_vm12, %v6277_v30, %v853_v35  ;;  %v1940_v4 = vsel %vm1828_vm14, -3e+38, %v6273_v0 }
 0x5a4   :  { %v5258_v40 = vsel %vm1604_vm4, %v1716_v33, %v1540_v56  ;;  %1960 = vmax.xlane.f32.xlu0 %v1939_v58  ;;  %1882 = vadd.xlane.f32.xlu1 %v2326_v32  ;;  %v1620_v11 = vsel %vm1604_vm4, %v6278_v3, %v1428_v27  ;;  %v1237_v56 = vsel %vm1221_vm10, %v6279_v8, %v1045_v25 }
 0x5a5   :  { %vm1796_vm8 = vcmp.gt.f32.partialorder %v5258_v40, 0.0  ;;  %v1773_v9 = vpop.xlane.xlu1 %1772  ;;  %v1693_v50 = vpop.xlane.xlu0 %1692  ;;  %v1429_v46 = vsel %vm1413_vm9, %v6280_v60, %v1237_v56 }
 0x5a6   :  { %v5269_v16 = vsel %vm1796_vm8, %v1771_v37, %v1620_v11  ;;  %vm1829_vm3 = vcmp.eq.f32.partialorder %v4507_v1, %v1773_v9  ;;  %v1717_v31 = vsub.f32 %v1541_v45, %v1693_v50  ;;  %v1621_v53 = vsel %vm1605_vm1, %v6281_v15, %v1429_v46 }
 0x5a7   :  { %v2327_v47 = vsel %vm1829_vm3, 1.0, %v5872_v41  ;;  %v1941_v22 = vsel %vm1829_vm3, -3e+38, %v4507_v1  ;;  %vm6282_vm3 = vcmp.gt.f32.partialorder %v4815_v44, 0.0 }
 0x5a8   :  { %1884 = vadd.xlane.f32.xlu0 %v2327_v47  ;;  %1962 = vmax.xlane.f32.xlu1 %v1940_v4  ;;  %v5283_v43 = vsel %vm1605_vm1, %v1717_v31, %v1541_v45 }
 0x5a9   :  { %v1695_v33 = vpop.xlane.xlu1 %1694  ;;  %v1775_v13 = vpop.xlane.xlu0 %1774  ;;  %vm1797_vm12 = vcmp.gt.f32.partialorder %v5283_v43, 0.0 }
 0x5aa   :  { %v1718_v58 = vsub.f32 %v4812_v5, %v1695_v33  ;;  %vm1830_vm7 = vcmp.eq.f32.partialorder %v4537_v14, %v1775_v13  ;;  %v5291_v37 = vsel %vm1797_vm12, %v1773_v9, %v1621_v53 }
 0x5ab   :  { %v2328_v0 = vsel %vm1830_vm7, 1.0, %v5872_v41 }
 0x5ac   :  { %v5300_v32 = vsel %vm1606_vm2, %v1718_v58, %v4812_v5  ;;  %1964 = vmax.xlane.f32.xlu0 %v1941_v22  ;;  %1886 = vadd.xlane.f32.xlu1 %v2328_v0  ;;  %v1942_v5 = vsel %vm1830_vm7, -3e+38, %v4537_v14  ;;  %vm6283_vm7 = vcmp.gt.f32.partialorder %v4849_v21, 0.0 }
 0x5ad   :  { %vm1798_vm6 = vcmp.gt.f32.partialorder %v5300_v32, 0.0  ;;  %v1777_v45 = vpop.xlane.xlu1 %1776  ;;  %v1697_v38 = vpop.xlane.xlu0 %1696 }
 0x5ae   :  { %v5306_v35 = vsel %vm1798_vm6, %v1775_v13, %v4828_v17  ;;  %vm1831_vm10 = vcmp.eq.f32.partialorder %v4556_v61, %v1777_v45  ;;  %v1719_v1 = vsub.f32 %v4779_v28, %v1697_v38 }
 0x5af   :  { %v2329_v10 = vsel %vm1831_vm10, 1.0, %v5872_v41  ;;  %v1943_v25 = vsel %vm1831_vm10, -3e+38, %v4556_v61  ;;  %vm6284_vm10 = vcmp.gt.f32.partialorder %v4854_v62, 0.0 }
 0x5b0   :  { %1888 = vadd.xlane.f32.xlu0 %v2329_v10  ;;  %1966 = vmax.xlane.f32.xlu1 %v1942_v5  ;;  %v5315_v27 = vsel %vm1607_vm5, %v1719_v1, %v4779_v28  ;;  %v6287_v10 = vld [vmem:[#allocation89_spill] sm:$0xff]  ;;  %v6288_v5 = vld [vmem:[#allocation36_spill] sm:$0xff] }
 0x5b1   :  { %v1779_v30 = vpop.xlane.xlu0 %1778  ;;  %vm1799_vm2 = vcmp.gt.f32.partialorder %v5315_v27, 0.0 }
 0x5b2   :  { %vm1832_vm4 = vcmp.eq.f32.partialorder %v4588_v59, %v1779_v30  ;;  %v5322_v17 = vsel %vm1799_vm2, %v1777_v45, %v4797_v57 }
 0x5b3   :  { %v2330_v14 = vsel %vm1832_vm4, 1.0, %v5872_v41  ;;  %v1944_v11 = vsel %vm1832_vm4, -3e+38, %v4588_v59 }
 0x5b4   :  { %1968 = vmax.xlane.f32.xlu0 %v1943_v25  ;;  %1890 = vadd.xlane.f32.xlu1 %v2330_v14 }
 0x5b5   :  { %v1781_v3 = vpop.xlane.xlu1 %1780 }
 0x5b6   :  { %vm1833_vm5 = vcmp.eq.f32.partialorder %v4612_v36, %v1781_v3 }
 0x5b7   :  { %v2331_v28 = vsel %vm1833_vm5, 1.0, %v5872_v41  ;;  %v1945_v57 = vsel %vm1833_vm5, -3e+38, %v4612_v36 }
 0x5b8   :  { %1892 = vadd.xlane.f32.xlu0 %v2331_v28  ;;  %1970 = vmax.xlane.f32.xlu1 %v1944_v11 }
 0x5b9   :  { %v1783_v9 = vpop.xlane.xlu0 %1782 }
 0x5ba   :  { %vm1834_vm13 = vcmp.eq.f32.partialorder %v4641_v54, %v1783_v9 }
 0x5bb   :  { %v2332_v61 = vsel %vm1834_vm13, 1.0, %v5872_v41  ;;  %v1946_v8 = vsel %vm1834_vm13, -3e+38, %v4641_v54  ;;  %vm6285_vm13 = vcmp.gt.f32.partialorder %v4890_v12, 0.0 }
 0x5bc   :  { %1972 = vmax.xlane.f32.xlu0 %v1945_v57  ;;  %1894 = vadd.xlane.f32.xlu1 %v2332_v61  ;;  %v6292_v57 = vld [vmem:[#allocation38_spill] sm:$0xff] }
 0x5bd   :  { %v1785_v50 = vpop.xlane.xlu1 %1784 }
 0x5be   :  { %vm1835_vm11 = vcmp.eq.f32.partialorder %v4672_v7, %v1785_v50 }
 0x5bf   :  { %v2333_v31 = vsel %vm1835_vm11, 1.0, %v5872_v41  ;;  %v1947_v56 = vsel %vm1835_vm11, -3e+38, %v4672_v7  ;;  %vm6286_vm11 = vcmp.gt.f32.partialorder %v4893_v51, 0.0 }
 0x5c0   :  { %1896 = vadd.xlane.f32.xlu0 %v2333_v31  ;;  %1974 = vmax.xlane.f32.xlu1 %v1946_v8 }
 0x5c1   :  { %v1787_v59 = vpop.xlane.xlu0 %1786 }
 0x5c2   :  { %vm1836_vm9 = vcmp.eq.f32.partialorder %v4702_v2, %v1787_v59 }
 0x5c3   :  { %v2334_v36 = vsel %vm1836_vm9, 1.0, %v5872_v41  ;;  %v1948_v54 = vsel %vm1836_vm9, -3e+38, %v4702_v2 }
 0x5c4   :  { %1976 = vmax.xlane.f32.xlu0 %v1947_v56  ;;  %1898 = vadd.xlane.f32.xlu1 %v2334_v36 }
 0x5c5   :  { %v1789_v47 = vpop.xlane.xlu1 %1788  ;;  %v1701_v4 = vpop.xlane.xlu0 %1700 }
 0x5c6   :  { %vm1837_vm14 = vcmp.eq.f32.partialorder %v4739_v42, %v1789_v47  ;;  %v1721_v60 = vsub.f32 %v4815_v44, %v1701_v4 }
 0x5c7   :  { %v2335_v46 = vsel %vm1837_vm14, 1.0, %v5872_v41  ;;  %v1949_v2 = vsel %vm1837_vm14, -3e+38, %v4739_v42 }
 0x5c8   :  { %1900 = vadd.xlane.f32.xlu0 %v2335_v46  ;;  %1978 = vmax.xlane.f32.xlu1 %v1948_v54  ;;  %v5345_v7 = vsel %vm6282_vm3, %v1721_v60, %v4815_v44  ;;  %vm6289_vm3 = vcmp.gt.f32.partialorder %v4917_v24, 0.0 }
 0x5c9   :  { %v1699_v33 = vpop.xlane.xlu1 %1698  ;;  %v1705_v13 = vpop.xlane.xlu0 %1704  ;;  %vm1801_vm1 = vcmp.gt.f32.partialorder %v5345_v7, 0.0 }
 0x5ca   :  { %v1720_v15 = vsub.f32 %v4849_v21, %v1699_v33  ;;  %v1723_v53 = vsub.f32 %v4854_v62, %v1705_v13  ;;  %v5353_v41 = vsel %vm1801_vm1, %v1781_v3, %v4833_v34  ;;  %v6296_v13 = vld [vmem:[#allocation13_spill] sm:$0xff] }
 0x5cc   :  { %1980 = vmax.xlane.f32.xlu0 %v1949_v2  ;;  %v5359_v44 = vsel %vm6283_vm7, %v1720_v15, %v4849_v21  ;;  %v5364_v58 = vsel %vm6284_vm10, %v1723_v53, %v4854_v62  ;;  %vm6291_vm10 = vcmp.gt.f32.partialorder %v5103_v23, 0.0 }
 0x5cd   :  { %v1703_v22 = vpop.xlane.xlu1 %1702  ;;  %v1709_v0 = vpop.xlane.xlu0 %1708  ;;  %vm1800_vm4 = vcmp.gt.f32.partialorder %v5359_v44, 0.0  ;;  %vm1803_vm5 = vcmp.gt.f32.partialorder %v5364_v58, 0.0 }
 0x5ce   :  { %v1722_v34 = vsub.f32 %v4890_v12, %v1703_v22  ;;  %v1725_v42 = vsub.f32 %v4893_v51, %v1709_v0  ;;  %v5373_v21 = vsel %vm1800_vm4, %v1779_v30, %v4861_v19  ;;  %v5378_v62 = vsel %vm1803_vm5, %v1785_v50, %v4866_v48  ;;  %v6290_v30 = vld [vmem:[#allocation58_spill] sm:$0xff]  ;;  %v6293_v50 = vld [vmem:[#allocation11_spill] sm:$0xff] }
 0x5cf   :  { %v6298_v22 = vld [vmem:[#allocation14_spill] sm:$0xff] }
 0x5d0   :  { %v5383_v45 = vsel %vm6285_vm13, %v1722_v34, %v4890_v12  ;;  %v5388_v38 = vsel %vm6286_vm11, %v1725_v42, %v4893_v51 }
 0x5d1   :  { %v1707_v1 = vpop.xlane.xlu1 %1706  ;;  %vm1802_vm9 = vcmp.gt.f32.partialorder %v5383_v45, 0.0  ;;  %vm1805_vm14 = vcmp.gt.f32.partialorder %v5388_v38, 0.0 }
 0x5d2   :  { %v1724_v19 = vsub.f32 %v4917_v24, %v1707_v1  ;;  %v5396_v48 = vsel %vm1802_vm9, %v1783_v9, %v6287_v10  ;;  %v5401_v12 = vsel %vm1805_vm14, %v1789_v47, %v6288_v5  ;;  %v6294_v47 = vld [vmem:[#allocation12_spill] sm:$0xff]  ;;  %v6300_v10 = vld [vmem:[#allocation15_spill] sm:$0xff] }
 0x5d4   :  { %v5406_v51 = vsel %vm6289_vm3, %v1724_v19, %v4917_v24 }
 0x5d5   :  { %vm1804_vm7 = vcmp.gt.f32.partialorder %v5406_v51, 0.0 }
 0x5d6   :  { %v5412_v25 = vsel %vm1804_vm7, %v1787_v59, %v6290_v30 }
 0x615   :  { %v1871_v14 = vpop.xlane.xlu1 %1870 }
 0x616   :  { %v1902_v3 = vsub.f32 %v5103_v23, %v1871_v14 }
 0x618   :  { %v1918_v28 = vsel %vm6291_vm10, %v1902_v3, %v5103_v23  ;;  %v6301_v3 = vld [vmem:[#allocation16_spill] sm:$0xff] }
 0x619   :  { %vm1982_vm13 = vcmp.gt.f32.partialorder %v1918_v28, 0.0  ;;  %v1951_v11 = vpop.xlane.xlu1 %1950  ;;  %v1873_v9 = vpop.xlane.xlu0 %1872 }
 0x61a   :  { %v1998_v24 = vsel %vm1982_vm13, %v1951_v11, %v6292_v57  ;;  %v1903_v61 = vsub.f32 %v5127_v20, %v1873_v9  ;;  %vm6295_vm13 = vcmp.gt.f32.partialorder %v5149_v49, 0.0 }
 0x61b   :  { %vm2014_vm11 = vcmp.ge.f32.partialorder %v6293_v50, %v1998_v24 }
 0x61c   :  { %v5422_v31 = vsel %vm2014_vm11, %v6293_v50, 0.0  ;;  %v1919_v8 = vsel %vm1791_vm15, %v1903_v61, %v5127_v20  ;;  %v6302_v61 = vld [vmem:[#allocation17_spill] sm:$0xff] }
 0x61d   :  { %v1875_v59 = vpop.xlane.xlu1 %1874  ;;  %2046 = vadd.xlane.f32.xlu1 %v5422_v31  ;;  %vm1983_vm3 = vcmp.gt.f32.partialorder %v1919_v8, 0.0  ;;  %v1953_v23 = vpop.xlane.xlu0 %1952 }
 0x61e   :  { %v1904_v56 = vsub.f32 %v5149_v49, %v1875_v59  ;;  %v1999_v36 = vsel %vm1983_vm3, %v1953_v23, %v5136_v52  ;;  %vm6297_vm3 = vcmp.gt.f32.partialorder %v5175_v29, 0.0  ;;  %v6303_v23 = vld [vmem:[#allocation18_spill] sm:$0xff] }
 0x61f   :  { %vm2015_vm10 = vcmp.ge.f32.partialorder %v6294_v47, %v1999_v36 }
 0x620   :  { %v1920_v4 = vsel %vm6295_vm13, %v1904_v56, %v5149_v49  ;;  %v5435_v60 = vsel %vm2015_vm10, %v6294_v47, 0.0 }
 0x621   :  { %vm1984_vm11 = vcmp.gt.f32.partialorder %v1920_v4, 0.0  ;;  %v1955_v20 = vpop.xlane.xlu1 %1954  ;;  %2048 = vadd.xlane.f32.xlu0 %v5435_v60  ;;  %v1877_v46 = vpop.xlane.xlu0 %1876 }
 0x622   :  { %v2000_v54 = vsel %vm1984_vm11, %v1955_v20, %v5159_v26  ;;  %v1905_v33 = vsub.f32 %v5175_v29, %v1877_v46  ;;  %vm6299_vm11 = vcmp.gt.f32.partialorder %v5203_v18, 0.0  ;;  %v6304_v46 = vld [vmem:[#allocation19_spill] sm:$0xff] }
 0x623   :  { %vm2016_vm15 = vcmp.ge.f32.partialorder %v6296_v13, %v2000_v54 }
 0x624   :  { %v5442_v52 = vsel %vm2016_vm15, %v6296_v13, 0.0  ;;  %v1921_v49 = vsel %vm6297_vm3, %v1905_v33, %v5175_v29 }
 0x625   :  { %v1879_v15 = vpop.xlane.xlu1 %1878  ;;  %2050 = vadd.xlane.f32.xlu1 %v5442_v52  ;;  %vm1985_vm10 = vcmp.gt.f32.partialorder %v1921_v49, 0.0  ;;  %v1957_v53 = vpop.xlane.xlu0 %1956  ;;  %v6305_v49 = vld [vmem:[#allocation20_spill] sm:$0xff] }
 0x626   :  { %v1906_v2 = vsub.f32 %v5203_v18, %v1879_v15  ;;  %v2001_v26 = vsel %vm1985_vm10, %v1957_v53, %v5188_v55 }
 0x627   :  { %vm2017_vm13 = vcmp.ge.f32.partialorder %v6298_v22, %v2001_v26 }
 0x628   :  { %v1922_v0 = vsel %vm6299_vm11, %v1906_v2, %v5203_v18  ;;  %v5455_v34 = vsel %vm2017_vm13, %v6298_v22, 0.0 }
 0x629   :  { %vm1986_vm15 = vcmp.gt.f32.partialorder %v1922_v0, 0.0  ;;  %v1959_v29 = vpop.xlane.xlu1 %1958  ;;  %2052 = vadd.xlane.f32.xlu0 %v5455_v34  ;;  %v1881_v42 = vpop.xlane.xlu0 %1880  ;;  %v6306_v0 = vld [vmem:[#allocation21_spill] sm:$0xff] }
 0x62a   :  { %v2002_v1 = vsel %vm1986_vm15, %v1959_v29, %v5215_v6  ;;  %v1907_v19 = vsub.f32 %v5232_v63, %v1881_v42 }
 0x62b   :  { %vm2018_vm3 = vcmp.ge.f32.partialorder %v6300_v10, %v2002_v1 }
 0x62c   :  { %v5462_v55 = vsel %vm2018_vm3, %v6300_v10, 0.0  ;;  %v1923_v18 = vsel %vm1795_vm0, %v1907_v19, %v5232_v63  ;;  %v6307_v19 = vld [vmem:[#allocation22_spill] sm:$0xff] }
 0x62d   :  { %v1883_v5 = vpop.xlane.xlu1 %1882  ;;  %2054 = vadd.xlane.f32.xlu1 %v5462_v55  ;;  %vm1987_vm10 = vcmp.gt.f32.partialorder %v1923_v18, 0.0  ;;  %v1961_v30 = vpop.xlane.xlu0 %1960 }
 0x62e   :  { %v1908_v14 = vsub.f32 %v5258_v40, %v1883_v5  ;;  %v2003_v6 = vsel %vm1987_vm10, %v1961_v30, %v5242_v39 }
 0x62f   :  { %vm2019_vm13 = vcmp.ge.f32.partialorder %v6301_v3, %v2003_v6  ;;  %v6308_v6 = vld [vmem:[#allocation23_spill] sm:$0xff] }
 0x630   :  { %v1924_v28 = vsel %vm1796_vm8, %v1908_v14, %v5258_v40  ;;  %v5475_v11 = vsel %vm2019_vm13, %v6301_v3, 0.0 }
 0x631   :  { %vm1988_vm11 = vcmp.gt.f32.partialorder %v1924_v28, 0.0  ;;  %v1963_v63 = vpop.xlane.xlu1 %1962  ;;  %2056 = vadd.xlane.f32.xlu0 %v5475_v11  ;;  %v1885_v9 = vpop.xlane.xlu0 %1884 }
 0x632   :  { %v2004_v57 = vsel %vm1988_vm11, %v1963_v63, %v5269_v16  ;;  %v1909_v24 = vsub.f32 %v5283_v43, %v1885_v9  ;;  %v6309_v9 = vld [vmem:[#allocation24_spill] sm:$0xff] }
 0x633   :  { %vm2020_vm0 = vcmp.ge.f32.partialorder %v6302_v61, %v2004_v57 }
 0x634   :  { %v5482_v39 = vsel %vm2020_vm0, %v6302_v61, 0.0  ;;  %v1925_v40 = vsel %vm1797_vm12, %v1909_v24, %v5283_v43 }
 0x635   :  { %v1887_v50 = vpop.xlane.xlu1 %1886  ;;  %2058 = vadd.xlane.f32.xlu1 %v5482_v39  ;;  %vm1989_vm8 = vcmp.gt.f32.partialorder %v1925_v40, 0.0  ;;  %v1965_v8 = vpop.xlane.xlu0 %1964 }
 0x636   :  { %v1910_v59 = vsub.f32 %v5300_v32, %v1887_v50  ;;  %v2005_v16 = vsel %vm1989_vm8, %v1965_v8, %v5291_v37  ;;  %v6310_v8 = vld [vmem:[#allocation25_spill] sm:$0xff] }
 0x637   :  { %vm2021_vm15 = vcmp.ge.f32.partialorder %v6303_v23, %v2005_v16 }
 0x638   :  { %v1926_v56 = vsel %vm1798_vm6, %v1910_v59, %v5300_v32  ;;  %v5495_v36 = vsel %vm2021_vm15, %v6303_v23, 0.0  ;;  %v6311_v23 = vld [vmem:[#allocation26_spill] sm:$0xff] }
 0x639   :  { %vm1990_vm3 = vcmp.gt.f32.partialorder %v1926_v56, 0.0  ;;  %v1967_v43 = vpop.xlane.xlu1 %1966  ;;  %2060 = vadd.xlane.f32.xlu0 %v5495_v36  ;;  %v1889_v47 = vpop.xlane.xlu0 %1888 }
 0x63a   :  { %v2006_v4 = vsel %vm1990_vm3, %v1967_v43, %v5306_v35  ;;  %v1911_v20 = vsub.f32 %v5315_v27, %v1889_v47 }
 0x63b   :  { %vm2022_vm12 = vcmp.ge.f32.partialorder %v6304_v46, %v2006_v4 }
 0x63c   :  { %v5502_v37 = vsel %vm2022_vm12, %v6304_v46, 0.0  ;;  %v1927_v32 = vsel %vm1799_vm2, %v1911_v20, %v5315_v27 }
 0x63d   :  { %v1891_v54 = vpop.xlane.xlu1 %1890  ;;  %2062 = vadd.xlane.f32.xlu1 %v5502_v37  ;;  %vm1991_vm6 = vcmp.gt.f32.partialorder %v1927_v32, 0.0  ;;  %v1969_v33 = vpop.xlane.xlu0 %1968 }
 0x63e   :  { %v1912_v13 = vsub.f32 %v5359_v44, %v1891_v54  ;;  %v2007_v35 = vsel %vm1991_vm6, %v1969_v33, %v5322_v17 }
 0x63f   :  { %vm2023_vm10 = vcmp.ge.f32.partialorder %v6305_v49, %v2007_v35 }
 0x640   :  { %v1928_v15 = vsel %vm1800_vm4, %v1912_v13, %v5359_v44  ;;  %v5515_v53 = vsel %vm2023_vm10, %v6305_v49, 0.0 }
 0x641   :  { %vm1992_vm13 = vcmp.gt.f32.partialorder %v1928_v15, 0.0  ;;  %v1971_v27 = vpop.xlane.xlu1 %1970  ;;  %2064 = vadd.xlane.f32.xlu0 %v5515_v53  ;;  %v1893_v2 = vpop.xlane.xlu0 %1892 }
 0x642   :  { %v2008_v26 = vsel %vm1992_vm13, %v1971_v27, %v5373_v21  ;;  %v1913_v22 = vsub.f32 %v5345_v7, %v1893_v2 }
 0x643   :  { %vm2024_vm2 = vcmp.ge.f32.partialorder %v6306_v0, %v2008_v26 }
 0x644   :  { %v5522_v17 = vsel %vm2024_vm2, %v6306_v0, 0.0  ;;  %v1929_v44 = vsel %vm1801_vm1, %v1913_v22, %v5345_v7 }
 0x645   :  { %v1895_v29 = vpop.xlane.xlu1 %1894  ;;  %2066 = vadd.xlane.f32.xlu1 %v5522_v17  ;;  %vm1993_vm4 = vcmp.gt.f32.partialorder %v1929_v44, 0.0  ;;  %v1973_v42 = vpop.xlane.xlu0 %1972 }
 0x646   :  { %v1914_v1 = vsub.f32 %v5383_v45, %v1895_v29  ;;  %v2009_v21 = vsel %vm1993_vm4, %v1973_v42, %v5353_v41 }
 0x647   :  { %vm2025_vm11 = vcmp.ge.f32.partialorder %v6307_v19, %v2009_v21 }
 0x648   :  { %v1930_v10 = vsel %vm1802_vm9, %v1914_v1, %v5383_v45  ;;  %v5535_v18 = vsel %vm2025_vm11, %v6307_v19, 0.0 }
 0x649   :  { %vm1994_vm0 = vcmp.gt.f32.partialorder %v1930_v10, 0.0  ;;  %v1975_v7 = vpop.xlane.xlu1 %1974  ;;  %2068 = vadd.xlane.f32.xlu0 %v5535_v18  ;;  %v1897_v5 = vpop.xlane.xlu0 %1896 }
 0x64a   :  { %v2010_v30 = vsel %vm1994_vm0, %v1975_v7, %v5396_v48  ;;  %v1915_v14 = vsub.f32 %v5364_v58, %v1897_v5 }
 0x64b   :  { %vm2026_vm1 = vcmp.ge.f32.partialorder %v6308_v6, %v2010_v30 }
 0x64c   :  { %v5542_v41 = vsel %vm2026_vm1, %v6308_v6, 0.0  ;;  %v1931_v45 = vsel %vm1803_vm5, %v1915_v14, %v5364_v58 }
 0x64d   :  { %2070 = vadd.xlane.f32.xlu1 %v5542_v41  ;;  %v1899_v3 = vpop.xlane.xlu1 %1898  ;;  %vm1995_vm9 = vcmp.gt.f32.partialorder %v1931_v45, 0.0  ;;  %v1977_v28 = vpop.xlane.xlu0 %1976 }
 0x64e   :  { %v1916_v63 = vsub.f32 %v5406_v51, %v1899_v3  ;;  %v2011_v48 = vsel %vm1995_vm9, %v1977_v28, %v5378_v62 }
 0x64f   :  { %vm2027_vm8 = vcmp.ge.f32.partialorder %v6309_v9, %v2011_v48 }
 0x650   :  { %v1932_v57 = vsel %vm1804_vm7, %v1916_v63, %v5406_v51  ;;  %v5555_v24 = vsel %vm2027_vm8, %v6309_v9, 0.0 }
 0x651   :  { %vm1996_vm15 = vcmp.gt.f32.partialorder %v1932_v57, 0.0  ;;  %v1979_v58 = vpop.xlane.xlu1 %1978  ;;  %2072 = vadd.xlane.f32.xlu0 %v5555_v24  ;;  %v1901_v61 = vpop.xlane.xlu0 %1900 }
 0x652   :  { %v2012_v40 = vsel %vm1996_vm15, %v1979_v58, %v5412_v25  ;;  %v1917_v50 = vsub.f32 %v5388_v38, %v1901_v61 }
 0x653   :  { %vm2028_vm5 = vcmp.ge.f32.partialorder %v6310_v8, %v2012_v40 }
 0x654   :  { %v5562_v62 = vsel %vm2028_vm5, %v6310_v8, 0.0  ;;  %v1933_v51 = vsel %vm1805_vm14, %v1917_v50, %v5388_v38 }
 0x655   :  { %2074 = vadd.xlane.f32.xlu1 %v5562_v62  ;;  %vm1997_vm7 = vcmp.gt.f32.partialorder %v1933_v51, 0.0  ;;  %v1981_v59 = vpop.xlane.xlu0 %1980 }
 0x656   :  { %v2013_v16 = vsel %vm1997_vm7, %v1981_v59, %v5401_v12 }
 0x657   :  { %vm2029_vm3 = vcmp.ge.f32.partialorder %v6311_v23, %v2013_v16 }
 0x658   :  { %v5571_v25 = vsel %vm2029_vm3, %v6311_v23, 0.0 }
 0x659   :  { %2076 = vadd.xlane.f32.xlu0 %v5571_v25 }
 0x6a6   :  { %v2047_v56 = vpop.xlane.xlu1 %2046 }
 0x6a7   :  { %v2078_v43 = vadd.f32 1e-08, %v2047_v56 }
 0x6a9   :  { %2342 = vrcp.f32 %v2078_v43 }
 0x6aa   :  { %v2049_v47 = vpop.xlane.xlu0 %2048 }
 0x6ab   :  { %v2079_v4 = vadd.f32 1e-08, %v2049_v47 }
 0x6ad   :  { %2344 = vrcp.f32 %v2079_v4 }
 0x6ae   :  { %v2051_v38 = vpop.xlane.xlu1 %2050 }
 0x6af   :  { %v2080_v20 = vadd.f32 1e-08, %v2051_v38 }
 0x6b1   :  { %2346 = vrcp.f32 %v2080_v20 }
 0x6b2   :  { %v2053_v46 = vpop.xlane.xlu0 %2052 }
 0x6b3   :  { %v2081_v32 = vadd.f32 1e-08, %v2053_v46 }
 0x6b5   :  { %2348 = vrcp.f32 %v2081_v32 }
 0x6b6   :  { %v2343_v12 = vpop.eup %2342  ;;  %v2055_v54 = vpop.xlane.xlu1 %2054 }
 0x6b7   :  { %v2126_v33 = vmul.f32 %v2343_v12, %v5422_v31  ;;  %v2082_v13 = vadd.f32 1e-08, %v2055_v54 }
 0x6b9   :  { %2142 = vst [vmem:[#allocation7] sm:$0xff] %v2126_v33  ;;  %2350 = vrcp.f32 %v2082_v13 }
 0x6ba   :  { %v2345_v35 = vpop.eup %2344  ;;  %v2057_v49 = vpop.xlane.xlu0 %2056 }
 0x6bb   :  { %v2127_v15 = vmul.f32 %v2345_v35, %v5435_v60  ;;  %v2083_v27 = vadd.f32 1e-08, %v2057_v49 }
 0x6bd   :  { %2143 = vst [vmem:[#allocation7 + $0x8] sm:$0xff] %v2127_v15  ;;  %2352 = vrcp.f32 %v2083_v27 }
 0x6be   :  { %v2347_v2 = vpop.eup %2346  ;;  %v2059_v26 = vpop.xlane.xlu1 %2058 }
 0x6bf   :  { %v2128_v22 = vmul.f32 %v2347_v2, %v5442_v52  ;;  %v2084_v0 = vadd.f32 1e-08, %v2059_v26 }
 0x6c1   :  { %2144 = vst [vmem:[#allocation7 + $0x10] sm:$0xff] %v2128_v22  ;;  %2354 = vrcp.f32 %v2084_v0 }
 0x6c2   :  { %v2349_v44 = vpop.eup %2348  ;;  %v2061_v29 = vpop.xlane.xlu0 %2060 }
 0x6c3   :  { %v2129_v31 = vmul.f32 %v2349_v44, %v5455_v34  ;;  %v2085_v42 = vadd.f32 1e-08, %v2061_v29 }
 0x6c5   :  { %2145 = vst [vmem:[#allocation7 + $0x18] sm:$0xff] %v2129_v31  ;;  %2356 = vrcp.f32 %v2085_v42 }
 0x6c6   :  { %v2351_v1 = vpop.eup %2350  ;;  %v2063_v21 = vpop.xlane.xlu1 %2062 }
 0x6c7   :  { %v2130_v60 = vmul.f32 %v2351_v1, %v5462_v55  ;;  %v2086_v19 = vadd.f32 1e-08, %v2063_v21 }
 0x6c9   :  { %2146 = vst [vmem:[#allocation7 + $0x20] sm:$0xff] %v2130_v60  ;;  %2358 = vrcp.f32 %v2086_v19 }
 0x6ca   :  { %v2353_v10 = vpop.eup %2352  ;;  %v2065_v7 = vpop.xlane.xlu0 %2064 }
 0x6cb   :  { %v2131_v52 = vmul.f32 %v2353_v10, %v5475_v11  ;;  %v2087_v5 = vadd.f32 1e-08, %v2065_v7 }
 0x6cd   :  { %2147 = vst [vmem:[#allocation7 + $0x28] sm:$0xff] %v2131_v52  ;;  %2360 = vrcp.f32 %v2087_v5 }
 0x6ce   :  { %v2355_v30 = vpop.eup %2354  ;;  %v2067_v14 = vpop.xlane.xlu1 %2066 }
 0x6cf   :  { %v2132_v34 = vmul.f32 %v2355_v30, %v5482_v39  ;;  %v2088_v6 = vadd.f32 1e-08, %v2067_v14 }
 0x6d1   :  { %2148 = vst [vmem:[#allocation7 + $0x30] sm:$0xff] %v2132_v34  ;;  %2362 = vrcp.f32 %v2088_v6 }
 0x6d2   :  { %v2357_v45 = vpop.eup %2356  ;;  %v2069_v3 = vpop.xlane.xlu0 %2068 }
 0x6d3   :  { %v2133_v55 = vmul.f32 %v2357_v45, %v5495_v36  ;;  %v2089_v28 = vadd.f32 1e-08, %v2069_v3 }
 0x6d5   :  { %2149 = vst [vmem:[#allocation7 + $0x38] sm:$0xff] %v2133_v55  ;;  %2364 = vrcp.f32 %v2089_v28 }
 0x6d6   :  { %v2359_v63 = vpop.eup %2358  ;;  %v2071_v48 = vpop.xlane.xlu1 %2070 }
 0x6d7   :  { %v2134_v11 = vmul.f32 %v2359_v63, %v5502_v37  ;;  %v2090_v9 = vadd.f32 1e-08, %v2071_v48 }
 0x6d9   :  { %2150 = vst [vmem:[#allocation7 + $0x40] sm:$0xff] %v2134_v11  ;;  %2366 = vrcp.f32 %v2090_v9 }
 0x6da   :  { %v2361_v57 = vpop.eup %2360  ;;  %v2073_v58 = vpop.xlane.xlu0 %2072 }
 0x6db   :  { %v2135_v39 = vmul.f32 %v2361_v57, %v5515_v53  ;;  %v2091_v61 = vadd.f32 1e-08, %v2073_v58 }
 0x6dd   :  { %2151 = vst [vmem:[#allocation7 + $0x48] sm:$0xff] %v2135_v39  ;;  %2368 = vrcp.f32 %v2091_v61 }
 0x6de   :  { %v2363_v40 = vpop.eup %2362  ;;  %v2075_v50 = vpop.xlane.xlu1 %2074 }
 0x6df   :  { %v2136_v36 = vmul.f32 %v2363_v40, %v5522_v17  ;;  %v2092_v8 = vadd.f32 1e-08, %v2075_v50 }
 0x6e1   :  { %2152 = vst [vmem:[#allocation7 + $0x50] sm:$0xff] %v2136_v36  ;;  %2370 = vrcp.f32 %v2092_v8 }
 0x6e2   :  { %v2365_v51 = vpop.eup %2364  ;;  %v2077_v59 = vpop.xlane.xlu0 %2076 }
 0x6e3   :  { %v2137_v37 = vmul.f32 %v2365_v51, %v5535_v18  ;;  %v2093_v16 = vadd.f32 1e-08, %v2077_v59 }
 0x6e5   :  { %2153 = vst [vmem:[#allocation7 + $0x58] sm:$0xff] %v2137_v37  ;;  %2372 = vrcp.f32 %v2093_v16 }
 0x6e6   :  { %v2367_v23 = vpop.eup %2366 }
 0x6e7   :  { %v2138_v53 = vmul.f32 %v2367_v23, %v5542_v41 }
 0x6e9   :  { %2154 = vst [vmem:[#allocation7 + $0x60] sm:$0xff] %v2138_v53 }
 0x6ea   :  { %v2369_v56 = vpop.eup %2368 }
 0x6eb   :  { %v2139_v43 = vmul.f32 %v2369_v56, %v5555_v24 }
 0x6ed   :  { %2155 = vst [vmem:[#allocation7 + $0x68] sm:$0xff] %v2139_v43 }
 0x6ee   :  { %v2371_v47 = vpop.eup %2370 }
 0x6ef   :  { %v2140_v17 = vmul.f32 %v2371_v47, %v5562_v62 }
 0x6f1   :  { %2156 = vst [vmem:[#allocation7 + $0x70] sm:$0xff] %v2140_v17 }
 0x6f2   :  { %v2373_v4 = vpop.eup %2372 }
 0x6f3   :  { %v2141_v18 = vmul.f32 %v2373_v4, %v5571_v25 }
 0x6f5   :  { %2157 = vst [vmem:[#allocation7 + $0x78] sm:$0xff] %v2141_v18 }
 0x6f6   :  { %2425 = shalt.err (!%p2422_p0)
}
 0x6f7   :  { %2169 = dma.vmem_to_hbm [thread:$0]  %s2164_s1, 2048, %s5598_s2, [#allocation4], %s2441_s12, %s2441_s12, %s2442_s13  }
 0x6f8   :  { %2438 = dma.done.wait [#allocation4], 2048  }
 0x6f9   :  { %2439 = vsyncadd [#allocation4], 4294965248 }
 0x6fa   :  { %2173 = vsyncpa [#allocation3], 1 }
 0x6fb   :  { %2174 = vsyncpa [#allocation6], 1 }
 0x6fc   :  { %2175 = vsyncpa [#allocation4], 1 }

</bundles_post_ra>
